<compile_context>
chip_gen: v6e
topology: v6e:2x2x1
jax: 0.10.0
libtpu: 0.0.40
codegen_flags: <defaults>
</compile_context>

<pallas_src>
import math
import functools
import numpy as np

import jax
import jax.numpy as jnp
from jax.experimental import pallas as pl
from jax.experimental.pallas import tpu as pltpu


# ----------------------------------------------------------------------------
# Constants / helpers
# ----------------------------------------------------------------------------

# torch nn.RMSNorm(eps=None) uses torch.finfo(float32).eps; nn.LayerNorm default 1e-5.
_RMS_EPS = 1.1920929e-07
_LN_EPS = 1e-5

_VMEM_FLOOR = 32 * 1024 * 1024
_VMEM_CAP = 64 * 1024 * 1024          # v7x has 64 MiB / TensorCore; valid everywhere


def _round_up(v, m):
    return ((v + m - 1) // m) * m


def _row_tiles(n, cap=256):
    """Row tile (multiple of 8) aiming for >=2 grid steps (megacore), <=cap."""
    n8 = _round_up(n, 8)
    if n8 <= 8:
        return n8, n8
    tn = min(cap, _round_up((n8 + 1) // 2, 8))
    npad = _round_up(n8, tn)
    return tn, npad


def _attn_tile(n, ball_size, cap=256):
    """Largest tile <= cap that is a multiple of ball_size and 8 and divides n."""
    assert n % ball_size == 0, "node count must be a multiple of the ball size"
    best = None
    c = ball_size
    while c <= min(n, cap):
        if n % c == 0 and c % 8 == 0:
            best = c
        c += ball_size
    if best is None:
        best = n  # full-extent block (always legal)
    if n // best == 1:
        half = best // 2
        if half >= 32 and half % ball_size == 0 and half % 8 == 0 and n % half == 0:
            best = half
    return best


def _mlp_hid_tile(hid, cap=512):
    """Hidden-dim tile for the SwiGLU contraction: multiple of 128 dividing hid."""
    if hid <= cap or hid % 128 != 0:
        return hid
    best = 128
    c = 128
    while c <= cap:
        if hid % c == 0:
            best = c
        c += 128
    return best


def _nbytes(shape_or_arr, dtype=None):
    if dtype is None:
        a = shape_or_arr
        return int(np.prod(a.shape)) * np.dtype(a.dtype).itemsize
    return int(np.prod(shape_or_arr)) * np.dtype(dtype).itemsize


def _cp(semantics, est_bytes=None):
    """CompilerParams with an explicit scoped-VMEM limit sized from block shapes."""
    kw = dict(dimension_semantics=semantics)
    if est_bytes is not None:
        kw["vmem_limit_bytes"] = int(min(_VMEM_CAP, max(_VMEM_FLOOR, 2 * est_bytes)))
    return pltpu.CompilerParams(**kw)


# ----------------------------------------------------------------------------
# Simple fused kernels (embedding / MPNN / pooling / unpooling)
# ----------------------------------------------------------------------------

def _linear_kernel(x_ref, w_ref, b_ref, o_ref):
    y = jnp.dot(x_ref[...], w_ref[...], preferred_element_type=jnp.float32) + b_ref[...]
    o_ref[...] = y.astype(o_ref.dtype)


def linear_pallas(x, w, b):
    n, din = x.shape
    dout = w.shape[1]
    tn, npad = _row_tiles(n)
    xp = x if npad == n else jnp.pad(x, ((0, npad - n), (0, 0)))
    out = pl.pallas_call(
        _linear_kernel,
        out_shape=jax.ShapeDtypeStruct((npad, dout), x.dtype),
        grid=(npad // tn,),
        in_specs=[pl.BlockSpec((tn, din), lambda i: (i, 0)),
                  pl.BlockSpec((din, dout), lambda i: (0, 0)),
                  pl.BlockSpec((1, dout), lambda i: (0, 0))],
        out_specs=pl.BlockSpec((tn, dout), lambda i: (i, 0)),
        compiler_params=_cp(("parallel",)),
    )(xp, w, b.reshape(1, dout))
    return out[:n] if npad != n else out


def _lin_gelu_ln_kernel(x_ref, w_ref, b_ref, g_ref, beta_ref, o_ref):
    """Fused MPNN message path: Linear -> GELU -> LayerNorm."""
    y = jnp.dot(x_ref[...], w_ref[...], preferred_element_type=jnp.float32) + b_ref[...]
    # TODO(synk): torch nn.GELU() is exact-erf; tanh approximation used in-kernel
    # (guaranteed Mosaic lowering, ~1e-3 max deviation).
    c = math.sqrt(2.0 / math.pi)
    y = 0.5 * y * (1.0 + jnp.tanh(c * (y + 0.044715 * y * y * y)))
    mu = jnp.mean(y, axis=-1, keepdims=True)
    yc = y - mu
    var = jnp.mean(yc * yc, axis=-1, keepdims=True)
    o_ref[...] = (yc * jax.lax.rsqrt(var + _LN_EPS) * g_ref[...] + beta_ref[...]).astype(o_ref.dtype)


def lin_gelu_ln_pallas(x, w, b, g, beta):
    n, din = x.shape
    dout = w.shape[1]
    tn, npad = _row_tiles(n)
    xp = x if npad == n else jnp.pad(x, ((0, npad - n), (0, 0)))
    out = pl.pallas_call(
        _lin_gelu_ln_kernel,
        out_shape=jax.ShapeDtypeStruct((npad, dout), x.dtype),
        grid=(npad // tn,),
        in_specs=[pl.BlockSpec((tn, din), lambda i: (i, 0)),
                  pl.BlockSpec((din, dout), lambda i: (0, 0)),
                  pl.BlockSpec((1, dout), lambda i: (0, 0)),
                  pl.BlockSpec((1, dout), lambda i: (0, 0)),
                  pl.BlockSpec((1, dout), lambda i: (0, 0))],
        out_specs=pl.BlockSpec((tn, dout), lambda i: (i, 0)),
        compiler_params=_cp(("parallel",)),
    )(xp, w, b.reshape(1, dout), g.reshape(1, dout), beta.reshape(1, dout))
    return out[:n] if npad != n else out


def _lin_ln_res_kernel(x_ref, res_ref, w_ref, b_ref, g_ref, beta_ref, o_ref):
    """Fused MPNN update path: out = res + LayerNorm(Linear(x))."""
    y = jnp.dot(x_ref[...], w_ref[...], preferred_element_type=jnp.float32) + b_ref[...]
    mu = jnp.mean(y, axis=-1, keepdims=True)
    yc = y - mu
    var = jnp.mean(yc * yc, axis=-1, keepdims=True)
    y = yc * jax.lax.rsqrt(var + _LN_EPS) * g_ref[...] + beta_ref[...]
    o_ref[...] = (res_ref[...].astype(jnp.float32) + y).astype(o_ref.dtype)


def lin_ln_residual_pallas(x, res, w, b, g, beta):
    n, din = x.shape
    dout = w.shape[1]
    tn, npad = _row_tiles(n)
    if npad != n:
        x = jnp.pad(x, ((0, npad - n), (0, 0)))
        res = jnp.pad(res, ((0, npad - n), (0, 0)))
    out = pl.pallas_call(
        _lin_ln_res_kernel,
        out_shape=jax.ShapeDtypeStruct((npad, dout), res.dtype),
        grid=(npad // tn,),
        in_specs=[pl.BlockSpec((tn, din), lambda i: (i, 0)),
                  pl.BlockSpec((tn, dout), lambda i: (i, 0)),
                  pl.BlockSpec((din, dout), lambda i: (0, 0)),
                  pl.BlockSpec((1, dout), lambda i: (0, 0)),
                  pl.BlockSpec((1, dout), lambda i: (0, 0)),
                  pl.BlockSpec((1, dout), lambda i: (0, 0))],
        out_specs=pl.BlockSpec((tn, dout), lambda i: (i, 0)),
        compiler_params=_cp(("parallel",)),
    )(x, res, w, b.reshape(1, dout), g.reshape(1, dout), beta.reshape(1, dout))
    return out[:n] if npad != n else out


def _linear_rmsnorm_kernel(x_ref, w_ref, b_ref, g_ref, o_ref):
    """Fused ball pooling: Linear -> RMSNorm."""
    y = jnp.dot(x_ref[...], w_ref[...], preferred_element_type=jnp.float32) + b_ref[...]
    ms = jnp.mean(y * y, axis=-1, keepdims=True)
    o_ref[...] = (y * jax.lax.rsqrt(ms + _RMS_EPS) * g_ref[...]).astype(o_ref.dtype)


def linear_rmsnorm_pallas(x, w, b, g):
    n, din = x.shape
    dout = w.shape[1]
    tn, npad = _row_tiles(n)
    xp = x if npad == n else jnp.pad(x, ((0, npad - n), (0, 0)))
    out = pl.pallas_call(
        _linear_rmsnorm_kernel,
        out_shape=jax.ShapeDtypeStruct((npad, dout), x.dtype),
        grid=(npad // tn,),
        in_specs=[pl.BlockSpec((tn, din), lambda i: (i, 0)),
                  pl.BlockSpec((din, dout), lambda i: (0, 0)),
                  pl.BlockSpec((1, dout), lambda i: (0, 0)),
                  pl.BlockSpec((1, dout), lambda i: (0, 0))],
        out_specs=pl.BlockSpec((tn, dout), lambda i: (i, 0)),
        compiler_params=_cp(("parallel",)),
    )(xp, w, b.reshape(1, dout), g.reshape(1, dout))
    return out[:n] if npad != n else out


def _add_rmsnorm_kernel(a_ref, d_ref, g_ref, o_ref):
    """Fused ball unpooling: RMSNorm(children.x + delta)."""
    s = a_ref[...].astype(jnp.float32) + d_ref[...].astype(jnp.float32)
    ms = jnp.mean(s * s, axis=-1, keepdims=True)
    o_ref[...] = (s * jax.lax.rsqrt(ms + _RMS_EPS) * g_ref[...]).astype(o_ref.dtype)


def add_rmsnorm_pallas(a, delta, g):
    n, d = a.shape
    tn, npad = _row_tiles(n)
    if npad != n:
        a = jnp.pad(a, ((0, npad - n), (0, 0)))
        delta = jnp.pad(delta, ((0, npad - n), (0, 0)))
    out = pl.pallas_call(
        _add_rmsnorm_kernel,
        out_shape=jax.ShapeDtypeStruct((npad, d), a.dtype),
        grid=(npad // tn,),
        in_specs=[pl.BlockSpec((tn, d), lambda i: (i, 0)),
                  pl.BlockSpec((tn, d), lambda i: (i, 0)),
                  pl.BlockSpec((1, d), lambda i: (0, 0))],
        out_specs=pl.BlockSpec((tn, d), lambda i: (i, 0)),
        compiler_params=_cp(("parallel",)),
    )(a, delta, g.reshape(1, d))
    return out[:n] if npad != n else out


# ----------------------------------------------------------------------------
# Fused attention block kernel (RMSNorm + rel-pos PE + qkv + banded BMSA + proj + residual)
# ----------------------------------------------------------------------------

def _attn_block_kernel(x_ref, pos_ref, g_ref, pew_ref, peb_ref, qkvw_ref, qkvb_ref,
                       projw_ref, projb_ref, sig_ref, o_ref, attn_vmem,
                       *, num_heads, ball_size, banded):
    xr = x_ref[...].astype(jnp.float32)              # (T, D) residual
    t, d = xr.shape
    e = d // num_heads
    dim3 = pos_ref.shape[-1]
    pos = pos_ref[...].astype(jnp.float32)

    # --- RMSNorm (pre-attention), f32 ---
    ms = jnp.mean(xr * xr, axis=-1, keepdims=True)
    h = xr * jax.lax.rsqrt(ms + _RMS_EPS) * g_ref[...]

    # --- relative position wrt ball center ---
    if banded:
        nb = t // ball_size
        posb = pos.reshape(nb, ball_size, dim3)
        relb = posb - jnp.mean(posb, axis=1, keepdims=True)      # reshape-mean centers
        rel = relb.reshape(t, dim3)
    else:
        rows = jax.lax.broadcasted_iota(jnp.int32, (t, t), 0) // ball_size
        cols = jax.lax.broadcasted_iota(jnp.int32, (t, t), 1) // ball_size
        same = rows == cols
        avg = same.astype(jnp.float32) * (1.0 / ball_size)
        rel = pos - jnp.dot(avg, pos, preferred_element_type=jnp.float32)

    h = h + jnp.dot(rel.astype(jnp.bfloat16), pew_ref[...],
                    preferred_element_type=jnp.float32) + peb_ref[...]

    # --- fused qkv projection (bf16 MXU operands, f32 accumulation) ---
    qkv = jnp.dot(h.astype(jnp.bfloat16), qkvw_ref[...],
                  preferred_element_type=jnp.float32) + qkvb_ref[...]    # (T, 3D)

    scale = 1.0 / math.sqrt(e)

    if banded:
        # --- banded pairwise distances: only (nb, bs, bs) entries, no cross-ball mask ---
        pr = relb * relb
        rn = jnp.sum(pr, axis=-1, keepdims=True)                                   # (nb,bs,1)
        ones_row = jnp.ones((nb, 1, dim3), jnp.float32)
        cn = jax.lax.dot_general(ones_row, pr, (((2,), (2,)), ((0,), (0,))),
                                 preferred_element_type=jnp.float32)               # (nb,1,bs)
        gram = jax.lax.dot_general(relb, relb, (((2,), (2,)), ((0,), (0,))),
                                   preferred_element_type=jnp.float32)             # (nb,bs,bs)
        dist = jnp.sqrt(jnp.maximum(rn + cn - 2.0 * gram, 0.0))

        for hh in range(num_heads):
            q = qkv[:, hh * e:(hh + 1) * e].astype(jnp.bfloat16).reshape(nb, ball_size, e)
            k = qkv[:, d + hh * e: d + (hh + 1) * e].astype(jnp.bfloat16).reshape(nb, ball_size, e)
            v = qkv[:, 2 * d + hh * e: 2 * d + (hh + 1) * e].astype(jnp.bfloat16).reshape(nb, ball_size, e)
            s = jax.lax.dot_general(q, k, (((2,), (2,)), ((0,), (0,))),
                                    preferred_element_type=jnp.float32) * scale
            s = s + sig_ref[hh] * dist                       # sigma (SMEM scalar) * cdist bias
            s = s - jnp.max(s, axis=-1, keepdims=True)
            p = jnp.exp(s)
            p = p * pl.reciprocal(jnp.sum(p, axis=-1, keepdims=True), approx=True)
            ob = jax.lax.dot_general(p.astype(jnp.bfloat16), v, (((2,), (1,)), ((0,), (0,))),
                                     preferred_element_type=jnp.float32)           # (nb,bs,e)
            attn_vmem[:, hh * e:(hh + 1) * e] = ob.reshape(t, e)
    else:
        # Dense masked fallback (only used when ball_size % 8 != 0).
        pp = pos * pos
        rn = jnp.sum(pp, axis=-1, keepdims=True)
        ones = jnp.ones((1, dim3), jnp.float32)
        cn = jax.lax.dot_general(ones, pp, (((1,), (1,)), ((), ())),
                                 preferred_element_type=jnp.float32)
        gram = jax.lax.dot_general(pos, pos, (((1,), (1,)), ((), ())),
                                   preferred_element_type=jnp.float32)
        dist = jnp.sqrt(jnp.maximum(rn + cn - 2.0 * gram, 0.0))
        bias = jnp.where(same, jnp.float32(0.0), jnp.float32(-1e30))
        for hh in range(num_heads):
            q = qkv[:, hh * e:(hh + 1) * e].astype(jnp.bfloat16)
            k = qkv[:, d + hh * e: d + (hh + 1) * e].astype(jnp.bfloat16)
            v = qkv[:, 2 * d + hh * e: 2 * d + (hh + 1) * e].astype(jnp.bfloat16)
            s = jax.lax.dot_general(q, k, (((1,), (1,)), ((), ())),
                                    preferred_element_type=jnp.float32) * scale
            s = s + sig_ref[hh] * dist + bias
            s = s - jnp.max(s, axis=-1, keepdims=True)
            p = jnp.exp(s)
            p = p * pl.reciprocal(jnp.sum(p, axis=-1, keepdims=True), approx=True)
            attn_vmem[:, hh * e:(hh + 1) * e] = jnp.dot(p.astype(jnp.bfloat16), v,
                                                        preferred_element_type=jnp.float32)

    # --- output projection + residual (single dense MXU matmul over all heads) ---
    y = jnp.dot(attn_vmem[...].astype(jnp.bfloat16), projw_ref[...],
                preferred_element_type=jnp.float32) + projb_ref[...]
    o_ref[...] = (xr + y).astype(o_ref.dtype)


def attn_block_pallas(x, pos, bp, num_heads, ball_size):
    n, d = x.shape
    dim3 = pos.shape[1]
    banded = (ball_size % 8 == 0)
    cap = 256 if banded else max(128, ball_size)
    t = _attn_tile(n, ball_size, cap)
    kernel = functools.partial(_attn_block_kernel, num_heads=num_heads,
                               ball_size=ball_size, banded=banded)
    est = (2 * (2 * _nbytes((t, d), x.dtype) + _nbytes((t, dim3), pos.dtype))
           + 2 * (_nbytes(bp['qkv_w']) + _nbytes(bp['proj_w']) + _nbytes(bp['pe_w'])
                  + 4 * 6 * d)
           + _nbytes((t, d), jnp.float32))
    return pl.pallas_call(
        kernel,
        out_shape=jax.ShapeDtypeStruct((n, d), x.dtype),
        grid=(n // t,),
        in_specs=[
            pl.BlockSpec((t, d), lambda i: (i, 0)),            # x (residual)
            pl.BlockSpec((t, dim3), lambda i: (i, 0)),         # positions
            pl.BlockSpec((1, d), lambda i: (0, 0)),            # norm1 gamma
            pl.BlockSpec((dim3, d), lambda i: (0, 0)),         # pe W (bf16)
            pl.BlockSpec((1, d), lambda i: (0, 0)),            # pe b
            pl.BlockSpec((d, 3 * d), lambda i: (0, 0)),        # qkv W (bf16, head-grouped)
            pl.BlockSpec((1, 3 * d), lambda i: (0, 0)),        # qkv b
            pl.BlockSpec((d, d), lambda i: (0, 0)),            # out-proj W (bf16)
            pl.BlockSpec((1, d), lambda i: (0, 0)),            # out-proj b
            pl.BlockSpec(memory_space=pltpu.MemorySpace.SMEM), # sigma per head (scalars)
        ],
        out_specs=pl.BlockSpec((t, d), lambda i: (i, 0)),
        scratch_shapes=[pltpu.VMEM((t, d), jnp.float32)],      # head-output staging
        input_output_aliases={0: 0},                           # residual in-place
        compiler_params=_cp(("parallel",), est),
    )(x, pos, bp['norm1_g'].reshape(1, d), bp['pe_w'], bp['pe_b'].reshape(1, d),
      bp['qkv_w'], bp['qkv_b'].reshape(1, 3 * d), bp['proj_w'], bp['proj_b'].reshape(1, d),
      bp['sigma'])


# ----------------------------------------------------------------------------
# Fused MLP block kernel (RMSNorm + SwiGLU + residual), hidden-dim tiled
# ----------------------------------------------------------------------------

def _mlp_block_kernel(x_ref, g_ref, w1_ref, b1_ref, w2_ref, b2_ref, w3_ref, b3_ref,
                      o_ref, acc_ref):
    xr = x_ref[...].astype(jnp.float32)
    ms = jnp.mean(xr * xr, axis=-1, keepdims=True)
    h = (xr * jax.lax.rsqrt(ms + _RMS_EPS) * g_ref[...]).astype(jnp.bfloat16)

    h1 = jnp.dot(h, w1_ref[...], preferred_element_type=jnp.float32) + b1_ref[...]
    h2 = jnp.dot(h, w2_ref[...], preferred_element_type=jnp.float32) + b2_ref[...]
    z = h2 * (h1 * (1.0 / (1.0 + jnp.exp(-h1))))          # w2(x) * SiLU(w1(x))
    part = jnp.dot(z.astype(jnp.bfloat16), w3_ref[...], preferred_element_type=jnp.float32)

    @pl.when(pl.program_id(1) == 0)
    def _():
        acc_ref[...] = xr + b3_ref[...]

    acc_ref[...] += part

    @pl.when(pl.program_id(1) == pl.num_programs(1) - 1)
    def _():
        o_ref[...] = acc_ref[...].astype(o_ref.dtype)


def mlp_block_pallas(x, bp):
    n, d = x.shape
    hid = bp['w1_w'].shape[1]
    tn, npad = _row_tiles(n, cap=256)
    tk = _mlp_hid_tile(hid)
    nk = hid // tk
    xp = x if npad == n else jnp.pad(x, ((0, npad - n), (0, 0)))
    est = (2 * 2 * _nbytes((tn, d), x.dtype)
           + 2 * (2 * _nbytes((d, tk), jnp.bfloat16) + _nbytes((tk, d), jnp.bfloat16)
                  + 4 * (2 * tk + 2 * d))
           + _nbytes((tn, d), jnp.float32))
    out = pl.pallas_call(
        _mlp_block_kernel,
        out_shape=jax.ShapeDtypeStruct((npad, d), x.dtype),
        grid=(npad // tn, nk),
        in_specs=[
            pl.BlockSpec((tn, d), lambda i, k: (i, 0)),
            pl.BlockSpec((1, d), lambda i, k: (0, 0)),
            pl.BlockSpec((d, tk), lambda i, k: (0, k)),
            pl.BlockSpec((1, tk), lambda i, k: (0, k)),
            pl.BlockSpec((d, tk), lambda i, k: (0, k)),
            pl.BlockSpec((1, tk), lambda i, k: (0, k)),
            pl.BlockSpec((tk, d), lambda i, k: (k, 0)),
            pl.BlockSpec((1, d), lambda i, k: (0, 0)),
        ],
        out_specs=pl.BlockSpec((tn, d), lambda i, k: (i, 0)),
        scratch_shapes=[pltpu.VMEM((tn, d), jnp.float32)],
        input_output_aliases={0: 0},
        compiler_params=_cp(("parallel", "arbitrary"), est),
    )(xp, bp['norm2_g'].reshape(1, d), bp['w1_w'], bp['w1_b'].reshape(1, hid),
      bp['w2_w'], bp['w2_b'].reshape(1, hid), bp['w3_w'], bp['w3_b'].reshape(1, d))
    return out[:n] if npad != n else out


# ----------------------------------------------------------------------------
# Parameters (deterministic init, mirroring torch _init_weights)
# ----------------------------------------------------------------------------

class KeyGen:
    def __init__(self, seed):
        self._key = jax.random.PRNGKey(seed)

    def __call__(self):
        self._key, sub = jax.random.split(self._key)
        return sub


def _trunc_normal(key, shape, std=0.02):
    # torch trunc_normal_(std=0.02, a=-2, b=2): bounds are +/-100 sigma -> plain normal
    return (std * jax.random.normal(key, shape)).astype(jnp.float32)


def make_linear(kg, din, dout):
    return _trunc_normal(kg(), (din, dout)), jnp.zeros((dout,), jnp.float32)


def make_block_params(kg, dim, heads, mlp_ratio, dim3):
    hid = dim * mlp_ratio
    e = dim // heads
    pe_w, pe_b = make_linear(kg, dim3, dim)
    qkv_w, qkv_b = make_linear(kg, dim, 3 * dim)
    # Permute qkv output columns ONCE so the kernel reads [Q_heads | K_heads | V_heads]
    # contiguously; mathematically identical to the original "(H E K)" rearrange.
    perm = jnp.asarray(np.arange(3 * dim).reshape(heads, e, 3)
                       .transpose(2, 0, 1).reshape(-1))
    qkv_w = qkv_w[:, perm]
    qkv_b = qkv_b[perm]
    proj_w, proj_b = make_linear(kg, dim, dim)
    w1_w, w1_b = make_linear(kg, dim, hid)
    w2_w, w2_b = make_linear(kg, dim, hid)
    w3_w, w3_b = make_linear(kg, hid, dim)
    # Weight matrices stored in bf16 (MXU operands); biases / gains / sigma stay f32.
    return dict(
        norm1_g=jnp.ones((dim,), jnp.float32),
        norm2_g=jnp.ones((dim,), jnp.float32),
        pe_w=pe_w.astype(jnp.bfloat16), pe_b=pe_b,
        qkv_w=qkv_w.astype(jnp.bfloat16), qkv_b=qkv_b,
        proj_w=proj_w.astype(jnp.bfloat16), proj_b=proj_b,
        sigma=(-1.0 + 0.01 * jax.random.normal(kg(), (heads,))).astype(jnp.float32),
        w1_w=w1_w.astype(jnp.bfloat16), w1_b=w1_b,
        w2_w=w2_w.astype(jnp.bfloat16), w2_b=w2_b,
        w3_w=w3_w.astype(jnp.bfloat16), w3_b=w3_b,
    )


def make_params(cfg, seed=0):
    kg = KeyGen(seed)
    c_in, ch, dim3, mlp = cfg['c_in'], cfg['c_hidden'], cfg['dimensionality'], cfg['mlp_ratio']
    params = {}
    lin_w, lin_b = make_linear(kg, c_in, ch[0])
    mpnn = []
    for _ in range(cfg['mp_steps']):
        mw, mb = make_linear(kg, 2 * ch[0] + dim3, ch[0])
        uw, ub = make_linear(kg, 2 * ch[0], ch[0])
        mpnn.append(dict(
            msg_w=mw, msg_b=mb,
            msg_ln_g=jnp.ones((ch[0],), jnp.float32), msg_ln_b=jnp.zeros((ch[0],), jnp.float32),
            upd_w=uw, upd_b=ub,
            upd_ln_g=jnp.ones((ch[0],), jnp.float32), upd_ln_b=jnp.zeros((ch[0],), jnp.float32)))
    params['embed'] = dict(lin_w=lin_w, lin_b=lin_b, mpnn=mpnn)

    num_layers = len(cfg['enc_depths']) - 1
    enc = []
    for i in range(num_layers):
        blocks = [make_block_params(kg, ch[i], cfg['enc_num_heads'][i], mlp, dim3)
                  for _ in range(cfg['enc_depths'][i])]
        s = cfg['strides'][i]
        pw, pb = make_linear(kg, s * ch[i] + s * dim3, ch[i + 1])
        enc.append(dict(blocks=blocks,
                        pool=dict(proj_w=pw, proj_b=pb,
                                  norm_g=jnp.ones((ch[i + 1],), jnp.float32))))
    params['encoder'] = enc
    params['bottleneck'] = dict(blocks=[
        make_block_params(kg, ch[-1], cfg['enc_num_heads'][-1], mlp, dim3)
        for _ in range(cfg['enc_depths'][-1])])
    if cfg['decode']:
        dec = []
        for i in range(num_layers - 1, -1, -1):
            s = cfg['strides'][i]
            uw, ub = make_linear(kg, ch[i + 1] + s * dim3, s * ch[i])
            blocks = [make_block_params(kg, ch[i], cfg['dec_num_heads'][i], mlp, dim3)
                      for _ in range(cfg['dec_depths'][i])]
            dec.append(dict(unpool=dict(proj_w=uw, proj_b=ub,
                                        norm_g=jnp.ones((ch[i],), jnp.float32)),
                            blocks=blocks))
        params['decoder'] = dec
    return params


# ----------------------------------------------------------------------------
# Model forward (JAX glue around Pallas kernels)
# ----------------------------------------------------------------------------

def mpnn_forward(h, pos, edge_index, step_params):
    row, col = edge_index[0], edge_index[1]
    edge_attr = pos[row] - pos[col]
    n = h.shape[0]
    for sp in step_params:
        msg_in = jnp.concatenate([h[row], h[col], edge_attr], axis=-1)
        msg = lin_gelu_ln_pallas(msg_in, sp['msg_w'], sp['msg_b'],
                                 sp['msg_ln_g'], sp['msg_ln_b'])
        # scatter_mean over receiving nodes (irregular scatter -> plain JAX segment_sum)
        sums = jax.ops.segment_sum(msg, col, num_segments=n)
        cnt = jax.ops.segment_sum(jnp.ones((col.shape[0],), h.dtype), col, num_segments=n)
        mean = sums / jnp.maximum(cnt, 1.0)[:, None]
        upd_in = jnp.concatenate([h, mean], axis=-1)
        h = lin_ln_residual_pallas(upd_in, h, sp['upd_w'], sp['upd_b'],
                                   sp['upd_ln_g'], sp['upd_ln_b'])
    return h


def erwin_block_forward(x, pos, bp, num_heads, ball_size):
    # x = x + proj(BMSA(RMSNorm(x), pos));   x = x + SwiGLU(RMSNorm(x))
    x = attn_block_pallas(x, pos, bp, num_heads, ball_size)
    x = mlp_block_pallas(x, bp)
    return x


def ball_pooling(node, pp, stride, dim3):
    if stride == 1:
        return dict(x=node['x'], pos=node['pos'], batch_idx=node['batch_idx'], children=None)
    x, pos, batch = node['x'], node['pos'], node['batch_idx']
    nb = x.shape[0] // stride
    posr = pos.reshape(nb, stride, dim3)
    centers = posr.mean(axis=1)
    rel = (posr - centers[:, None, :]).reshape(nb, stride * dim3)
    xin = jnp.concatenate([x.reshape(nb, stride * x.shape[1]), rel], axis=1)
    xnew = linear_rmsnorm_pallas(xin, pp['proj_w'], pp['proj_b'], pp['norm_g'])
    return dict(x=xnew, pos=centers, batch_idx=batch[::stride], children=node)


def ball_unpooling(node, up, stride, out_dim, dim3):
    children = node['children']
    nb = node['x'].shape[0]
    rel = (children['pos'].reshape(nb, stride, dim3) - node['pos'][:, None, :])
    rel = rel.reshape(nb, stride * dim3)
    xin = jnp.concatenate([node['x'], rel], axis=-1)
    delta = linear_pallas(xin, up['proj_w'], up['proj_b']).reshape(nb * stride, out_dim)
    cx = add_rmsnorm_pallas(children['x'], delta, up['norm_g'])
    out = dict(children)
    out['x'] = cx
    return out


def basic_layer_forward(node, lp, direction, stride, num_heads, ball_size, out_dim, dim3):
    if direction == 'up':
        node = ball_unpooling(node, lp['unpool'], stride, out_dim, dim3)
    x = node['x']
    for bp in lp['blocks']:
        x = erwin_block_forward(x, node['pos'], bp, num_heads, ball_size)
    node = dict(node)
    node['x'] = x
    if direction == 'down':
        node = ball_pooling(node, lp['pool'], stride, dim3)
    return node


def erwin_forward(params, cfg, node_features, node_positions, batch_idx, edge_index, tree_idx):
    """Returns per-node features in ball-tree order (unsorting done by the caller)."""
    ch, bs, st, dim3 = cfg['c_hidden'], cfg['ball_sizes'], cfg['strides'], cfg['dimensionality']
    if cfg['use_embedding']:
        x = linear_pallas(node_features, params['embed']['lin_w'], params['embed']['lin_b'])
        if cfg['mp_steps'] > 0:
            x = mpnn_forward(x, node_positions, edge_index, params['embed']['mpnn'])
    else:
        x = node_features
    node = dict(x=x[tree_idx], pos=node_positions[tree_idx],
                batch_idx=batch_idx[tree_idx], children=None)
    num_layers = len(cfg['enc_depths']) - 1
    # TODO(synk): rotate=0 here, so rotated-ball blocks / tree_idx_rot are unused.
    for i in range(num_layers):
        node = basic_layer_forward(node, params['encoder'][i], 'down', st[i],
                                   cfg['enc_num_heads'][i], bs[i], ch[i + 1], dim3)
    node = basic_layer_forward(node, params['bottleneck'], None, None,
                               cfg['enc_num_heads'][-1], bs[-1], ch[-1], dim3)
    if cfg['decode']:
        for j, i in enumerate(range(num_layers - 1, -1, -1)):
            node = basic_layer_forward(node, params['decoder'][j], 'up', st[i],
                                       cfg['dec_num_heads'][i], bs[i], ch[i], dim3)
        return node['x']
    return node['x'], node['batch_idx']


# ----------------------------------------------------------------------------
# Host-side preprocessing (torch.no_grad() equivalents)
# ----------------------------------------------------------------------------

def build_balltree_numpy(pos_np):
    # TODO(synk): build_balltree_with_rotations (C++ ball tree + rotated trees) and
    # torch_cluster.radius_graph are host-side preprocessing with no Pallas equivalent;
    # a simplified median-split ball tree is built here and edge_index is supplied explicitly.
    n = pos_np.shape[0]
    assert (n & (n - 1)) == 0, "demo assumes power-of-two point count (no padding)"

    def rec(ind):
        if len(ind) <= 1:
            return ind
        spread = pos_np[ind].max(axis=0) - pos_np[ind].min(axis=0)
        d = int(np.argmax(spread))
        order = ind[np.argsort(pos_np[ind, d], kind='stable')]
        half = len(order) // 2
        return np.concatenate([rec(order[:half]), rec(order[half:])])

    tree_idx = rec(np.arange(n)).astype(np.int32)
    tree_mask = np.ones((n,), dtype=bool)
    return tree_idx, tree_mask


# ----------------------------------------------------------------------------
# Main
# ----------------------------------------------------------------------------

if __name__ == "__main__":
    CFG = dict(c_in=4, c_hidden=[16, 32], ball_sizes=[8, 8],
               enc_num_heads=[2, 2], enc_depths=[1, 1],
               dec_num_heads=[2], dec_depths=[1], strides=[2],
               rotate=0, decode=True, mlp_ratio=4, dimensionality=3,
               mp_steps=1, use_embedding=True)

    key = jax.random.PRNGKey(0)
    kf, kp = jax.random.split(key)
    N = 64
    node_features = jax.random.normal(kf, (N, CFG['c_in']), jnp.float32)
    node_positions = jax.random.uniform(kp, (N, CFG['dimensionality']), jnp.float32)
    batch_idx = jnp.zeros((N,), jnp.int32)

    # explicit edge_index (self loops + bidirectional ring), 192 edges
    ar = jnp.arange(N, dtype=jnp.int32)
    src = jnp.concatenate([ar, ar, (ar + 1) % N])
    dst = jnp.concatenate([ar, (ar + 1) % N, ar])
    edge_index = jnp.stack([src, dst])

    ti_np, tm_np = build_balltree_numpy(np.asarray(node_positions))
    tree_idx = jnp.asarray(ti_np)
    tree_mask = jnp.asarray(tm_np)

    params = make_params(CFG, seed=0)

    fwd = jax.jit(lambda p, nf, npos, bi, ei, ti: erwin_forward(p, CFG, nf, npos, bi, ei, ti))
    x_tree = fwd(params, node_features, node_positions, batch_idx, edge_index, tree_idx)
    x_tree = jax.block_until_ready(x_tree)

    # node.x[tree_mask][argsort(tree_idx[tree_mask])]  (dynamic-shape masking done eagerly)
    x_masked = x_tree[tree_mask]
    out = x_masked[jnp.argsort(tree_idx[tree_mask])]
    out = jax.block_until_ready(out)

    assert out.shape == (N, CFG['c_hidden'][0])
    assert bool(jnp.all(jnp.isfinite(out)))
    print("KERNEL_OK")
</pallas_src>

<mosaic_0001>
module attributes {stable_mosaic.version = 11 : i64} {
  func.func private @main(%arg0: i32) attributes {dimension_semantics = [#tpu.dimension_semantics<core_parallel>], iteration_bounds = array<i64: 2>, tpu.core_type = #tpu.core_type<sc_scalar_subcore>, window_params = []} {
    return
  }
}

module attributes {stable_mosaic.version = 11 : i64} {
  func.func private @main(%arg0: i32) attributes {dimension_semantics = [#tpu.dimension_semantics<core_parallel>], iteration_bounds = array<i64: 2>, tpu.core_type = #tpu.core_type<sc_scalar_subcore>, window_params = []} {
    return
  }
}

module attributes {stable_mosaic.version = 11 : i64} {
  func.func @_linear_kernel(%arg0: i32, %arg1: memref<32x4xf32, #tpu.memory_space<vmem>>, %arg2: memref<4x16xf32, #tpu.memory_space<vmem>>, %arg3: memref<1x16xf32, #tpu.memory_space<vmem>>, %arg4: memref<32x16xf32, #tpu.memory_space<vmem>>) attributes {dimension_semantics = [#tpu.dimension_semantics<parallel>], iteration_bounds = array<i64: 2>, scalar_prefetch = 0 : i64, scratch_operands = 0 : i64, tpu.core_type = #tpu.core_type<tc>, window_params = [{transform_indices = @transform_0, window_bounds = array<i64: 32, 4>}, {pipeline_mode = #tpu.pipeline_mode<synchronous>, transform_indices = @transform_1, window_bounds = array<i64: 4, 16>}, {pipeline_mode = #tpu.pipeline_mode<synchronous>, transform_indices = @transform_2, window_bounds = array<i64: 1, 16>}, {transform_indices = @transform_3, window_bounds = array<i64: 32, 16>}]} {
    %c0 = arith.constant 0 : index
    %c0_0 = arith.constant 0 : index
    %0 = vector.load %arg1[%c0, %c0_0] : memref<32x4xf32, #tpu.memory_space<vmem>>, vector<32x4xf32>
    %c0_1 = arith.constant 0 : index
    %c0_2 = arith.constant 0 : index
    %1 = vector.load %arg2[%c0_1, %c0_2] : memref<4x16xf32, #tpu.memory_space<vmem>>, vector<4x16xf32>
    %cst = arith.constant dense<0.000000e+00> : vector<32x16xf32>
    %2 = tpu.matmul %0, %1, %cst {dimension_numbers = #tpu.dot_dimension_numbers<[1], [0], [0], [1], [0, 0, 1, 1], [], []>} : vector<32x4xf32>, vector<4x16xf32>, vector<32x16xf32> -> vector<32x16xf32>
    %c0_3 = arith.constant 0 : index
    %c0_4 = arith.constant 0 : index
    %3 = vector.load %arg3[%c0_3, %c0_4] : memref<1x16xf32, #tpu.memory_space<vmem>>, vector<1x16xf32>
    %4 = vector.broadcast %3 : vector<1x16xf32> to vector<32x16xf32>
    %5 = arith.addf %2, %4 : vector<32x16xf32>
    %c0_5 = arith.constant 0 : index
    %c0_6 = arith.constant 0 : index
    %6 = vector.load %arg4[%c0_5, %c0_6] : memref<32x16xf32, #tpu.memory_space<vmem>>, vector<32x16xf32>
    tpu.vector_store %arg4[%c0_5, %c0_6], %5 {strides = array<i32>} : memref<32x16xf32, #tpu.memory_space<vmem>>, vector<32x16xf32>,
    return
  }
  func.func @transform_0(%arg0: i32) -> (i32, i32) {
    %c0_i32 = arith.constant 0 : i32
    %c0_i32_0 = arith.constant 0 : i32
    return %arg0, %c0_i32 : i32, i32
  }
  func.func @transform_1(%arg0: i32) -> (i32, i32) {
    %c0_i32 = arith.constant 0 : i32
    %c0_i32_0 = arith.constant 0 : i32
    %c0_i32_1 = arith.constant 0 : i32
    return %c0_i32, %c0_i32_0 : i32, i32
  }
  func.func @transform_2(%arg0: i32) -> (i32, i32) {
    %c0_i32 = arith.constant 0 : i32
    %c0_i32_0 = arith.constant 0 : i32
    %c0_i32_1 = arith.constant 0 : i32
    return %c0_i32, %c0_i32_0 : i32, i32
  }
  func.func @transform_3(%arg0: i32) -> (i32, i32) {
    %c0_i32 = arith.constant 0 : i32
    %c0_i32_0 = arith.constant 0 : i32
    return %arg0, %c0_i32 : i32, i32
  }
}

module attributes {stable_mosaic.version = 11 : i64} {
  func.func @_lin_gelu_ln_kernel(%arg0: i32, %arg1: memref<96x35xf32, #tpu.memory_space<vmem>>, %arg2: memref<35x16xf32, #tpu.memory_space<vmem>>, %arg3: memref<1x16xf32, #tpu.memory_space<vmem>>, %arg4: memref<1x16xf32, #tpu.memory_space<vmem>>, %arg5: memref<1x16xf32, #tpu.memory_space<vmem>>, %arg6: memref<96x16xf32, #tpu.memory_space<vmem>>) attributes {dimension_semantics = [#tpu.dimension_semantics<parallel>], iteration_bounds = array<i64: 2>, scalar_prefetch = 0 : i64, scratch_operands = 0 : i64, tpu.core_type = #tpu.core_type<tc>, window_params = [{transform_indices = @transform_0, window_bounds = array<i64: 96, 35>}, {pipeline_mode = #tpu.pipeline_mode<synchronous>, transform_indices = @transform_1, window_bounds = array<i64: 35, 16>}, {pipeline_mode = #tpu.pipeline_mode<synchronous>, transform_indices = @transform_2, window_bounds = array<i64: 1, 16>}, {pipeline_mode = #tpu.pipeline_mode<synchronous>, transform_indices = @transform_3, window_bounds = array<i64: 1, 16>}, {pipeline_mode = #tpu.pipeline_mode<synchronous>, transform_indices = @transform_4, window_bounds = array<i64: 1, 16>}, {transform_indices = @transform_5, window_bounds = array<i64: 96, 16>}]} {
    %c0 = arith.constant 0 : index
    %c0_0 = arith.constant 0 : index
    %0 = vector.load %arg1[%c0, %c0_0] : memref<96x35xf32, #tpu.memory_space<vmem>>, vector<96x35xf32>
    %c0_1 = arith.constant 0 : index
    %c0_2 = arith.constant 0 : index
    %1 = vector.load %arg2[%c0_1, %c0_2] : memref<35x16xf32, #tpu.memory_space<vmem>>, vector<35x16xf32>
    %cst = arith.constant dense<0.000000e+00> : vector<96x16xf32>
    %2 = tpu.matmul %0, %1, %cst {dimension_numbers = #tpu.dot_dimension_numbers<[1], [0], [0], [1], [0, 0, 1, 1], [], []>} : vector<96x35xf32>, vector<35x16xf32>, vector<96x16xf32> -> vector<96x16xf32>
    %c0_3 = arith.constant 0 : index
    %c0_4 = arith.constant 0 : index
    %3 = vector.load %arg3[%c0_3, %c0_4] : memref<1x16xf32, #tpu.memory_space<vmem>>, vector<1x16xf32>
    %4 = vector.broadcast %3 : vector<1x16xf32> to vector<96x16xf32>
    %5 = arith.addf %2, %4 : vector<96x16xf32>
    %cst_5 = arith.constant 5.000000e-01 : f32
    %6 = vector.broadcast %cst_5 : f32 to vector<96x16xf32>
    %7 = arith.mulf %6, %5 : vector<96x16xf32>
    %cst_6 = arith.constant 4.471500e-02 : f32
    %8 = vector.broadcast %cst_6 : f32 to vector<96x16xf32>
    %9 = arith.mulf %8, %5 : vector<96x16xf32>
    %10 = arith.mulf %9, %5 : vector<96x16xf32>
    %11 = arith.mulf %10, %5 : vector<96x16xf32>
    %12 = arith.addf %5, %11 : vector<96x16xf32>
    %cst_7 = arith.constant 0.797884583 : f32
    %13 = vector.broadcast %cst_7 : f32 to vector<96x16xf32>
    %14 = arith.mulf %13, %12 : vector<96x16xf32>
    %15 = math.tanh %14 : vector<96x16xf32>
    %cst_8 = arith.constant 1.000000e+00 : f32
    %16 = vector.broadcast %cst_8 : f32 to vector<96x16xf32>
    %17 = arith.addf %16, %15 : vector<96x16xf32>
    %18 = arith.mulf %7, %17 : vector<96x16xf32>
    %cst_9 = arith.constant dense<0.000000e+00> : vector<96xf32>
    %19 = vector.multi_reduction <add>, %18, %cst_9 [1] : vector<96x16xf32> to vector<96xf32>
    %20 = vector.shape_cast %19 : vector<96xf32> to vector<96x1xf32>
    %cst_10 = arith.constant 1.600000e+01 : f32
    %21 = vector.broadcast %cst_10 : f32 to vector<96x1xf32>
    %22 = arith.divf %20, %21 : vector<96x1xf32>
    %23 = vector.broadcast %22 : vector<96x1xf32> to vector<96x16xf32>
    %24 = arith.subf %18, %23 : vector<96x16xf32>
    %25 = arith.mulf %24, %24 : vector<96x16xf32>
    %cst_11 = arith.constant dense<0.000000e+00> : vector<96xf32>
    %26 = vector.multi_reduction <add>, %25, %cst_11 [1] : vector<96x16xf32> to vector<96xf32>
    %27 = vector.shape_cast %26 : vector<96xf32> to vector<96x1xf32>
    %cst_12 = arith.constant 1.600000e+01 : f32
    %28 = vector.broadcast %cst_12 : f32 to vector<96x1xf32>
    %29 = arith.divf %27, %28 : vector<96x1xf32>
    %cst_13 = arith.constant 9.99999974E-6 : f32
    %30 = vector.broadcast %cst_13 : f32 to vector<96x1xf32>
    %31 = arith.addf %29, %30 : vector<96x1xf32>
    %32 = math.rsqrt %31 : vector<96x1xf32>
    %33 = vector.broadcast %32 : vector<96x1xf32> to vector<96x16xf32>
    %34 = arith.mulf %24, %33 : vector<96x16xf32>
    %c0_14 = arith.constant 0 : index
    %c0_15 = arith.constant 0 : index
    %35 = vector.load %arg4[%c0_14, %c0_15] : memref<1x16xf32, #tpu.memory_space<vmem>>, vector<1x16xf32>
    %36 = vector.broadcast %35 : vector<1x16xf32> to vector<96x16xf32>
    %37 = arith.mulf %34, %36 : vector<96x16xf32>
    %c0_16 = arith.constant 0 : index
    %c0_17 = arith.constant 0 : index
    %38 = vector.load %arg5[%c0_16, %c0_17] : memref<1x16xf32, #tpu.memory_space<vmem>>, vector<1x16xf32>
    %39 = vector.broadcast %38 : vector<1x16xf32> to vector<96x16xf32>
    %40 = arith.addf %37, %39 : vector<96x16xf32>
    %c0_18 = arith.constant 0 : index
    %c0_19 = arith.constant 0 : index
    %41 = vector.load %arg6[%c0_18, %c0_19] : memref<96x16xf32, #tpu.memory_space<vmem>>, vector<96x16xf32>
    tpu.vector_store %arg6[%c0_18, %c0_19], %40 {strides = array<i32>} : memref<96x16xf32, #tpu.memory_space<vmem>>, vector<96x16xf32>,
    return
  }
  func.func @transform_0(%arg0: i32) -> (i32, i32) {
    %c0_i32 = arith.constant 0 : i32
    %c0_i32_0 = arith.constant 0 : i32
    return %arg0, %c0_i32 : i32, i32
  }
  func.func @transform_1(%arg0: i32) -> (i32, i32) {
    %c0_i32 = arith.constant 0 : i32
    %c0_i32_0 = arith.constant 0 : i32
    %c0_i32_1 = arith.constant 0 : i32
    return %c0_i32, %c0_i32_0 : i32, i32
  }
  func.func @transform_2(%arg0: i32) -> (i32, i32) {
    %c0_i32 = arith.constant 0 : i32
    %c0_i32_0 = arith.constant 0 : i32
    %c0_i32_1 = arith.constant 0 : i32
    return %c0_i32, %c0_i32_0 : i32, i32
  }
  func.func @transform_3(%arg0: i32) -> (i32, i32) {
    %c0_i32 = arith.constant 0 : i32
    %c0_i32_0 = arith.constant 0 : i32
    %c0_i32_1 = arith.constant 0 : i32
    return %c0_i32, %c0_i32_0 : i32, i32
  }
  func.func @transform_4(%arg0: i32) -> (i32, i32) {
    %c0_i32 = arith.constant 0 : i32
    %c0_i32_0 = arith.constant 0 : i32
    %c0_i32_1 = arith.constant 0 : i32
    return %c0_i32, %c0_i32_0 : i32, i32
  }
  func.func @transform_5(%arg0: i32) -> (i32, i32) {
    %c0_i32 = arith.constant 0 : i32
    %c0_i32_0 = arith.constant 0 : i32
    return %arg0, %c0_i32 : i32, i32
  }
}

module attributes {stable_mosaic.version = 11 : i64} {
  func.func @_lin_ln_res_kernel(%arg0: i32, %arg1: memref<32x32xf32, #tpu.memory_space<vmem>>, %arg2: memref<32x16xf32, #tpu.memory_space<vmem>>, %arg3: memref<32x16xf32, #tpu.memory_space<vmem>>, %arg4: memref<1x16xf32, #tpu.memory_space<vmem>>, %arg5: memref<1x16xf32, #tpu.memory_space<vmem>>, %arg6: memref<1x16xf32, #tpu.memory_space<vmem>>, %arg7: memref<32x16xf32, #tpu.memory_space<vmem>>) attributes {dimension_semantics = [#tpu.dimension_semantics<parallel>], iteration_bounds = array<i64: 2>, scalar_prefetch = 0 : i64, scratch_operands = 0 : i64, tpu.core_type = #tpu.core_type<tc>, window_params = [{transform_indices = @transform_0, window_bounds = array<i64: 32, 32>}, {transform_indices = @transform_1, window_bounds = array<i64: 32, 16>}, {pipeline_mode = #tpu.pipeline_mode<synchronous>, transform_indices = @transform_2, window_bounds = array<i64: 32, 16>}, {pipeline_mode = #tpu.pipeline_mode<synchronous>, transform_indices = @transform_3, window_bounds = array<i64: 1, 16>}, {pipeline_mode = #tpu.pipeline_mode<synchronous>, transform_indices = @transform_4, window_bounds = array<i64: 1, 16>}, {pipeline_mode = #tpu.pipeline_mode<synchronous>, transform_indices = @transform_5, window_bounds = array<i64: 1, 16>}, {transform_indices = @transform_6, window_bounds = array<i64: 32, 16>}]} {
    %c0 = arith.constant 0 : index
    %c0_0 = arith.constant 0 : index
    %0 = vector.load %arg1[%c0, %c0_0] : memref<32x32xf32, #tpu.memory_space<vmem>>, vector<32x32xf32>
    %c0_1 = arith.constant 0 : index
    %c0_2 = arith.constant 0 : index
    %1 = vector.load %arg3[%c0_1, %c0_2] : memref<32x16xf32, #tpu.memory_space<vmem>>, vector<32x16xf32>
    %cst = arith.constant dense<0.000000e+00> : vector<32x16xf32>
    %2 = tpu.matmul %0, %1, %cst {dimension_numbers = #tpu.dot_dimension_numbers<[1], [0], [0], [1], [0, 0, 1, 1], [], []>} : vector<32x32xf32>, vector<32x16xf32>, vector<32x16xf32> -> vector<32x16xf32>
    %c0_3 = arith.constant 0 : index
    %c0_4 = arith.constant 0 : index
    %3 = vector.load %arg4[%c0_3, %c0_4] : memref<1x16xf32, #tpu.memory_space<vmem>>, vector<1x16xf32>
    %4 = vector.broadcast %3 : vector<1x16xf32> to vector<32x16xf32>
    %5 = arith.addf %2, %4 : vector<32x16xf32>
    %cst_5 = arith.constant dense<0.000000e+00> : vector<32xf32>
    %6 = vector.multi_reduction <add>, %5, %cst_5 [1] : vector<32x16xf32> to vector<32xf32>
    %7 = vector.shape_cast %6 : vector<32xf32> to vector<32x1xf32>
    %cst_6 = arith.constant 1.600000e+01 : f32
    %8 = vector.broadcast %cst_6 : f32 to vector<32x1xf32>
    %9 = arith.divf %7, %8 : vector<32x1xf32>
    %10 = vector.broadcast %9 : vector<32x1xf32> to vector<32x16xf32>
    %11 = arith.subf %5, %10 : vector<32x16xf32>
    %12 = arith.mulf %11, %11 : vector<32x16xf32>
    %cst_7 = arith.constant dense<0.000000e+00> : vector<32xf32>
    %13 = vector.multi_reduction <add>, %12, %cst_7 [1] : vector<32x16xf32> to vector<32xf32>
    %14 = vector.shape_cast %13 : vector<32xf32> to vector<32x1xf32>
    %cst_8 = arith.constant 1.600000e+01 : f32
    %15 = vector.broadcast %cst_8 : f32 to vector<32x1xf32>
    %16 = arith.divf %14, %15 : vector<32x1xf32>
    %cst_9 = arith.constant 9.99999974E-6 : f32
    %17 = vector.broadcast %cst_9 : f32 to vector<32x1xf32>
    %18 = arith.addf %16, %17 : vector<32x1xf32>
    %19 = math.rsqrt %18 : vector<32x1xf32>
    %20 = vector.broadcast %19 : vector<32x1xf32> to vector<32x16xf32>
    %21 = arith.mulf %11, %20 : vector<32x16xf32>
    %c0_10 = arith.constant 0 : index
    %c0_11 = arith.constant 0 : index
    %22 = vector.load %arg5[%c0_10, %c0_11] : memref<1x16xf32, #tpu.memory_space<vmem>>, vector<1x16xf32>
    %23 = vector.broadcast %22 : vector<1x16xf32> to vector<32x16xf32>
    %24 = arith.mulf %21, %23 : vector<32x16xf32>
    %c0_12 = arith.constant 0 : index
    %c0_13 = arith.constant 0 : index
    %25 = vector.load %arg6[%c0_12, %c0_13] : memref<1x16xf32, #tpu.memory_space<vmem>>, vector<1x16xf32>
    %26 = vector.broadcast %25 : vector<1x16xf32> to vector<32x16xf32>
    %27 = arith.addf %24, %26 : vector<32x16xf32>
    %c0_14 = arith.constant 0 : index
    %c0_15 = arith.constant 0 : index
    %28 = vector.load %arg2[%c0_14, %c0_15] : memref<32x16xf32, #tpu.memory_space<vmem>>, vector<32x16xf32>
    %29 = arith.addf %28, %27 : vector<32x16xf32>
    %c0_16 = arith.constant 0 : index
    %c0_17 = arith.constant 0 : index
    %30 = vector.load %arg7[%c0_16, %c0_17] : memref<32x16xf32, #tpu.memory_space<vmem>>, vector<32x16xf32>
    tpu.vector_store %arg7[%c0_16, %c0_17], %29 {strides = array<i32>} : memref<32x16xf32, #tpu.memory_space<vmem>>, vector<32x16xf32>,
    return
  }
  func.func @transform_0(%arg0: i32) -> (i32, i32) {
    %c0_i32 = arith.constant 0 : i32
    %c0_i32_0 = arith.constant 0 : i32
    return %arg0, %c0_i32 : i32, i32
  }
  func.func @transform_1(%arg0: i32) -> (i32, i32) {
    %c0_i32 = arith.constant 0 : i32
    %c0_i32_0 = arith.constant 0 : i32
    return %arg0, %c0_i32 : i32, i32
  }
  func.func @transform_2(%arg0: i32) -> (i32, i32) {
    %c0_i32 = arith.constant 0 : i32
    %c0_i32_0 = arith.constant 0 : i32
    %c0_i32_1 = arith.constant 0 : i32
    return %c0_i32, %c0_i32_0 : i32, i32
  }
  func.func @transform_3(%arg0: i32) -> (i32, i32) {
    %c0_i32 = arith.constant 0 : i32
    %c0_i32_0 = arith.constant 0 : i32
    %c0_i32_1 = arith.constant 0 : i32
    return %c0_i32, %c0_i32_0 : i32, i32
  }
  func.func @transform_4(%arg0: i32) -> (i32, i32) {
    %c0_i32 = arith.constant 0 : i32
    %c0_i32_0 = arith.constant 0 : i32
    %c0_i32_1 = arith.constant 0 : i32
    return %c0_i32, %c0_i32_0 : i32, i32
  }
  func.func @transform_5(%arg0: i32) -> (i32, i32) {
    %c0_i32 = arith.constant 0 : i32
    %c0_i32_0 = arith.constant 0 : i32
    %c0_i32_1 = arith.constant 0 : i32
    return %c0_i32, %c0_i32_0 : i32, i32
  }
  func.func @transform_6(%arg0: i32) -> (i32, i32) {
    %c0_i32 = arith.constant 0 : i32
    %c0_i32_0 = arith.constant 0 : i32
    return %arg0, %c0_i32 : i32, i32
  }
}

module attributes {stable_mosaic.version = 11 : i64} {
  func.func @_attn_block_kernel(%arg0: i32, %arg1: memref<32x16xf32, #tpu.memory_space<vmem>>, %arg2: memref<32x3xf32, #tpu.memory_space<vmem>>, %arg3: memref<1x16xf32, #tpu.memory_space<vmem>>, %arg4: memref<3x16xbf16, #tpu.memory_space<vmem>>, %arg5: memref<1x16xf32, #tpu.memory_space<vmem>>, %arg6: memref<16x48xbf16, #tpu.memory_space<vmem>>, %arg7: memref<1x48xf32, #tpu.memory_space<vmem>>, %arg8: memref<16x16xbf16, #tpu.memory_space<vmem>>, %arg9: memref<1x16xf32, #tpu.memory_space<vmem>>, %arg10: memref<2xf32, #tpu.memory_space<smem>>, %arg11: memref<32x16xf32, #tpu.memory_space<vmem>>, %arg12: memref<32x16xf32, #tpu.memory_space<vmem>>) attributes {dimension_semantics = [#tpu.dimension_semantics<parallel>], iteration_bounds = array<i64: 2>, scalar_prefetch = 0 : i64, scratch_operands = 1 : i64, tpu.core_type = #tpu.core_type<tc>, window_params = [{transform_indices = @transform_0, window_bounds = array<i64: 32, 16>}, {transform_indices = @transform_1, window_bounds = array<i64: 32, 3>}, {pipeline_mode = #tpu.pipeline_mode<synchronous>, transform_indices = @transform_2, window_bounds = array<i64: 1, 16>}, {pipeline_mode = #tpu.pipeline_mode<synchronous>, transform_indices = @transform_3, window_bounds = array<i64: 3, 16>}, {pipeline_mode = #tpu.pipeline_mode<synchronous>, transform_indices = @transform_4, window_bounds = array<i64: 1, 16>}, {pipeline_mode = #tpu.pipeline_mode<synchronous>, transform_indices = @transform_5, window_bounds = array<i64: 16, 48>}, {pipeline_mode = #tpu.pipeline_mode<synchronous>, transform_indices = @transform_6, window_bounds = array<i64: 1, 48>}, {pipeline_mode = #tpu.pipeline_mode<synchronous>, transform_indices = @transform_7, window_bounds = array<i64: 16, 16>}, {pipeline_mode = #tpu.pipeline_mode<synchronous>, transform_indices = @transform_8, window_bounds = array<i64: 1, 16>}, {transform_indices = @transform_9, window_bounds = array<i64: 2>}, {transform_indices = @transform_10, window_bounds = array<i64: 32, 16>}]} {
    %c0 = arith.constant 0 : index
    %c0_0 = arith.constant 0 : index
    %0 = vector.load %arg1[%c0, %c0_0] : memref<32x16xf32, #tpu.memory_space<vmem>>, vector<32x16xf32>
    %c0_1 = arith.constant 0 : index
    %c0_2 = arith.constant 0 : index
    %1 = vector.load %arg2[%c0_1, %c0_2] : memref<32x3xf32, #tpu.memory_space<vmem>>, vector<32x3xf32>
    %2 = arith.mulf %0, %0 : vector<32x16xf32>
    %cst = arith.constant dense<0.000000e+00> : vector<32xf32>
    %3 = vector.multi_reduction <add>, %2, %cst [1] : vector<32x16xf32> to vector<32xf32>
    %4 = vector.shape_cast %3 : vector<32xf32> to vector<32x1xf32>
    %cst_3 = arith.constant 1.600000e+01 : f32
    %5 = vector.broadcast %cst_3 : f32 to vector<32x1xf32>
    %6 = arith.divf %4, %5 : vector<32x1xf32>
    %cst_4 = arith.constant 1.1920929E-7 : f32
    %7 = vector.broadcast %cst_4 : f32 to vector<32x1xf32>
    %8 = arith.addf %6, %7 : vector<32x1xf32>
    %9 = math.rsqrt %8 : vector<32x1xf32>
    %10 = vector.broadcast %9 : vector<32x1xf32> to vector<32x16xf32>
    %11 = arith.mulf %0, %10 : vector<32x16xf32>
    %c0_5 = arith.constant 0 : index
    %c0_6 = arith.constant 0 : index
    %12 = vector.load %arg3[%c0_5, %c0_6] : memref<1x16xf32, #tpu.memory_space<vmem>>, vector<1x16xf32>
    %13 = vector.broadcast %12 : vector<1x16xf32> to vector<32x16xf32>
    %14 = arith.mulf %11, %13 : vector<32x16xf32>
    %15 = vector.shape_cast %1 : vector<32x3xf32> to vector<4x8x3xf32>
    %cst_7 = arith.constant dense<0.000000e+00> : vector<4x3xf32>
    %16 = vector.multi_reduction <add>, %15, %cst_7 [1] : vector<4x8x3xf32> to vector<4x3xf32>
    %17 = vector.shape_cast %16 : vector<4x3xf32> to vector<4x1x3xf32>
    %cst_8 = arith.constant 8.000000e+00 : f32
    %18 = vector.broadcast %cst_8 : f32 to vector<4x1x3xf32>
    %19 = arith.divf %17, %18 : vector<4x1x3xf32>
    %20 = vector.broadcast %19 : vector<4x1x3xf32> to vector<4x8x3xf32>
    %21 = arith.subf %15, %20 : vector<4x8x3xf32>
    %22 = vector.shape_cast %21 : vector<4x8x3xf32> to vector<32x3xf32>
    %23 = arith.truncf %22 : vector<32x3xf32> to vector<32x3xbf16>
    %c0_9 = arith.constant 0 : index
    %c0_10 = arith.constant 0 : index
    %24 = vector.load %arg4[%c0_9, %c0_10] : memref<3x16xbf16, #tpu.memory_space<vmem>>, vector<3x16xbf16>
    %cst_11 = arith.constant dense<0.000000e+00> : vector<32x16xf32>
    %25 = tpu.matmul %23, %24, %cst_11 {dimension_numbers = #tpu.dot_dimension_numbers<[1], [0], [0], [1], [0, 0, 1, 1], [], []>} : vector<32x3xbf16>, vector<3x16xbf16>, vector<32x16xf32> -> vector<32x16xf32>
    %26 = arith.addf %14, %25 : vector<32x16xf32>
    %c0_12 = arith.constant 0 : index
    %c0_13 = arith.constant 0 : index
    %27 = vector.load %arg5[%c0_12, %c0_13] : memref<1x16xf32, #tpu.memory_space<vmem>>, vector<1x16xf32>
    %28 = vector.broadcast %27 : vector<1x16xf32> to vector<32x16xf32>
    %29 = arith.addf %26, %28 : vector<32x16xf32>
    %30 = arith.truncf %29 : vector<32x16xf32> to vector<32x16xbf16>
    %c0_14 = arith.constant 0 : index
    %c0_15 = arith.constant 0 : index
    %31 = vector.load %arg6[%c0_14, %c0_15] : memref<16x48xbf16, #tpu.memory_space<vmem>>, vector<16x48xbf16>
    %cst_16 = arith.constant dense<0.000000e+00> : vector<32x48xf32>
    %32 = tpu.matmul %30, %31, %cst_16 {dimension_numbers = #tpu.dot_dimension_numbers<[1], [0], [0], [1], [0, 0, 1, 1], [], []>} : vector<32x16xbf16>, vector<16x48xbf16>, vector<32x48xf32> -> vector<32x48xf32>
    %c0_17 = arith.constant 0 : index
    %c0_18 = arith.constant 0 : index
    %33 = vector.load %arg7[%c0_17, %c0_18] : memref<1x48xf32, #tpu.memory_space<vmem>>, vector<1x48xf32>
    %34 = vector.broadcast %33 : vector<1x48xf32> to vector<32x48xf32>
    %35 = arith.addf %32, %34 : vector<32x48xf32>
    %36 = arith.mulf %21, %21 : vector<4x8x3xf32>
    %cst_19 = arith.constant dense<0.000000e+00> : vector<4x8xf32>
    %37 = vector.multi_reduction <add>, %36, %cst_19 [2] : vector<4x8x3xf32> to vector<4x8xf32>
    %38 = vector.shape_cast %37 : vector<4x8xf32> to vector<4x8x1xf32>
    %cst_20 = arith.constant 1.000000e+00 : f32
    %39 = vector.broadcast %cst_20 : f32 to vector<4x1x3xf32>
    %cst_21 = arith.constant dense<0.000000e+00> : vector<4x1x8xf32>
    %40 = tpu.matmul %39, %36, %cst_21 {dimension_numbers = #tpu.dot_dimension_numbers<[2], [2], [1], [1], [0, 0, 0, 1, 1, 1], [0], [0]>} : vector<4x1x3xf32>, vector<4x8x3xf32>, vector<4x1x8xf32> -> vector<4x1x8xf32>
    %cst_22 = arith.constant dense<0.000000e+00> : vector<4x8x8xf32>
    %41 = tpu.matmul %21, %21, %cst_22 {dimension_numbers = #tpu.dot_dimension_numbers<[2], [2], [1], [1], [0, 0, 0, 1, 1, 1], [0], [0]>} : vector<4x8x3xf32>, vector<4x8x3xf32>, vector<4x8x8xf32> -> vector<4x8x8xf32>
    %42 = vector.broadcast %38 : vector<4x8x1xf32> to vector<4x8x8xf32>
    %43 = vector.broadcast %40 : vector<4x1x8xf32> to vector<4x8x8xf32>
    %44 = arith.addf %42, %43 : vector<4x8x8xf32>
    %cst_23 = arith.constant 2.000000e+00 : f32
    %45 = vector.broadcast %cst_23 : f32 to vector<4x8x8xf32>
    %46 = arith.mulf %45, %41 : vector<4x8x8xf32>
    %47 = arith.subf %44, %46 : vector<4x8x8xf32>
    %cst_24 = arith.constant 0.000000e+00 : f32
    %48 = vector.broadcast %cst_24 : f32 to vector<4x8x8xf32>
    %49 = arith.maximumf %47, %48 : vector<4x8x8xf32>
    %50 = math.sqrt %49 : vector<4x8x8xf32>
    %51 = vector.extract_strided_slice %35 {offsets = [0, 0], sizes = [32, 8], strides = [1, 1]} : vector<32x48xf32> to vector<32x8xf32>
    %52 = arith.truncf %51 : vector<32x8xf32> to vector<32x8xbf16>
    %53 = vector.shape_cast %52 : vector<32x8xbf16> to vector<4x8x8xbf16>
    %54 = vector.extract_strided_slice %35 {offsets = [0, 16], sizes = [32, 8], strides = [1, 1]} : vector<32x48xf32> to vector<32x8xf32>
    %55 = arith.truncf %54 : vector<32x8xf32> to vector<32x8xbf16>
    %56 = vector.shape_cast %55 : vector<32x8xbf16> to vector<4x8x8xbf16>
    %57 = vector.extract_strided_slice %35 {offsets = [0, 32], sizes = [32, 8], strides = [1, 1]} : vector<32x48xf32> to vector<32x8xf32>
    %58 = arith.truncf %57 : vector<32x8xf32> to vector<32x8xbf16>
    %59 = vector.shape_cast %58 : vector<32x8xbf16> to vector<4x8x8xbf16>
    %cst_25 = arith.constant dense<0.000000e+00> : vector<4x8x8xf32>
    %60 = tpu.matmul %53, %56, %cst_25 {dimension_numbers = #tpu.dot_dimension_numbers<[2], [2], [1], [1], [0, 0, 0, 1, 1, 1], [0], [0]>} : vector<4x8x8xbf16>, vector<4x8x8xbf16>, vector<4x8x8xf32> -> vector<4x8x8xf32>
    %cst_26 = arith.constant 0.353553385 : f32
    %61 = vector.broadcast %cst_26 : f32 to vector<4x8x8xf32>
    %62 = arith.mulf %60, %61 : vector<4x8x8xf32>
    %c0_27 = arith.constant 0 : index
    %63 = memref.load %arg10[%c0_27] : memref<2xf32, #tpu.memory_space<smem>>
    %64 = vector.broadcast %63 : f32 to vector<4x8x8xf32>
    %65 = arith.mulf %64, %50 : vector<4x8x8xf32>
    %66 = arith.addf %62, %65 : vector<4x8x8xf32>
    %cst_28 = arith.constant dense<0xFF800000> : vector<4x8xf32>
    %67 = vector.multi_reduction <maximumf>, %66, %cst_28 [2] : vector<4x8x8xf32> to vector<4x8xf32>
    %68 = vector.shape_cast %67 : vector<4x8xf32> to vector<4x8x1xf32>
    %69 = vector.broadcast %68 : vector<4x8x1xf32> to vector<4x8x8xf32>
    %70 = arith.subf %66, %69 : vector<4x8x8xf32>
    %71 = math.exp %70 : vector<4x8x8xf32>
    %cst_29 = arith.constant dense<0.000000e+00> : vector<4x8xf32>
    %72 = vector.multi_reduction <add>, %71, %cst_29 [2] : vector<4x8x8xf32> to vector<4x8xf32>
    %73 = vector.shape_cast %72 : vector<4x8xf32> to vector<4x8x1xf32>
    %74 = tpu.reciprocal %73 {approx = true} : vector<4x8x1xf32> -> vector<4x8x1xf32>
    %75 = vector.broadcast %74 : vector<4x8x1xf32> to vector<4x8x8xf32>
    %76 = arith.mulf %71, %75 : vector<4x8x8xf32>
    %77 = arith.truncf %76 : vector<4x8x8xf32> to vector<4x8x8xbf16>
    %cst_30 = arith.constant dense<0.000000e+00> : vector<4x8x8xf32>
    %78 = tpu.matmul %77, %59, %cst_30 {dimension_numbers = #tpu.dot_dimension_numbers<[2], [1], [1], [2], [0, 0, 0, 1, 1, 2], [0], [0]>} : vector<4x8x8xbf16>, vector<4x8x8xbf16>, vector<4x8x8xf32> -> vector<4x8x8xf32>
    %79 = vector.shape_cast %78 : vector<4x8x8xf32> to vector<32x8xf32>
    %c0_31 = arith.constant 0 : index
    %c0_32 = arith.constant 0 : index
    %80 = vector.load %arg12[%c0_31, %c0_32] : memref<32x16xf32, #tpu.memory_space<vmem>>, vector<32x8xf32>
    tpu.vector_store %arg12[%c0_31, %c0_32], %79 {strides = array<i32>} : memref<32x16xf32, #tpu.memory_space<vmem>>, vector<32x8xf32>,
    %81 = vector.extract_strided_slice %35 {offsets = [0, 8], sizes = [32, 8], strides = [1, 1]} : vector<32x48xf32> to vector<32x8xf32>
    %82 = arith.truncf %81 : vector<32x8xf32> to vector<32x8xbf16>
    %83 = vector.shape_cast %82 : vector<32x8xbf16> to vector<4x8x8xbf16>
    %84 = vector.extract_strided_slice %35 {offsets = [0, 24], sizes = [32, 8], strides = [1, 1]} : vector<32x48xf32> to vector<32x8xf32>
    %85 = arith.truncf %84 : vector<32x8xf32> to vector<32x8xbf16>
    %86 = vector.shape_cast %85 : vector<32x8xbf16> to vector<4x8x8xbf16>
    %87 = vector.extract_strided_slice %35 {offsets = [0, 40], sizes = [32, 8], strides = [1, 1]} : vector<32x48xf32> to vector<32x8xf32>
    %88 = arith.truncf %87 : vector<32x8xf32> to vector<32x8xbf16>
    %89 = vector.shape_cast %88 : vector<32x8xbf16> to vector<4x8x8xbf16>
    %cst_33 = arith.constant dense<0.000000e+00> : vector<4x8x8xf32>
    %90 = tpu.matmul %83, %86, %cst_33 {dimension_numbers = #tpu.dot_dimension_numbers<[2], [2], [1], [1], [0, 0, 0, 1, 1, 1], [0], [0]>} : vector<4x8x8xbf16>, vector<4x8x8xbf16>, vector<4x8x8xf32> -> vector<4x8x8xf32>
    %cst_34 = arith.constant 0.353553385 : f32
    %91 = vector.broadcast %cst_34 : f32 to vector<4x8x8xf32>
    %92 = arith.mulf %90, %91 : vector<4x8x8xf32>
    %c1 = arith.constant 1 : index
    %93 = memref.load %arg10[%c1] : memref<2xf32, #tpu.memory_space<smem>>
    %94 = vector.broadcast %93 : f32 to vector<4x8x8xf32>
    %95 = arith.mulf %94, %50 : vector<4x8x8xf32>
    %96 = arith.addf %92, %95 : vector<4x8x8xf32>
    %cst_35 = arith.constant dense<0xFF800000> : vector<4x8xf32>
    %97 = vector.multi_reduction <maximumf>, %96, %cst_35 [2] : vector<4x8x8xf32> to vector<4x8xf32>
    %98 = vector.shape_cast %97 : vector<4x8xf32> to vector<4x8x1xf32>
    %99 = vector.broadcast %98 : vector<4x8x1xf32> to vector<4x8x8xf32>
    %100 = arith.subf %96, %99 : vector<4x8x8xf32>
    %101 = math.exp %100 : vector<4x8x8xf32>
    %cst_36 = arith.constant dense<0.000000e+00> : vector<4x8xf32>
    %102 = vector.multi_reduction <add>, %101, %cst_36 [2] : vector<4x8x8xf32> to vector<4x8xf32>
    %103 = vector.shape_cast %102 : vector<4x8xf32> to vector<4x8x1xf32>
    %104 = tpu.reciprocal %103 {approx = true} : vector<4x8x1xf32> -> vector<4x8x1xf32>
    %105 = vector.broadcast %104 : vector<4x8x1xf32> to vector<4x8x8xf32>
    %106 = arith.mulf %101, %105 : vector<4x8x8xf32>
    %107 = arith.truncf %106 : vector<4x8x8xf32> to vector<4x8x8xbf16>
    %cst_37 = arith.constant dense<0.000000e+00> : vector<4x8x8xf32>
    %108 = tpu.matmul %107, %89, %cst_37 {dimension_numbers = #tpu.dot_dimension_numbers<[2], [1], [1], [2], [0, 0, 0, 1, 1, 2], [0], [0]>} : vector<4x8x8xbf16>, vector<4x8x8xbf16>, vector<4x8x8xf32> -> vector<4x8x8xf32>
    %109 = vector.shape_cast %108 : vector<4x8x8xf32> to vector<32x8xf32>
    %c0_38 = arith.constant 0 : index
    %c8 = arith.constant 8 : index
    %110 = vector.load %arg12[%c0_38, %c8] : memref<32x16xf32, #tpu.memory_space<vmem>>, vector<32x8xf32>
    tpu.vector_store %arg12[%c0_38, %c8], %109 {strides = array<i32>} : memref<32x16xf32, #tpu.memory_space<vmem>>, vector<32x8xf32>,
    %c0_39 = arith.constant 0 : index
    %c0_40 = arith.constant 0 : index
    %111 = vector.load %arg12[%c0_39, %c0_40] : memref<32x16xf32, #tpu.memory_space<vmem>>, vector<32x16xf32>
    %112 = arith.truncf %111 : vector<32x16xf32> to vector<32x16xbf16>
    %c0_41 = arith.constant 0 : index
    %c0_42 = arith.constant 0 : index
    %113 = vector.load %arg8[%c0_41, %c0_42] : memref<16x16xbf16, #tpu.memory_space<vmem>>, vector<16x16xbf16>
    %cst_43 = arith.constant dense<0.000000e+00> : vector<32x16xf32>
    %114 = tpu.matmul %112, %113, %cst_43 {dimension_numbers = #tpu.dot_dimension_numbers<[1], [0], [0], [1], [0, 0, 1, 1], [], []>} : vector<32x16xbf16>, vector<16x16xbf16>, vector<32x16xf32> -> vector<32x16xf32>
    %c0_44 = arith.constant 0 : index
    %c0_45 = arith.constant 0 : index
    %115 = vector.load %arg9[%c0_44, %c0_45] : memref<1x16xf32, #tpu.memory_space<vmem>>, vector<1x16xf32>
    %116 = vector.broadcast %115 : vector<1x16xf32> to vector<32x16xf32>
    %117 = arith.addf %114, %116 : vector<32x16xf32>
    %118 = arith.addf %0, %117 : vector<32x16xf32>
    %c0_46 = arith.constant 0 : index
    %c0_47 = arith.constant 0 : index
    %119 = vector.load %arg11[%c0_46, %c0_47] : memref<32x16xf32, #tpu.memory_space<vmem>>, vector<32x16xf32>
    tpu.vector_store %arg11[%c0_46, %c0_47], %118 {strides = array<i32>} : memref<32x16xf32, #tpu.memory_space<vmem>>, vector<32x16xf32>,
    return
  }
  func.func @transform_0(%arg0: i32) -> (i32, i32) {
    %c0_i32 = arith.constant 0 : i32
    %c0_i32_0 = arith.constant 0 : i32
    return %arg0, %c0_i32 : i32, i32
  }
  func.func @transform_1(%arg0: i32) -> (i32, i32) {
    %c0_i32 = arith.constant 0 : i32
    %c0_i32_0 = arith.constant 0 : i32
    return %arg0, %c0_i32 : i32, i32
  }
  func.func @transform_2(%arg0: i32) -> (i32, i32) {
    %c0_i32 = arith.constant 0 : i32
    %c0_i32_0 = arith.constant 0 : i32
    %c0_i32_1 = arith.constant 0 : i32
    return %c0_i32, %c0_i32_0 : i32, i32
  }
  func.func @transform_3(%arg0: i32) -> (i32, i32) {
    %c0_i32 = arith.constant 0 : i32
    %c0_i32_0 = arith.constant 0 : i32
    %c0_i32_1 = arith.constant 0 : i32
    return %c0_i32, %c0_i32_0 : i32, i32
  }
  func.func @transform_4(%arg0: i32) -> (i32, i32) {
    %c0_i32 = arith.constant 0 : i32
    %c0_i32_0 = arith.constant 0 : i32
    %c0_i32_1 = arith.constant 0 : i32
    return %c0_i32, %c0_i32_0 : i32, i32
  }
  func.func @transform_5(%arg0: i32) -> (i32, i32) {
    %c0_i32 = arith.constant 0 : i32
    %c0_i32_0 = arith.constant 0 : i32
    %c0_i32_1 = arith.constant 0 : i32
    return %c0_i32, %c0_i32_0 : i32, i32
  }
  func.func @transform_6(%arg0: i32) -> (i32, i32) {
    %c0_i32 = arith.constant 0 : i32
    %c0_i32_0 = arith.constant 0 : i32
    %c0_i32_1 = arith.constant 0 : i32
    return %c0_i32, %c0_i32_0 : i32, i32
  }
  func.func @transform_7(%arg0: i32) -> (i32, i32) {
    %c0_i32 = arith.constant 0 : i32
    %c0_i32_0 = arith.constant 0 : i32
    %c0_i32_1 = arith.constant 0 : i32
    return %c0_i32, %c0_i32_0 : i32, i32
  }
  func.func @transform_8(%arg0: i32) -> (i32, i32) {
    %c0_i32 = arith.constant 0 : i32
    %c0_i32_0 = arith.constant 0 : i32
    %c0_i32_1 = arith.constant 0 : i32
    return %c0_i32, %c0_i32_0 : i32, i32
  }
  func.func @transform_9(%arg0: i32) -> i32 {
    %c0_i32 = arith.constant 0 : i32
    %c0_i32_0 = arith.constant 0 : i32
    return %c0_i32 : i32
  }
  func.func @transform_10(%arg0: i32) -> (i32, i32) {
    %c0_i32 = arith.constant 0 : i32
    %c0_i32_0 = arith.constant 0 : i32
    return %arg0, %c0_i32 : i32, i32
  }
}

module attributes {stable_mosaic.version = 11 : i64} {
  func.func @_mlp_block_kernel(%arg0: i32, %arg1: i32, %arg2: memref<32x16xf32, #tpu.memory_space<vmem>>, %arg3: memref<1x16xf32, #tpu.memory_space<vmem>>, %arg4: memref<16x64xbf16, #tpu.memory_space<vmem>>, %arg5: memref<1x64xf32, #tpu.memory_space<vmem>>, %arg6: memref<16x64xbf16, #tpu.memory_space<vmem>>, %arg7: memref<1x64xf32, #tpu.memory_space<vmem>>, %arg8: memref<64x16xbf16, #tpu.memory_space<vmem>>, %arg9: memref<1x16xf32, #tpu.memory_space<vmem>>, %arg10: memref<32x16xf32, #tpu.memory_space<vmem>>, %arg11: memref<32x16xf32, #tpu.memory_space<vmem>>) attributes {dimension_semantics = [#tpu.dimension_semantics<parallel>, #tpu.dimension_semantics<arbitrary>], iteration_bounds = array<i64: 2, 1>, scalar_prefetch = 0 : i64, scratch_operands = 1 : i64, tpu.core_type = #tpu.core_type<tc>, window_params = [{transform_indices = @transform_0, window_bounds = array<i64: 32, 16>}, {pipeline_mode = #tpu.pipeline_mode<synchronous>, transform_indices = @transform_1, window_bounds = array<i64: 1, 16>}, {transform_indices = @transform_2, window_bounds = array<i64: 16, 64>}, {transform_indices = @transform_3, window_bounds = array<i64: 1, 64>}, {transform_indices = @transform_4, window_bounds = array<i64: 16, 64>}, {transform_indices = @transform_5, window_bounds = array<i64: 1, 64>}, {transform_indices = @transform_6, window_bounds = array<i64: 64, 16>}, {pipeline_mode = #tpu.pipeline_mode<synchronous>, transform_indices = @transform_7, window_bounds = array<i64: 1, 16>}, {transform_indices = @transform_8, window_bounds = array<i64: 32, 16>}]} {
    %c0 = arith.constant 0 : index
    %c0_0 = arith.constant 0 : index
    %0 = vector.load %arg2[%c0, %c0_0] : memref<32x16xf32, #tpu.memory_space<vmem>>, vector<32x16xf32>
    %1 = arith.mulf %0, %0 : vector<32x16xf32>
    %cst = arith.constant dense<0.000000e+00> : vector<32xf32>
    %2 = vector.multi_reduction <add>, %1, %cst [1] : vector<32x16xf32> to vector<32xf32>
    %3 = vector.shape_cast %2 : vector<32xf32> to vector<32x1xf32>
    %cst_1 = arith.constant 1.600000e+01 : f32
    %4 = vector.broadcast %cst_1 : f32 to vector<32x1xf32>
    %5 = arith.divf %3, %4 : vector<32x1xf32>
    %cst_2 = arith.constant 1.1920929E-7 : f32
    %6 = vector.broadcast %cst_2 : f32 to vector<32x1xf32>
    %7 = arith.addf %5, %6 : vector<32x1xf32>
    %8 = math.rsqrt %7 : vector<32x1xf32>
    %9 = vector.broadcast %8 : vector<32x1xf32> to vector<32x16xf32>
    %10 = arith.mulf %0, %9 : vector<32x16xf32>
    %c0_3 = arith.constant 0 : index
    %c0_4 = arith.constant 0 : index
    %11 = vector.load %arg3[%c0_3, %c0_4] : memref<1x16xf32, #tpu.memory_space<vmem>>, vector<1x16xf32>
    %12 = vector.broadcast %11 : vector<1x16xf32> to vector<32x16xf32>
    %13 = arith.mulf %10, %12 : vector<32x16xf32>
    %14 = arith.truncf %13 : vector<32x16xf32> to vector<32x16xbf16>
    %c0_5 = arith.constant 0 : index
    %c0_6 = arith.constant 0 : index
    %15 = vector.load %arg4[%c0_5, %c0_6] : memref<16x64xbf16, #tpu.memory_space<vmem>>, vector<16x64xbf16>
    %cst_7 = arith.constant dense<0.000000e+00> : vector<32x64xf32>
    %16 = tpu.matmul %14, %15, %cst_7 {dimension_numbers = #tpu.dot_dimension_numbers<[1], [0], [0], [1], [0, 0, 1, 1], [], []>} : vector<32x16xbf16>, vector<16x64xbf16>, vector<32x64xf32> -> vector<32x64xf32>
    %c0_8 = arith.constant 0 : index
    %c0_9 = arith.constant 0 : index
    %17 = vector.load %arg5[%c0_8, %c0_9] : memref<1x64xf32, #tpu.memory_space<vmem>>, vector<1x64xf32>
    %18 = vector.broadcast %17 : vector<1x64xf32> to vector<32x64xf32>
    %19 = arith.addf %16, %18 : vector<32x64xf32>
    %c0_10 = arith.constant 0 : index
    %c0_11 = arith.constant 0 : index
    %20 = vector.load %arg6[%c0_10, %c0_11] : memref<16x64xbf16, #tpu.memory_space<vmem>>, vector<16x64xbf16>
    %cst_12 = arith.constant dense<0.000000e+00> : vector<32x64xf32>
    %21 = tpu.matmul %14, %20, %cst_12 {dimension_numbers = #tpu.dot_dimension_numbers<[1], [0], [0], [1], [0, 0, 1, 1], [], []>} : vector<32x16xbf16>, vector<16x64xbf16>, vector<32x64xf32> -> vector<32x64xf32>
    %c0_13 = arith.constant 0 : index
    %c0_14 = arith.constant 0 : index
    %22 = vector.load %arg7[%c0_13, %c0_14] : memref<1x64xf32, #tpu.memory_space<vmem>>, vector<1x64xf32>
    %23 = vector.broadcast %22 : vector<1x64xf32> to vector<32x64xf32>
    %24 = arith.addf %21, %23 : vector<32x64xf32>
    %cst_15 = arith.constant 0.000000e+00 : f32
    %25 = vector.broadcast %cst_15 : f32 to vector<32x64xf32>
    %26 = arith.subf %25, %19 : vector<32x64xf32>
    %27 = math.exp %26 : vector<32x64xf32>
    %cst_16 = arith.constant 1.000000e+00 : f32
    %28 = vector.broadcast %cst_16 : f32 to vector<32x64xf32>
    %29 = arith.addf %28, %27 : vector<32x64xf32>
    %cst_17 = arith.constant 1.000000e+00 : f32
    %30 = vector.broadcast %cst_17 : f32 to vector<32x64xf32>
    %31 = arith.divf %30, %29 : vector<32x64xf32>
    %32 = arith.mulf %19, %31 : vector<32x64xf32>
    %33 = arith.mulf %24, %32 : vector<32x64xf32>
    %34 = arith.truncf %33 : vector<32x64xf32> to vector<32x64xbf16>
    %c0_18 = arith.constant 0 : index
    %c0_19 = arith.constant 0 : index
    %35 = vector.load %arg8[%c0_18, %c0_19] : memref<64x16xbf16, #tpu.memory_space<vmem>>, vector<64x16xbf16>
    %cst_20 = arith.constant dense<0.000000e+00> : vector<32x16xf32>
    %36 = tpu.matmul %34, %35, %cst_20 {dimension_numbers = #tpu.dot_dimension_numbers<[1], [0], [0], [1], [0, 0, 1, 1], [], []>} : vector<32x64xbf16>, vector<64x16xbf16>, vector<32x16xf32> -> vector<32x16xf32>
    %c0_i32 = arith.constant 0 : i32
    %37 = arith.cmpi eq, %arg1, %c0_i32 : i32
    %38 = arith.extui %37 : i1 to i32
    %c0_i32_21 = arith.constant 0 : i32
    %39 = arith.cmpi ne, %38, %c0_i32_21 : i32
    scf.if %39 {
      %c0_28 = arith.constant 0 : index
      %c0_29 = arith.constant 0 : index
      %46 = vector.load %arg9[%c0_28, %c0_29] : memref<1x16xf32, #tpu.memory_space<vmem>>, vector<1x16xf32>
      %47 = vector.broadcast %46 : vector<1x16xf32> to vector<32x16xf32>
      %48 = arith.addf %0, %47 : vector<32x16xf32>
      %c0_30 = arith.constant 0 : index
      %c0_31 = arith.constant 0 : index
      %49 = vector.load %arg11[%c0_30, %c0_31] : memref<32x16xf32, #tpu.memory_space<vmem>>, vector<32x16xf32>
      tpu.vector_store %arg11[%c0_30, %c0_31], %48 {strides = array<i32>} : memref<32x16xf32, #tpu.memory_space<vmem>>, vector<32x16xf32>,
    } else {
    }
    %c0_22 = arith.constant 0 : index
    %c0_23 = arith.constant 0 : index
    %40 = vector.load %arg11[%c0_22, %c0_23] : memref<32x16xf32, #tpu.memory_space<vmem>>, vector<32x16xf32>
    %41 = arith.addf %40, %36 : vector<32x16xf32>
    %c0_24 = arith.constant 0 : index
    %c0_25 = arith.constant 0 : index
    %42 = vector.load %arg11[%c0_24, %c0_25] : memref<32x16xf32, #tpu.memory_space<vmem>>, vector<32x16xf32>
    tpu.vector_store %arg11[%c0_24, %c0_25], %41 {strides = array<i32>} : memref<32x16xf32, #tpu.memory_space<vmem>>, vector<32x16xf32>,
    %c0_i32_26 = arith.constant 0 : i32
    %43 = arith.cmpi eq, %arg1, %c0_i32_26 : i32
    %44 = arith.extui %43 : i1 to i32
    %c0_i32_27 = arith.constant 0 : i32
    %45 = arith.cmpi ne, %44, %c0_i32_27 : i32
    scf.if %45 {
      %c0_28 = arith.constant 0 : index
      %c0_29 = arith.constant 0 : index
      %46 = vector.load %arg11[%c0_28, %c0_29] : memref<32x16xf32, #tpu.memory_space<vmem>>, vector<32x16xf32>
      %c0_30 = arith.constant 0 : index
      %c0_31 = arith.constant 0 : index
      %47 = vector.load %arg10[%c0_30, %c0_31] : memref<32x16xf32, #tpu.memory_space<vmem>>, vector<32x16xf32>
      tpu.vector_store %arg10[%c0_30, %c0_31], %46 {strides = array<i32>} : memref<32x16xf32, #tpu.memory_space<vmem>>, vector<32x16xf32>,
    } else {
    }
    return
  }
  func.func @transform_0(%arg0: i32, %arg1: i32) -> (i32, i32) {
    %c0_i32 = arith.constant 0 : i32
    %c0_i32_0 = arith.constant 0 : i32
    return %arg0, %c0_i32 : i32, i32
  }
  func.func @transform_1(%arg0: i32, %arg1: i32) -> (i32, i32) {
    %c0_i32 = arith.constant 0 : i32
    %c0_i32_0 = arith.constant 0 : i32
    %c0_i32_1 = arith.constant 0 : i32
    return %c0_i32, %c0_i32_0 : i32, i32
  }
  func.func @transform_2(%arg0: i32, %arg1: i32) -> (i32, i32) {
    %c0_i32 = arith.constant 0 : i32
    %c0_i32_0 = arith.constant 0 : i32
    return %c0_i32, %arg1 : i32, i32
  }
  func.func @transform_3(%arg0: i32, %arg1: i32) -> (i32, i32) {
    %c0_i32 = arith.constant 0 : i32
    %c0_i32_0 = arith.constant 0 : i32
    return %c0_i32, %arg1 : i32, i32
  }
  func.func @transform_4(%arg0: i32, %arg1: i32) -> (i32, i32) {
    %c0_i32 = arith.constant 0 : i32
    %c0_i32_0 = arith.constant 0 : i32
    return %c0_i32, %arg1 : i32, i32
  }
  func.func @transform_5(%arg0: i32, %arg1: i32) -> (i32, i32) {
    %c0_i32 = arith.constant 0 : i32
    %c0_i32_0 = arith.constant 0 : i32
    return %c0_i32, %arg1 : i32, i32
  }
  func.func @transform_6(%arg0: i32, %arg1: i32) -> (i32, i32) {
    %c0_i32 = arith.constant 0 : i32
    %c0_i32_0 = arith.constant 0 : i32
    return %arg1, %c0_i32 : i32, i32
  }
  func.func @transform_7(%arg0: i32, %arg1: i32) -> (i32, i32) {
    %c0_i32 = arith.constant 0 : i32
    %c0_i32_0 = arith.constant 0 : i32
    %c0_i32_1 = arith.constant 0 : i32
    return %c0_i32, %c0_i32_0 : i32, i32
  }
  func.func @transform_8(%arg0: i32, %arg1: i32) -> (i32, i32) {
    %c0_i32 = arith.constant 0 : i32
    %c0_i32_0 = arith.constant 0 : i32
    return %arg0, %c0_i32 : i32, i32
  }
}

module attributes {stable_mosaic.version = 11 : i64} {
  func.func @_linear_rmsnorm_kernel(%arg0: i32, %arg1: memref<16x38xf32, #tpu.memory_space<vmem>>, %arg2: memref<38x32xf32, #tpu.memory_space<vmem>>, %arg3: memref<1x32xf32, #tpu.memory_space<vmem>>, %arg4: memref<1x32xf32, #tpu.memory_space<vmem>>, %arg5: memref<16x32xf32, #tpu.memory_space<vmem>>) attributes {dimension_semantics = [#tpu.dimension_semantics<parallel>], iteration_bounds = array<i64: 2>, scalar_prefetch = 0 : i64, scratch_operands = 0 : i64, tpu.core_type = #tpu.core_type<tc>, window_params = [{transform_indices = @transform_0, window_bounds = array<i64: 16, 38>}, {pipeline_mode = #tpu.pipeline_mode<synchronous>, transform_indices = @transform_1, window_bounds = array<i64: 38, 32>}, {pipeline_mode = #tpu.pipeline_mode<synchronous>, transform_indices = @transform_2, window_bounds = array<i64: 1, 32>}, {pipeline_mode = #tpu.pipeline_mode<synchronous>, transform_indices = @transform_3, window_bounds = array<i64: 1, 32>}, {transform_indices = @transform_4, window_bounds = array<i64: 16, 32>}]} {
    %c0 = arith.constant 0 : index
    %c0_0 = arith.constant 0 : index
    %0 = vector.load %arg1[%c0, %c0_0] : memref<16x38xf32, #tpu.memory_space<vmem>>, vector<16x38xf32>
    %c0_1 = arith.constant 0 : index
    %c0_2 = arith.constant 0 : index
    %1 = vector.load %arg2[%c0_1, %c0_2] : memref<38x32xf32, #tpu.memory_space<vmem>>, vector<38x32xf32>
    %cst = arith.constant dense<0.000000e+00> : vector<16x32xf32>
    %2 = tpu.matmul %0, %1, %cst {dimension_numbers = #tpu.dot_dimension_numbers<[1], [0], [0], [1], [0, 0, 1, 1], [], []>} : vector<16x38xf32>, vector<38x32xf32>, vector<16x32xf32> -> vector<16x32xf32>
    %c0_3 = arith.constant 0 : index
    %c0_4 = arith.constant 0 : index
    %3 = vector.load %arg3[%c0_3, %c0_4] : memref<1x32xf32, #tpu.memory_space<vmem>>, vector<1x32xf32>
    %4 = vector.broadcast %3 : vector<1x32xf32> to vector<16x32xf32>
    %5 = arith.addf %2, %4 : vector<16x32xf32>
    %6 = arith.mulf %5, %5 : vector<16x32xf32>
    %cst_5 = arith.constant dense<0.000000e+00> : vector<16xf32>
    %7 = vector.multi_reduction <add>, %6, %cst_5 [1] : vector<16x32xf32> to vector<16xf32>
    %8 = vector.shape_cast %7 : vector<16xf32> to vector<16x1xf32>
    %cst_6 = arith.constant 3.200000e+01 : f32
    %9 = vector.broadcast %cst_6 : f32 to vector<16x1xf32>
    %10 = arith.divf %8, %9 : vector<16x1xf32>
    %cst_7 = arith.constant 1.1920929E-7 : f32
    %11 = vector.broadcast %cst_7 : f32 to vector<16x1xf32>
    %12 = arith.addf %10, %11 : vector<16x1xf32>
    %13 = math.rsqrt %12 : vector<16x1xf32>
    %14 = vector.broadcast %13 : vector<16x1xf32> to vector<16x32xf32>
    %15 = arith.mulf %5, %14 : vector<16x32xf32>
    %c0_8 = arith.constant 0 : index
    %c0_9 = arith.constant 0 : index
    %16 = vector.load %arg4[%c0_8, %c0_9] : memref<1x32xf32, #tpu.memory_space<vmem>>, vector<1x32xf32>
    %17 = vector.broadcast %16 : vector<1x32xf32> to vector<16x32xf32>
    %18 = arith.mulf %15, %17 : vector<16x32xf32>
    %c0_10 = arith.constant 0 : index
    %c0_11 = arith.constant 0 : index
    %19 = vector.load %arg5[%c0_10, %c0_11] : memref<16x32xf32, #tpu.memory_space<vmem>>, vector<16x32xf32>
    tpu.vector_store %arg5[%c0_10, %c0_11], %18 {strides = array<i32>} : memref<16x32xf32, #tpu.memory_space<vmem>>, vector<16x32xf32>,
    return
  }
  func.func @transform_0(%arg0: i32) -> (i32, i32) {
    %c0_i32 = arith.constant 0 : i32
    %c0_i32_0 = arith.constant 0 : i32
    return %arg0, %c0_i32 : i32, i32
  }
  func.func @transform_1(%arg0: i32) -> (i32, i32) {
    %c0_i32 = arith.constant 0 : i32
    %c0_i32_0 = arith.constant 0 : i32
    %c0_i32_1 = arith.constant 0 : i32
    return %c0_i32, %c0_i32_0 : i32, i32
  }
  func.func @transform_2(%arg0: i32) -> (i32, i32) {
    %c0_i32 = arith.constant 0 : i32
    %c0_i32_0 = arith.constant 0 : i32
    %c0_i32_1 = arith.constant 0 : i32
    return %c0_i32, %c0_i32_0 : i32, i32
  }
  func.func @transform_3(%arg0: i32) -> (i32, i32) {
    %c0_i32 = arith.constant 0 : i32
    %c0_i32_0 = arith.constant 0 : i32
    %c0_i32_1 = arith.constant 0 : i32
    return %c0_i32, %c0_i32_0 : i32, i32
  }
  func.func @transform_4(%arg0: i32) -> (i32, i32) {
    %c0_i32 = arith.constant 0 : i32
    %c0_i32_0 = arith.constant 0 : i32
    return %arg0, %c0_i32 : i32, i32
  }
}

module attributes {stable_mosaic.version = 11 : i64} {
  func.func @_attn_block_kernel(%arg0: i32, %arg1: memref<32x32xf32, #tpu.memory_space<vmem>>, %arg2: memref<32x3xf32, #tpu.memory_space<vmem>>, %arg3: memref<1x32xf32, #tpu.memory_space<vmem>>, %arg4: memref<3x32xbf16, #tpu.memory_space<vmem>>, %arg5: memref<1x32xf32, #tpu.memory_space<vmem>>, %arg6: memref<32x96xbf16, #tpu.memory_space<vmem>>, %arg7: memref<1x96xf32, #tpu.memory_space<vmem>>, %arg8: memref<32x32xbf16, #tpu.memory_space<vmem>>, %arg9: memref<1x32xf32, #tpu.memory_space<vmem>>, %arg10: memref<2xf32, #tpu.memory_space<smem>>, %arg11: memref<32x32xf32, #tpu.memory_space<vmem>>, %arg12: memref<32x32xf32, #tpu.memory_space<vmem>>) attributes {dimension_semantics = [#tpu.dimension_semantics<parallel>], iteration_bounds = array<i64: 1>, scalar_prefetch = 0 : i64, scratch_operands = 1 : i64, tpu.core_type = #tpu.core_type<tc>, window_params = [{transform_indices = @transform_0, window_bounds = array<i64: 32, 32>}, {transform_indices = @transform_1, window_bounds = array<i64: 32, 3>}, {pipeline_mode = #tpu.pipeline_mode<synchronous>, transform_indices = @transform_2, window_bounds = array<i64: 1, 32>}, {pipeline_mode = #tpu.pipeline_mode<synchronous>, transform_indices = @transform_3, window_bounds = array<i64: 3, 32>}, {pipeline_mode = #tpu.pipeline_mode<synchronous>, transform_indices = @transform_4, window_bounds = array<i64: 1, 32>}, {pipeline_mode = #tpu.pipeline_mode<synchronous>, transform_indices = @transform_5, window_bounds = array<i64: 32, 96>}, {pipeline_mode = #tpu.pipeline_mode<synchronous>, transform_indices = @transform_6, window_bounds = array<i64: 1, 96>}, {pipeline_mode = #tpu.pipeline_mode<synchronous>, transform_indices = @transform_7, window_bounds = array<i64: 32, 32>}, {pipeline_mode = #tpu.pipeline_mode<synchronous>, transform_indices = @transform_8, window_bounds = array<i64: 1, 32>}, {transform_indices = @transform_9, window_bounds = array<i64: 2>}, {transform_indices = @transform_10, window_bounds = array<i64: 32, 32>}]} {
    %c0 = arith.constant 0 : index
    %c0_0 = arith.constant 0 : index
    %0 = vector.load %arg1[%c0, %c0_0] : memref<32x32xf32, #tpu.memory_space<vmem>>, vector<32x32xf32>
    %c0_1 = arith.constant 0 : index
    %c0_2 = arith.constant 0 : index
    %1 = vector.load %arg2[%c0_1, %c0_2] : memref<32x3xf32, #tpu.memory_space<vmem>>, vector<32x3xf32>
    %2 = arith.mulf %0, %0 : vector<32x32xf32>
    %cst = arith.constant dense<0.000000e+00> : vector<32xf32>
    %3 = vector.multi_reduction <add>, %2, %cst [1] : vector<32x32xf32> to vector<32xf32>
    %4 = vector.shape_cast %3 : vector<32xf32> to vector<32x1xf32>
    %cst_3 = arith.constant 3.200000e+01 : f32
    %5 = vector.broadcast %cst_3 : f32 to vector<32x1xf32>
    %6 = arith.divf %4, %5 : vector<32x1xf32>
    %cst_4 = arith.constant 1.1920929E-7 : f32
    %7 = vector.broadcast %cst_4 : f32 to vector<32x1xf32>
    %8 = arith.addf %6, %7 : vector<32x1xf32>
    %9 = math.rsqrt %8 : vector<32x1xf32>
    %10 = vector.broadcast %9 : vector<32x1xf32> to vector<32x32xf32>
    %11 = arith.mulf %0, %10 : vector<32x32xf32>
    %c0_5 = arith.constant 0 : index
    %c0_6 = arith.constant 0 : index
    %12 = vector.load %arg3[%c0_5, %c0_6] : memref<1x32xf32, #tpu.memory_space<vmem>>, vector<1x32xf32>
    %13 = vector.broadcast %12 : vector<1x32xf32> to vector<32x32xf32>
    %14 = arith.mulf %11, %13 : vector<32x32xf32>
    %15 = vector.shape_cast %1 : vector<32x3xf32> to vector<4x8x3xf32>
    %cst_7 = arith.constant dense<0.000000e+00> : vector<4x3xf32>
    %16 = vector.multi_reduction <add>, %15, %cst_7 [1] : vector<4x8x3xf32> to vector<4x3xf32>
    %17 = vector.shape_cast %16 : vector<4x3xf32> to vector<4x1x3xf32>
    %cst_8 = arith.constant 8.000000e+00 : f32
    %18 = vector.broadcast %cst_8 : f32 to vector<4x1x3xf32>
    %19 = arith.divf %17, %18 : vector<4x1x3xf32>
    %20 = vector.broadcast %19 : vector<4x1x3xf32> to vector<4x8x3xf32>
    %21 = arith.subf %15, %20 : vector<4x8x3xf32>
    %22 = vector.shape_cast %21 : vector<4x8x3xf32> to vector<32x3xf32>
    %23 = arith.truncf %22 : vector<32x3xf32> to vector<32x3xbf16>
    %c0_9 = arith.constant 0 : index
    %c0_10 = arith.constant 0 : index
    %24 = vector.load %arg4[%c0_9, %c0_10] : memref<3x32xbf16, #tpu.memory_space<vmem>>, vector<3x32xbf16>
    %cst_11 = arith.constant dense<0.000000e+00> : vector<32x32xf32>
    %25 = tpu.matmul %23, %24, %cst_11 {dimension_numbers = #tpu.dot_dimension_numbers<[1], [0], [0], [1], [0, 0, 1, 1], [], []>} : vector<32x3xbf16>, vector<3x32xbf16>, vector<32x32xf32> -> vector<32x32xf32>
    %26 = arith.addf %14, %25 : vector<32x32xf32>
    %c0_12 = arith.constant 0 : index
    %c0_13 = arith.constant 0 : index
    %27 = vector.load %arg5[%c0_12, %c0_13] : memref<1x32xf32, #tpu.memory_space<vmem>>, vector<1x32xf32>
    %28 = vector.broadcast %27 : vector<1x32xf32> to vector<32x32xf32>
    %29 = arith.addf %26, %28 : vector<32x32xf32>
    %30 = arith.truncf %29 : vector<32x32xf32> to vector<32x32xbf16>
    %c0_14 = arith.constant 0 : index
    %c0_15 = arith.constant 0 : index
    %31 = vector.load %arg6[%c0_14, %c0_15] : memref<32x96xbf16, #tpu.memory_space<vmem>>, vector<32x96xbf16>
    %cst_16 = arith.constant dense<0.000000e+00> : vector<32x96xf32>
    %32 = tpu.matmul %30, %31, %cst_16 {dimension_numbers = #tpu.dot_dimension_numbers<[1], [0], [0], [1], [0, 0, 1, 1], [], []>} : vector<32x32xbf16>, vector<32x96xbf16>, vector<32x96xf32> -> vector<32x96xf32>
    %c0_17 = arith.constant 0 : index
    %c0_18 = arith.constant 0 : index
    %33 = vector.load %arg7[%c0_17, %c0_18] : memref<1x96xf32, #tpu.memory_space<vmem>>, vector<1x96xf32>
    %34 = vector.broadcast %33 : vector<1x96xf32> to vector<32x96xf32>
    %35 = arith.addf %32, %34 : vector<32x96xf32>
    %36 = arith.mulf %21, %21 : vector<4x8x3xf32>
    %cst_19 = arith.constant dense<0.000000e+00> : vector<4x8xf32>
    %37 = vector.multi_reduction <add>, %36, %cst_19 [2] : vector<4x8x3xf32> to vector<4x8xf32>
    %38 = vector.shape_cast %37 : vector<4x8xf32> to vector<4x8x1xf32>
    %cst_20 = arith.constant 1.000000e+00 : f32
    %39 = vector.broadcast %cst_20 : f32 to vector<4x1x3xf32>
    %cst_21 = arith.constant dense<0.000000e+00> : vector<4x1x8xf32>
    %40 = tpu.matmul %39, %36, %cst_21 {dimension_numbers = #tpu.dot_dimension_numbers<[2], [2], [1], [1], [0, 0, 0, 1, 1, 1], [0], [0]>} : vector<4x1x3xf32>, vector<4x8x3xf32>, vector<4x1x8xf32> -> vector<4x1x8xf32>
    %cst_22 = arith.constant dense<0.000000e+00> : vector<4x8x8xf32>
    %41 = tpu.matmul %21, %21, %cst_22 {dimension_numbers = #tpu.dot_dimension_numbers<[2], [2], [1], [1], [0, 0, 0, 1, 1, 1], [0], [0]>} : vector<4x8x3xf32>, vector<4x8x3xf32>, vector<4x8x8xf32> -> vector<4x8x8xf32>
    %42 = vector.broadcast %38 : vector<4x8x1xf32> to vector<4x8x8xf32>
    %43 = vector.broadcast %40 : vector<4x1x8xf32> to vector<4x8x8xf32>
    %44 = arith.addf %42, %43 : vector<4x8x8xf32>
    %cst_23 = arith.constant 2.000000e+00 : f32
    %45 = vector.broadcast %cst_23 : f32 to vector<4x8x8xf32>
    %46 = arith.mulf %45, %41 : vector<4x8x8xf32>
    %47 = arith.subf %44, %46 : vector<4x8x8xf32>
    %cst_24 = arith.constant 0.000000e+00 : f32
    %48 = vector.broadcast %cst_24 : f32 to vector<4x8x8xf32>
    %49 = arith.maximumf %47, %48 : vector<4x8x8xf32>
    %50 = math.sqrt %49 : vector<4x8x8xf32>
    %51 = vector.extract_strided_slice %35 {offsets = [0, 0], sizes = [32, 16], strides = [1, 1]} : vector<32x96xf32> to vector<32x16xf32>
    %52 = arith.truncf %51 : vector<32x16xf32> to vector<32x16xbf16>
    %53 = vector.shape_cast %52 : vector<32x16xbf16> to vector<4x8x16xbf16>
    %54 = vector.extract_strided_slice %35 {offsets = [0, 32], sizes = [32, 16], strides = [1, 1]} : vector<32x96xf32> to vector<32x16xf32>
    %55 = arith.truncf %54 : vector<32x16xf32> to vector<32x16xbf16>
    %56 = vector.shape_cast %55 : vector<32x16xbf16> to vector<4x8x16xbf16>
    %57 = vector.extract_strided_slice %35 {offsets = [0, 64], sizes = [32, 16], strides = [1, 1]} : vector<32x96xf32> to vector<32x16xf32>
    %58 = arith.truncf %57 : vector<32x16xf32> to vector<32x16xbf16>
    %59 = vector.shape_cast %58 : vector<32x16xbf16> to vector<4x8x16xbf16>
    %cst_25 = arith.constant dense<0.000000e+00> : vector<4x8x8xf32>
    %60 = tpu.matmul %53, %56, %cst_25 {dimension_numbers = #tpu.dot_dimension_numbers<[2], [2], [1], [1], [0, 0, 0, 1, 1, 1], [0], [0]>} : vector<4x8x16xbf16>, vector<4x8x16xbf16>, vector<4x8x8xf32> -> vector<4x8x8xf32>
    %cst_26 = arith.constant 2.500000e-01 : f32
    %61 = vector.broadcast %cst_26 : f32 to vector<4x8x8xf32>
    %62 = arith.mulf %60, %61 : vector<4x8x8xf32>
    %c0_27 = arith.constant 0 : index
    %63 = memref.load %arg10[%c0_27] : memref<2xf32, #tpu.memory_space<smem>>
    %64 = vector.broadcast %63 : f32 to vector<4x8x8xf32>
    %65 = arith.mulf %64, %50 : vector<4x8x8xf32>
    %66 = arith.addf %62, %65 : vector<4x8x8xf32>
    %cst_28 = arith.constant dense<0xFF800000> : vector<4x8xf32>
    %67 = vector.multi_reduction <maximumf>, %66, %cst_28 [2] : vector<4x8x8xf32> to vector<4x8xf32>
    %68 = vector.shape_cast %67 : vector<4x8xf32> to vector<4x8x1xf32>
    %69 = vector.broadcast %68 : vector<4x8x1xf32> to vector<4x8x8xf32>
    %70 = arith.subf %66, %69 : vector<4x8x8xf32>
    %71 = math.exp %70 : vector<4x8x8xf32>
    %cst_29 = arith.constant dense<0.000000e+00> : vector<4x8xf32>
    %72 = vector.multi_reduction <add>, %71, %cst_29 [2] : vector<4x8x8xf32> to vector<4x8xf32>
    %73 = vector.shape_cast %72 : vector<4x8xf32> to vector<4x8x1xf32>
    %74 = tpu.reciprocal %73 {approx = true} : vector<4x8x1xf32> -> vector<4x8x1xf32>
    %75 = vector.broadcast %74 : vector<4x8x1xf32> to vector<4x8x8xf32>
    %76 = arith.mulf %71, %75 : vector<4x8x8xf32>
    %77 = arith.truncf %76 : vector<4x8x8xf32> to vector<4x8x8xbf16>
    %cst_30 = arith.constant dense<0.000000e+00> : vector<4x8x16xf32>
    %78 = tpu.matmul %77, %59, %cst_30 {dimension_numbers = #tpu.dot_dimension_numbers<[2], [1], [1], [2], [0, 0, 0, 1, 1, 2], [0], [0]>} : vector<4x8x8xbf16>, vector<4x8x16xbf16>, vector<4x8x16xf32> -> vector<4x8x16xf32>
    %79 = vector.shape_cast %78 : vector<4x8x16xf32> to vector<32x16xf32>
    %c0_31 = arith.constant 0 : index
    %c0_32 = arith.constant 0 : index
    %80 = vector.load %arg12[%c0_31, %c0_32] : memref<32x32xf32, #tpu.memory_space<vmem>>, vector<32x16xf32>
    tpu.vector_store %arg12[%c0_31, %c0_32], %79 {strides = array<i32>} : memref<32x32xf32, #tpu.memory_space<vmem>>, vector<32x16xf32>,
    %81 = vector.extract_strided_slice %35 {offsets = [0, 16], sizes = [32, 16], strides = [1, 1]} : vector<32x96xf32> to vector<32x16xf32>
    %82 = arith.truncf %81 : vector<32x16xf32> to vector<32x16xbf16>
    %83 = vector.shape_cast %82 : vector<32x16xbf16> to vector<4x8x16xbf16>
    %84 = vector.extract_strided_slice %35 {offsets = [0, 48], sizes = [32, 16], strides = [1, 1]} : vector<32x96xf32> to vector<32x16xf32>
    %85 = arith.truncf %84 : vector<32x16xf32> to vector<32x16xbf16>
    %86 = vector.shape_cast %85 : vector<32x16xbf16> to vector<4x8x16xbf16>
    %87 = vector.extract_strided_slice %35 {offsets = [0, 80], sizes = [32, 16], strides = [1, 1]} : vector<32x96xf32> to vector<32x16xf32>
    %88 = arith.truncf %87 : vector<32x16xf32> to vector<32x16xbf16>
    %89 = vector.shape_cast %88 : vector<32x16xbf16> to vector<4x8x16xbf16>
    %cst_33 = arith.constant dense<0.000000e+00> : vector<4x8x8xf32>
    %90 = tpu.matmul %83, %86, %cst_33 {dimension_numbers = #tpu.dot_dimension_numbers<[2], [2], [1], [1], [0, 0, 0, 1, 1, 1], [0], [0]>} : vector<4x8x16xbf16>, vector<4x8x16xbf16>, vector<4x8x8xf32> -> vector<4x8x8xf32>
    %cst_34 = arith.constant 2.500000e-01 : f32
    %91 = vector.broadcast %cst_34 : f32 to vector<4x8x8xf32>
    %92 = arith.mulf %90, %91 : vector<4x8x8xf32>
    %c1 = arith.constant 1 : index
    %93 = memref.load %arg10[%c1] : memref<2xf32, #tpu.memory_space<smem>>
    %94 = vector.broadcast %93 : f32 to vector<4x8x8xf32>
    %95 = arith.mulf %94, %50 : vector<4x8x8xf32>
    %96 = arith.addf %92, %95 : vector<4x8x8xf32>
    %cst_35 = arith.constant dense<0xFF800000> : vector<4x8xf32>
    %97 = vector.multi_reduction <maximumf>, %96, %cst_35 [2] : vector<4x8x8xf32> to vector<4x8xf32>
    %98 = vector.shape_cast %97 : vector<4x8xf32> to vector<4x8x1xf32>
    %99 = vector.broadcast %98 : vector<4x8x1xf32> to vector<4x8x8xf32>
    %100 = arith.subf %96, %99 : vector<4x8x8xf32>
    %101 = math.exp %100 : vector<4x8x8xf32>
    %cst_36 = arith.constant dense<0.000000e+00> : vector<4x8xf32>
    %102 = vector.multi_reduction <add>, %101, %cst_36 [2] : vector<4x8x8xf32> to vector<4x8xf32>
    %103 = vector.shape_cast %102 : vector<4x8xf32> to vector<4x8x1xf32>
    %104 = tpu.reciprocal %103 {approx = true} : vector<4x8x1xf32> -> vector<4x8x1xf32>
    %105 = vector.broadcast %104 : vector<4x8x1xf32> to vector<4x8x8xf32>
    %106 = arith.mulf %101, %105 : vector<4x8x8xf32>
    %107 = arith.truncf %106 : vector<4x8x8xf32> to vector<4x8x8xbf16>
    %cst_37 = arith.constant dense<0.000000e+00> : vector<4x8x16xf32>
    %108 = tpu.matmul %107, %89, %cst_37 {dimension_numbers = #tpu.dot_dimension_numbers<[2], [1], [1], [2], [0, 0, 0, 1, 1, 2], [0], [0]>} : vector<4x8x8xbf16>, vector<4x8x16xbf16>, vector<4x8x16xf32> -> vector<4x8x16xf32>
    %109 = vector.shape_cast %108 : vector<4x8x16xf32> to vector<32x16xf32>
    %c0_38 = arith.constant 0 : index
    %c16 = arith.constant 16 : index
    %110 = vector.load %arg12[%c0_38, %c16] : memref<32x32xf32, #tpu.memory_space<vmem>>, vector<32x16xf32>
    tpu.vector_store %arg12[%c0_38, %c16], %109 {strides = array<i32>} : memref<32x32xf32, #tpu.memory_space<vmem>>, vector<32x16xf32>,
    %c0_39 = arith.constant 0 : index
    %c0_40 = arith.constant 0 : index
    %111 = vector.load %arg12[%c0_39, %c0_40] : memref<32x32xf32, #tpu.memory_space<vmem>>, vector<32x32xf32>
    %112 = arith.truncf %111 : vector<32x32xf32> to vector<32x32xbf16>
    %c0_41 = arith.constant 0 : index
    %c0_42 = arith.constant 0 : index
    %113 = vector.load %arg8[%c0_41, %c0_42] : memref<32x32xbf16, #tpu.memory_space<vmem>>, vector<32x32xbf16>
    %cst_43 = arith.constant dense<0.000000e+00> : vector<32x32xf32>
    %114 = tpu.matmul %112, %113, %cst_43 {dimension_numbers = #tpu.dot_dimension_numbers<[1], [0], [0], [1], [0, 0, 1, 1], [], []>} : vector<32x32xbf16>, vector<32x32xbf16>, vector<32x32xf32> -> vector<32x32xf32>
    %c0_44 = arith.constant 0 : index
    %c0_45 = arith.constant 0 : index
    %115 = vector.load %arg9[%c0_44, %c0_45] : memref<1x32xf32, #tpu.memory_space<vmem>>, vector<1x32xf32>
    %116 = vector.broadcast %115 : vector<1x32xf32> to vector<32x32xf32>
    %117 = arith.addf %114, %116 : vector<32x32xf32>
    %118 = arith.addf %0, %117 : vector<32x32xf32>
    %c0_46 = arith.constant 0 : index
    %c0_47 = arith.constant 0 : index
    %119 = vector.load %arg11[%c0_46, %c0_47] : memref<32x32xf32, #tpu.memory_space<vmem>>, vector<32x32xf32>
    tpu.vector_store %arg11[%c0_46, %c0_47], %118 {strides = array<i32>} : memref<32x32xf32, #tpu.memory_space<vmem>>, vector<32x32xf32>,
    return
  }
  func.func @transform_0(%arg0: i32) -> (i32, i32) {
    %c0_i32 = arith.constant 0 : i32
    %c0_i32_0 = arith.constant 0 : i32
    return %arg0, %c0_i32 : i32, i32
  }
  func.func @transform_1(%arg0: i32) -> (i32, i32) {
    %c0_i32 = arith.constant 0 : i32
    %c0_i32_0 = arith.constant 0 : i32
    return %arg0, %c0_i32 : i32, i32
  }
  func.func @transform_2(%arg0: i32) -> (i32, i32) {
    %c0_i32 = arith.constant 0 : i32
    %c0_i32_0 = arith.constant 0 : i32
    %c0_i32_1 = arith.constant 0 : i32
    return %c0_i32, %c0_i32_0 : i32, i32
  }
  func.func @transform_3(%arg0: i32) -> (i32, i32) {
    %c0_i32 = arith.constant 0 : i32
    %c0_i32_0 = arith.constant 0 : i32
    %c0_i32_1 = arith.constant 0 : i32
    return %c0_i32, %c0_i32_0 : i32, i32
  }
  func.func @transform_4(%arg0: i32) -> (i32, i32) {
    %c0_i32 = arith.constant 0 : i32
    %c0_i32_0 = arith.constant 0 : i32
    %c0_i32_1 = arith.constant 0 : i32
    return %c0_i32, %c0_i32_0 : i32, i32
  }
  func.func @transform_5(%arg0: i32) -> (i32, i32) {
    %c0_i32 = arith.constant 0 : i32
    %c0_i32_0 = arith.constant 0 : i32
    %c0_i32_1 = arith.constant 0 : i32
    return %c0_i32, %c0_i32_0 : i32, i32
  }
  func.func @transform_6(%arg0: i32) -> (i32, i32) {
    %c0_i32 = arith.constant 0 : i32
    %c0_i32_0 = arith.constant 0 : i32
    %c0_i32_1 = arith.constant 0 : i32
    return %c0_i32, %c0_i32_0 : i32, i32
  }
  func.func @transform_7(%arg0: i32) -> (i32, i32) {
    %c0_i32 = arith.constant 0 : i32
    %c0_i32_0 = arith.constant 0 : i32
    %c0_i32_1 = arith.constant 0 : i32
    return %c0_i32, %c0_i32_0 : i32, i32
  }
  func.func @transform_8(%arg0: i32) -> (i32, i32) {
    %c0_i32 = arith.constant 0 : i32
    %c0_i32_0 = arith.constant 0 : i32
    %c0_i32_1 = arith.constant 0 : i32
    return %c0_i32, %c0_i32_0 : i32, i32
  }
  func.func @transform_9(%arg0: i32) -> i32 {
    %c0_i32 = arith.constant 0 : i32
    %c0_i32_0 = arith.constant 0 : i32
    return %c0_i32 : i32
  }
  func.func @transform_10(%arg0: i32) -> (i32, i32) {
    %c0_i32 = arith.constant 0 : i32
    %c0_i32_0 = arith.constant 0 : i32
    return %arg0, %c0_i32 : i32, i32
  }
}

module attributes {stable_mosaic.version = 11 : i64} {
  func.func @_mlp_block_kernel(%arg0: i32, %arg1: i32, %arg2: memref<16x32xf32, #tpu.memory_space<vmem>>, %arg3: memref<1x32xf32, #tpu.memory_space<vmem>>, %arg4: memref<32x128xbf16, #tpu.memory_space<vmem>>, %arg5: memref<1x128xf32, #tpu.memory_space<vmem>>, %arg6: memref<32x128xbf16, #tpu.memory_space<vmem>>, %arg7: memref<1x128xf32, #tpu.memory_space<vmem>>, %arg8: memref<128x32xbf16, #tpu.memory_space<vmem>>, %arg9: memref<1x32xf32, #tpu.memory_space<vmem>>, %arg10: memref<16x32xf32, #tpu.memory_space<vmem>>, %arg11: memref<16x32xf32, #tpu.memory_space<vmem>>) attributes {dimension_semantics = [#tpu.dimension_semantics<parallel>, #tpu.dimension_semantics<arbitrary>], iteration_bounds = array<i64: 2, 1>, scalar_prefetch = 0 : i64, scratch_operands = 1 : i64, tpu.core_type = #tpu.core_type<tc>, window_params = [{transform_indices = @transform_0, window_bounds = array<i64: 16, 32>}, {pipeline_mode = #tpu.pipeline_mode<synchronous>, transform_indices = @transform_1, window_bounds = array<i64: 1, 32>}, {transform_indices = @transform_2, window_bounds = array<i64: 32, 128>}, {transform_indices = @transform_3, window_bounds = array<i64: 1, 128>}, {transform_indices = @transform_4, window_bounds = array<i64: 32, 128>}, {transform_indices = @transform_5, window_bounds = array<i64: 1, 128>}, {transform_indices = @transform_6, window_bounds = array<i64: 128, 32>}, {pipeline_mode = #tpu.pipeline_mode<synchronous>, transform_indices = @transform_7, window_bounds = array<i64: 1, 32>}, {transform_indices = @transform_8, window_bounds = array<i64: 16, 32>}]} {
    %c0 = arith.constant 0 : index
    %c0_0 = arith.constant 0 : index
    %0 = vector.load %arg2[%c0, %c0_0] : memref<16x32xf32, #tpu.memory_space<vmem>>, vector<16x32xf32>
    %1 = arith.mulf %0, %0 : vector<16x32xf32>
    %cst = arith.constant dense<0.000000e+00> : vector<16xf32>
    %2 = vector.multi_reduction <add>, %1, %cst [1] : vector<16x32xf32> to vector<16xf32>
    %3 = vector.shape_cast %2 : vector<16xf32> to vector<16x1xf32>
    %cst_1 = arith.constant 3.200000e+01 : f32
    %4 = vector.broadcast %cst_1 : f32 to vector<16x1xf32>
    %5 = arith.divf %3, %4 : vector<16x1xf32>
    %cst_2 = arith.constant 1.1920929E-7 : f32
    %6 = vector.broadcast %cst_2 : f32 to vector<16x1xf32>
    %7 = arith.addf %5, %6 : vector<16x1xf32>
    %8 = math.rsqrt %7 : vector<16x1xf32>
    %9 = vector.broadcast %8 : vector<16x1xf32> to vector<16x32xf32>
    %10 = arith.mulf %0, %9 : vector<16x32xf32>
    %c0_3 = arith.constant 0 : index
    %c0_4 = arith.constant 0 : index
    %11 = vector.load %arg3[%c0_3, %c0_4] : memref<1x32xf32, #tpu.memory_space<vmem>>, vector<1x32xf32>
    %12 = vector.broadcast %11 : vector<1x32xf32> to vector<16x32xf32>
    %13 = arith.mulf %10, %12 : vector<16x32xf32>
    %14 = arith.truncf %13 : vector<16x32xf32> to vector<16x32xbf16>
    %c0_5 = arith.constant 0 : index
    %c0_6 = arith.constant 0 : index
    %15 = vector.load %arg4[%c0_5, %c0_6] : memref<32x128xbf16, #tpu.memory_space<vmem>>, vector<32x128xbf16>
    %cst_7 = arith.constant dense<0.000000e+00> : vector<16x128xf32>
    %16 = tpu.matmul %14, %15, %cst_7 {dimension_numbers = #tpu.dot_dimension_numbers<[1], [0], [0], [1], [0, 0, 1, 1], [], []>} : vector<16x32xbf16>, vector<32x128xbf16>, vector<16x128xf32> -> vector<16x128xf32>
    %c0_8 = arith.constant 0 : index
    %c0_9 = arith.constant 0 : index
    %17 = vector.load %arg5[%c0_8, %c0_9] : memref<1x128xf32, #tpu.memory_space<vmem>>, vector<1x128xf32>
    %18 = vector.broadcast %17 : vector<1x128xf32> to vector<16x128xf32>
    %19 = arith.addf %16, %18 : vector<16x128xf32>
    %c0_10 = arith.constant 0 : index
    %c0_11 = arith.constant 0 : index
    %20 = vector.load %arg6[%c0_10, %c0_11] : memref<32x128xbf16, #tpu.memory_space<vmem>>, vector<32x128xbf16>
    %cst_12 = arith.constant dense<0.000000e+00> : vector<16x128xf32>
    %21 = tpu.matmul %14, %20, %cst_12 {dimension_numbers = #tpu.dot_dimension_numbers<[1], [0], [0], [1], [0, 0, 1, 1], [], []>} : vector<16x32xbf16>, vector<32x128xbf16>, vector<16x128xf32> -> vector<16x128xf32>
    %c0_13 = arith.constant 0 : index
    %c0_14 = arith.constant 0 : index
    %22 = vector.load %arg7[%c0_13, %c0_14] : memref<1x128xf32, #tpu.memory_space<vmem>>, vector<1x128xf32>
    %23 = vector.broadcast %22 : vector<1x128xf32> to vector<16x128xf32>
    %24 = arith.addf %21, %23 : vector<16x128xf32>
    %cst_15 = arith.constant 0.000000e+00 : f32
    %25 = vector.broadcast %cst_15 : f32 to vector<16x128xf32>
    %26 = arith.subf %25, %19 : vector<16x128xf32>
    %27 = math.exp %26 : vector<16x128xf32>
    %cst_16 = arith.constant 1.000000e+00 : f32
    %28 = vector.broadcast %cst_16 : f32 to vector<16x128xf32>
    %29 = arith.addf %28, %27 : vector<16x128xf32>
    %cst_17 = arith.constant 1.000000e+00 : f32
    %30 = vector.broadcast %cst_17 : f32 to vector<16x128xf32>
    %31 = arith.divf %30, %29 : vector<16x128xf32>
    %32 = arith.mulf %19, %31 : vector<16x128xf32>
    %33 = arith.mulf %24, %32 : vector<16x128xf32>
    %34 = arith.truncf %33 : vector<16x128xf32> to vector<16x128xbf16>
    %c0_18 = arith.constant 0 : index
    %c0_19 = arith.constant 0 : index
    %35 = vector.load %arg8[%c0_18, %c0_19] : memref<128x32xbf16, #tpu.memory_space<vmem>>, vector<128x32xbf16>
    %cst_20 = arith.constant dense<0.000000e+00> : vector<16x32xf32>
    %36 = tpu.matmul %34, %35, %cst_20 {dimension_numbers = #tpu.dot_dimension_numbers<[1], [0], [0], [1], [0, 0, 1, 1], [], []>} : vector<16x128xbf16>, vector<128x32xbf16>, vector<16x32xf32> -> vector<16x32xf32>
    %c0_i32 = arith.constant 0 : i32
    %37 = arith.cmpi eq, %arg1, %c0_i32 : i32
    %38 = arith.extui %37 : i1 to i32
    %c0_i32_21 = arith.constant 0 : i32
    %39 = arith.cmpi ne, %38, %c0_i32_21 : i32
    scf.if %39 {
      %c0_28 = arith.constant 0 : index
      %c0_29 = arith.constant 0 : index
      %46 = vector.load %arg9[%c0_28, %c0_29] : memref<1x32xf32, #tpu.memory_space<vmem>>, vector<1x32xf32>
      %47 = vector.broadcast %46 : vector<1x32xf32> to vector<16x32xf32>
      %48 = arith.addf %0, %47 : vector<16x32xf32>
      %c0_30 = arith.constant 0 : index
      %c0_31 = arith.constant 0 : index
      %49 = vector.load %arg11[%c0_30, %c0_31] : memref<16x32xf32, #tpu.memory_space<vmem>>, vector<16x32xf32>
      tpu.vector_store %arg11[%c0_30, %c0_31], %48 {strides = array<i32>} : memref<16x32xf32, #tpu.memory_space<vmem>>, vector<16x32xf32>,
    } else {
    }
    %c0_22 = arith.constant 0 : index
    %c0_23 = arith.constant 0 : index
    %40 = vector.load %arg11[%c0_22, %c0_23] : memref<16x32xf32, #tpu.memory_space<vmem>>, vector<16x32xf32>
    %41 = arith.addf %40, %36 : vector<16x32xf32>
    %c0_24 = arith.constant 0 : index
    %c0_25 = arith.constant 0 : index
    %42 = vector.load %arg11[%c0_24, %c0_25] : memref<16x32xf32, #tpu.memory_space<vmem>>, vector<16x32xf32>
    tpu.vector_store %arg11[%c0_24, %c0_25], %41 {strides = array<i32>} : memref<16x32xf32, #tpu.memory_space<vmem>>, vector<16x32xf32>,
    %c0_i32_26 = arith.constant 0 : i32
    %43 = arith.cmpi eq, %arg1, %c0_i32_26 : i32
    %44 = arith.extui %43 : i1 to i32
    %c0_i32_27 = arith.constant 0 : i32
    %45 = arith.cmpi ne, %44, %c0_i32_27 : i32
    scf.if %45 {
      %c0_28 = arith.constant 0 : index
      %c0_29 = arith.constant 0 : index
      %46 = vector.load %arg11[%c0_28, %c0_29] : memref<16x32xf32, #tpu.memory_space<vmem>>, vector<16x32xf32>
      %c0_30 = arith.constant 0 : index
      %c0_31 = arith.constant 0 : index
      %47 = vector.load %arg10[%c0_30, %c0_31] : memref<16x32xf32, #tpu.memory_space<vmem>>, vector<16x32xf32>
      tpu.vector_store %arg10[%c0_30, %c0_31], %46 {strides = array<i32>} : memref<16x32xf32, #tpu.memory_space<vmem>>, vector<16x32xf32>,
    } else {
    }
    return
  }
  func.func @transform_0(%arg0: i32, %arg1: i32) -> (i32, i32) {
    %c0_i32 = arith.constant 0 : i32
    %c0_i32_0 = arith.constant 0 : i32
    return %arg0, %c0_i32 : i32, i32
  }
  func.func @transform_1(%arg0: i32, %arg1: i32) -> (i32, i32) {
    %c0_i32 = arith.constant 0 : i32
    %c0_i32_0 = arith.constant 0 : i32
    %c0_i32_1 = arith.constant 0 : i32
    return %c0_i32, %c0_i32_0 : i32, i32
  }
  func.func @transform_2(%arg0: i32, %arg1: i32) -> (i32, i32) {
    %c0_i32 = arith.constant 0 : i32
    %c0_i32_0 = arith.constant 0 : i32
    return %c0_i32, %arg1 : i32, i32
  }
  func.func @transform_3(%arg0: i32, %arg1: i32) -> (i32, i32) {
    %c0_i32 = arith.constant 0 : i32
    %c0_i32_0 = arith.constant 0 : i32
    return %c0_i32, %arg1 : i32, i32
  }
  func.func @transform_4(%arg0: i32, %arg1: i32) -> (i32, i32) {
    %c0_i32 = arith.constant 0 : i32
    %c0_i32_0 = arith.constant 0 : i32
    return %c0_i32, %arg1 : i32, i32
  }
  func.func @transform_5(%arg0: i32, %arg1: i32) -> (i32, i32) {
    %c0_i32 = arith.constant 0 : i32
    %c0_i32_0 = arith.constant 0 : i32
    return %c0_i32, %arg1 : i32, i32
  }
  func.func @transform_6(%arg0: i32, %arg1: i32) -> (i32, i32) {
    %c0_i32 = arith.constant 0 : i32
    %c0_i32_0 = arith.constant 0 : i32
    return %arg1, %c0_i32 : i32, i32
  }
  func.func @transform_7(%arg0: i32, %arg1: i32) -> (i32, i32) {
    %c0_i32 = arith.constant 0 : i32
    %c0_i32_0 = arith.constant 0 : i32
    %c0_i32_1 = arith.constant 0 : i32
    return %c0_i32, %c0_i32_0 : i32, i32
  }
  func.func @transform_8(%arg0: i32, %arg1: i32) -> (i32, i32) {
    %c0_i32 = arith.constant 0 : i32
    %c0_i32_0 = arith.constant 0 : i32
    return %arg0, %c0_i32 : i32, i32
  }
}

module attributes {stable_mosaic.version = 11 : i64} {
  func.func @_linear_kernel(%arg0: i32, %arg1: memref<16x38xf32, #tpu.memory_space<vmem>>, %arg2: memref<38x32xf32, #tpu.memory_space<vmem>>, %arg3: memref<1x32xf32, #tpu.memory_space<vmem>>, %arg4: memref<16x32xf32, #tpu.memory_space<vmem>>) attributes {dimension_semantics = [#tpu.dimension_semantics<parallel>], iteration_bounds = array<i64: 2>, scalar_prefetch = 0 : i64, scratch_operands = 0 : i64, tpu.core_type = #tpu.core_type<tc>, window_params = [{transform_indices = @transform_0, window_bounds = array<i64: 16, 38>}, {pipeline_mode = #tpu.pipeline_mode<synchronous>, transform_indices = @transform_1, window_bounds = array<i64: 38, 32>}, {pipeline_mode = #tpu.pipeline_mode<synchronous>, transform_indices = @transform_2, window_bounds = array<i64: 1, 32>}, {transform_indices = @transform_3, window_bounds = array<i64: 16, 32>}]} {
    %c0 = arith.constant 0 : index
    %c0_0 = arith.constant 0 : index
    %0 = vector.load %arg1[%c0, %c0_0] : memref<16x38xf32, #tpu.memory_space<vmem>>, vector<16x38xf32>
    %c0_1 = arith.constant 0 : index
    %c0_2 = arith.constant 0 : index
    %1 = vector.load %arg2[%c0_1, %c0_2] : memref<38x32xf32, #tpu.memory_space<vmem>>, vector<38x32xf32>
    %cst = arith.constant dense<0.000000e+00> : vector<16x32xf32>
    %2 = tpu.matmul %0, %1, %cst {dimension_numbers = #tpu.dot_dimension_numbers<[1], [0], [0], [1], [0, 0, 1, 1], [], []>} : vector<16x38xf32>, vector<38x32xf32>, vector<16x32xf32> -> vector<16x32xf32>
    %c0_3 = arith.constant 0 : index
    %c0_4 = arith.constant 0 : index
    %3 = vector.load %arg3[%c0_3, %c0_4] : memref<1x32xf32, #tpu.memory_space<vmem>>, vector<1x32xf32>
    %4 = vector.broadcast %3 : vector<1x32xf32> to vector<16x32xf32>
    %5 = arith.addf %2, %4 : vector<16x32xf32>
    %c0_5 = arith.constant 0 : index
    %c0_6 = arith.constant 0 : index
    %6 = vector.load %arg4[%c0_5, %c0_6] : memref<16x32xf32, #tpu.memory_space<vmem>>, vector<16x32xf32>
    tpu.vector_store %arg4[%c0_5, %c0_6], %5 {strides = array<i32>} : memref<16x32xf32, #tpu.memory_space<vmem>>, vector<16x32xf32>,
    return
  }
  func.func @transform_0(%arg0: i32) -> (i32, i32) {
    %c0_i32 = arith.constant 0 : i32
    %c0_i32_0 = arith.constant 0 : i32
    return %arg0, %c0_i32 : i32, i32
  }
  func.func @transform_1(%arg0: i32) -> (i32, i32) {
    %c0_i32 = arith.constant 0 : i32
    %c0_i32_0 = arith.constant 0 : i32
    %c0_i32_1 = arith.constant 0 : i32
    return %c0_i32, %c0_i32_0 : i32, i32
  }
  func.func @transform_2(%arg0: i32) -> (i32, i32) {
    %c0_i32 = arith.constant 0 : i32
    %c0_i32_0 = arith.constant 0 : i32
    %c0_i32_1 = arith.constant 0 : i32
    return %c0_i32, %c0_i32_0 : i32, i32
  }
  func.func @transform_3(%arg0: i32) -> (i32, i32) {
    %c0_i32 = arith.constant 0 : i32
    %c0_i32_0 = arith.constant 0 : i32
    return %arg0, %c0_i32 : i32, i32
  }
}

module attributes {stable_mosaic.version = 11 : i64} {
  func.func @_add_rmsnorm_kernel(%arg0: i32, %arg1: memref<32x16xf32, #tpu.memory_space<vmem>>, %arg2: memref<32x16xf32, #tpu.memory_space<vmem>>, %arg3: memref<1x16xf32, #tpu.memory_space<vmem>>, %arg4: memref<32x16xf32, #tpu.memory_space<vmem>>) attributes {dimension_semantics = [#tpu.dimension_semantics<parallel>], iteration_bounds = array<i64: 2>, scalar_prefetch = 0 : i64, scratch_operands = 0 : i64, tpu.core_type = #tpu.core_type<tc>, window_params = [{transform_indices = @transform_0, window_bounds = array<i64: 32, 16>}, {transform_indices = @transform_1, window_bounds = array<i64: 32, 16>}, {pipeline_mode = #tpu.pipeline_mode<synchronous>, transform_indices = @transform_2, window_bounds = array<i64: 1, 16>}, {transform_indices = @transform_3, window_bounds = array<i64: 32, 16>}]} {
    %c0 = arith.constant 0 : index
    %c0_0 = arith.constant 0 : index
    %0 = vector.load %arg1[%c0, %c0_0] : memref<32x16xf32, #tpu.memory_space<vmem>>, vector<32x16xf32>
    %c0_1 = arith.constant 0 : index
    %c0_2 = arith.constant 0 : index
    %1 = vector.load %arg2[%c0_1, %c0_2] : memref<32x16xf32, #tpu.memory_space<vmem>>, vector<32x16xf32>
    %2 = arith.addf %0, %1 : vector<32x16xf32>
    %3 = arith.mulf %2, %2 : vector<32x16xf32>
    %cst = arith.constant dense<0.000000e+00> : vector<32xf32>
    %4 = vector.multi_reduction <add>, %3, %cst [1] : vector<32x16xf32> to vector<32xf32>
    %5 = vector.shape_cast %4 : vector<32xf32> to vector<32x1xf32>
    %cst_3 = arith.constant 1.600000e+01 : f32
    %6 = vector.broadcast %cst_3 : f32 to vector<32x1xf32>
    %7 = arith.divf %5, %6 : vector<32x1xf32>
    %cst_4 = arith.constant 1.1920929E-7 : f32
    %8 = vector.broadcast %cst_4 : f32 to vector<32x1xf32>
    %9 = arith.addf %7, %8 : vector<32x1xf32>
    %10 = math.rsqrt %9 : vector<32x1xf32>
    %11 = vector.broadcast %10 : vector<32x1xf32> to vector<32x16xf32>
    %12 = arith.mulf %2, %11 : vector<32x16xf32>
    %c0_5 = arith.constant 0 : index
    %c0_6 = arith.constant 0 : index
    %13 = vector.load %arg3[%c0_5, %c0_6] : memref<1x16xf32, #tpu.memory_space<vmem>>, vector<1x16xf32>
    %14 = vector.broadcast %13 : vector<1x16xf32> to vector<32x16xf32>
    %15 = arith.mulf %12, %14 : vector<32x16xf32>
    %c0_7 = arith.constant 0 : index
    %c0_8 = arith.constant 0 : index
    %16 = vector.load %arg4[%c0_7, %c0_8] : memref<32x16xf32, #tpu.memory_space<vmem>>, vector<32x16xf32>
    tpu.vector_store %arg4[%c0_7, %c0_8], %15 {strides = array<i32>} : memref<32x16xf32, #tpu.memory_space<vmem>>, vector<32x16xf32>,
    return
  }
  func.func @transform_0(%arg0: i32) -> (i32, i32) {
    %c0_i32 = arith.constant 0 : i32
    %c0_i32_0 = arith.constant 0 : i32
    return %arg0, %c0_i32 : i32, i32
  }
  func.func @transform_1(%arg0: i32) -> (i32, i32) {
    %c0_i32 = arith.constant 0 : i32
    %c0_i32_0 = arith.constant 0 : i32
    return %arg0, %c0_i32 : i32, i32
  }
  func.func @transform_2(%arg0: i32) -> (i32, i32) {
    %c0_i32 = arith.constant 0 : i32
    %c0_i32_0 = arith.constant 0 : i32
    %c0_i32_1 = arith.constant 0 : i32
    return %c0_i32, %c0_i32_0 : i32, i32
  }
  func.func @transform_3(%arg0: i32) -> (i32, i32) {
    %c0_i32 = arith.constant 0 : i32
    %c0_i32_0 = arith.constant 0 : i32
    return %arg0, %c0_i32 : i32, i32
  }
}

</mosaic_0001>

<bundles_post_ra>
// kernel: sub.9
= control target key start
LH: loop header
LB: loop body
LE: loop exit
PB: predicated region body
PF: predicated region fallthrough
CT: control target
= control target key end

     0   :  { %s540_s0 = inlined_call_operand.vmem [shape: f32[192,3], index: 0, kind: input, shape index: {}]   ;;  %s541_s1 = inlined_call_operand.vmem [shape: f32[192,3], index: 1, kind: input, shape index: {}]   ;;  %s542_s2 = inlined_call_operand.vmem [shape: f32[192,3], index: 2, kind: output, shape index: {}]  }
   0x1   :  { %v3_v0 = vld [vmem:[%s540_s0] sm:$0xff]  ;;  %v240_v2 = vld [vmem:[%s540_s0 + $0x8] sm:$0xff]  ;;  %v243_v5 = vld [vmem:[%s540_s0 + $0x10] sm:$0xff] }
   0x2   :  { %v4_v1 = vld [vmem:[%s541_s1] sm:$0xff]  ;;  %v241_v4 = vld [vmem:[%s541_s1 + $0x8] sm:$0xff]  ;;  %v244_v6 = vld [vmem:[%s541_s1 + $0x10] sm:$0xff] }
   0x3   :  { %v7_v3 = vsub.f32 %v3_v0, %v4_v1  ;;  %v16_v7 = vsub.f32 %v240_v2, %v241_v4  ;;  %v26_v8 = vsub.f32 %v243_v5, %v244_v6  ;;  %v246_v9 = vld [vmem:[%s540_s0 + $0x18] sm:$0xff]  ;;  %v249_v11 = vld [vmem:[%s540_s0 + $0x20] sm:$0xff]  ;;  %v252_v14 = vld [vmem:[%s540_s0 + $0x28] sm:$0xff] }
   0x4   :  { %v247_v10 = vld [vmem:[%s541_s1 + $0x18] sm:$0xff]  ;;  %v250_v13 = vld [vmem:[%s541_s1 + $0x20] sm:$0xff]  ;;  %v253_v15 = vld [vmem:[%s541_s1 + $0x28] sm:$0xff] }
   0x5   :  { %9 = vst [vmem:[%s542_s2] sm:$0xff] %v7_v3  ;;  %v36_v12 = vsub.f32 %v246_v9, %v247_v10  ;;  %242 = vst [vmem:[%s542_s2 + $0x8] sm:$0xff] %v16_v7  ;;  %v46_v16 = vsub.f32 %v249_v11, %v250_v13  ;;  %v56_v17 = vsub.f32 %v252_v14, %v253_v15  ;;  %v255_v18 = vld [vmem:[%s540_s0 + $0x30] sm:$0xff]  ;;  %v258_v20 = vld [vmem:[%s540_s0 + $0x38] sm:$0xff] }
   0x6   :  { %245 = vst [vmem:[%s542_s2 + $0x10] sm:$0xff] %v26_v8  ;;  %v256_v19 = vld [vmem:[%s541_s1 + $0x30] sm:$0xff]  ;;  %v259_v22 = vld [vmem:[%s541_s1 + $0x38] sm:$0xff]  ;;  %v261_v23 = vld [vmem:[%s540_s0 + $0x40] sm:$0xff] }
   0x7   :  { %248 = vst [vmem:[%s542_s2 + $0x18] sm:$0xff] %v36_v12  ;;  %v66_v21 = vsub.f32 %v255_v18, %v256_v19  ;;  %v262_v24 = vld [vmem:[%s541_s1 + $0x40] sm:$0xff]  ;;  %251 = vst [vmem:[%s542_s2 + $0x20] sm:$0xff] %v46_v16  ;;  %v76_v25 = vsub.f32 %v258_v20, %v259_v22  ;;  %v264_v27 = vld [vmem:[%s540_s0 + $0x48] sm:$0xff] }
   0x8   :  { %254 = vst [vmem:[%s542_s2 + $0x28] sm:$0xff] %v56_v17  ;;  %v86_v26 = vsub.f32 %v261_v23, %v262_v24  ;;  %v265_v28 = vld [vmem:[%s541_s1 + $0x48] sm:$0xff]  ;;  %v267_v29 = vld [vmem:[%s540_s0 + $0x50] sm:$0xff]  ;;  %v270_v32 = vld [vmem:[%s540_s0 + $0x58] sm:$0xff] }
   0x9   :  { %257 = vst [vmem:[%s542_s2 + $0x30] sm:$0xff] %v66_v21  ;;  %v96_v30 = vsub.f32 %v264_v27, %v265_v28  ;;  %v268_v31 = vld [vmem:[%s541_s1 + $0x50] sm:$0xff]  ;;  %v271_v33 = vld [vmem:[%s541_s1 + $0x58] sm:$0xff]  ;;  %260 = vst [vmem:[%s542_s2 + $0x38] sm:$0xff] %v76_v25 }
   0xa   :  { %263 = vst [vmem:[%s542_s2 + $0x40] sm:$0xff] %v86_v26  ;;  %v106_v34 = vsub.f32 %v267_v29, %v268_v31  ;;  %v116_v35 = vsub.f32 %v270_v32, %v271_v33  ;;  %v273_v36 = vld [vmem:[%s540_s0 + $0x60] sm:$0xff]  ;;  %v276_v38 = vld [vmem:[%s540_s0 + $0x68] sm:$0xff]  ;;  %v279_v41 = vld [vmem:[%s540_s0 + $0x70] sm:$0xff] }
   0xb   :  { %v274_v37 = vld [vmem:[%s541_s1 + $0x60] sm:$0xff]  ;;  %266 = vst [vmem:[%s542_s2 + $0x48] sm:$0xff] %v96_v30  ;;  %v277_v40 = vld [vmem:[%s541_s1 + $0x68] sm:$0xff]  ;;  %v280_v42 = vld [vmem:[%s541_s1 + $0x70] sm:$0xff] }
   0xc   :  { %v126_v39 = vsub.f32 %v273_v36, %v274_v37  ;;  %269 = vst [vmem:[%s542_s2 + $0x50] sm:$0xff] %v106_v34  ;;  %272 = vst [vmem:[%s542_s2 + $0x58] sm:$0xff] %v116_v35  ;;  %v136_v43 = vsub.f32 %v276_v38, %v277_v40  ;;  %v146_v44 = vsub.f32 %v279_v41, %v280_v42  ;;  %v282_v45 = vld [vmem:[%s540_s0 + $0x78] sm:$0xff]  ;;  %v285_v47 = vld [vmem:[%s540_s0 + $0x80] sm:$0xff] }
   0xd   :  { %v283_v46 = vld [vmem:[%s541_s1 + $0x78] sm:$0xff]  ;;  %v286_v49 = vld [vmem:[%s541_s1 + $0x80] sm:$0xff]  ;;  %v288_v50 = vld [vmem:[%s540_s0 + $0x88] sm:$0xff] }
   0xe   :  { %275 = vst [vmem:[%s542_s2 + $0x60] sm:$0xff] %v126_v39  ;;  %v156_v48 = vsub.f32 %v282_v45, %v283_v46  ;;  %v289_v51 = vld [vmem:[%s541_s1 + $0x88] sm:$0xff]  ;;  %278 = vst [vmem:[%s542_s2 + $0x68] sm:$0xff] %v136_v43  ;;  %v166_v52 = vsub.f32 %v285_v47, %v286_v49  ;;  %v291_v54 = vld [vmem:[%s540_s0 + $0x90] sm:$0xff] }
   0xf   :  { %281 = vst [vmem:[%s542_s2 + $0x70] sm:$0xff] %v146_v44  ;;  %v176_v53 = vsub.f32 %v288_v50, %v289_v51  ;;  %v292_v55 = vld [vmem:[%s541_s1 + $0x90] sm:$0xff]  ;;  %v294_v56 = vld [vmem:[%s540_s0 + $0x98] sm:$0xff]  ;;  %v297_v59 = vld [vmem:[%s540_s0 + $0xa0] sm:$0xff] }
  0x10   :  { %284 = vst [vmem:[%s542_s2 + $0x78] sm:$0xff] %v156_v48  ;;  %v186_v57 = vsub.f32 %v291_v54, %v292_v55  ;;  %v295_v58 = vld [vmem:[%s541_s1 + $0x98] sm:$0xff]  ;;  %v298_v60 = vld [vmem:[%s541_s1 + $0xa0] sm:$0xff]  ;;  %287 = vst [vmem:[%s542_s2 + $0x80] sm:$0xff] %v166_v52 }
  0x11   :  { %290 = vst [vmem:[%s542_s2 + $0x88] sm:$0xff] %v176_v53  ;;  %v196_v61 = vsub.f32 %v294_v56, %v295_v58  ;;  %v206_v62 = vsub.f32 %v297_v59, %v298_v60  ;;  %v300_v63 = vld [vmem:[%s540_s0 + $0xa8] sm:$0xff]  ;;  %v303_v1 = vld [vmem:[%s540_s0 + $0xb0] sm:$0xff]  ;;  %v306_v4 = vld [vmem:[%s540_s0 + $0xb8] sm:$0xff] }
  0x12   :  { %v301_v0 = vld [vmem:[%s541_s1 + $0xa8] sm:$0xff]  ;;  %293 = vst [vmem:[%s542_s2 + $0x90] sm:$0xff] %v186_v57  ;;  %v304_v3 = vld [vmem:[%s541_s1 + $0xb0] sm:$0xff]  ;;  %v307_v5 = vld [vmem:[%s541_s1 + $0xb8] sm:$0xff] }
  0x13   :  { %v216_v2 = vsub.f32 %v300_v63, %v301_v0  ;;  %296 = vst [vmem:[%s542_s2 + $0x98] sm:$0xff] %v196_v61  ;;  %299 = vst [vmem:[%s542_s2 + $0xa0] sm:$0xff] %v206_v62  ;;  %v226_v6 = vsub.f32 %v303_v1, %v304_v3  ;;  %v236_v7 = vsub.f32 %v306_v4, %v307_v5 }
  0x15   :  { %302 = vst [vmem:[%s542_s2 + $0xa8] sm:$0xff] %v216_v2  ;;  %305 = vst [vmem:[%s542_s2 + $0xb0] sm:$0xff] %v226_v6 }
  0x16   :  { %308 = vst [vmem:[%s542_s2 + $0xb8] sm:$0xff] %v236_v7 }

// kernel: _lambda_.12
= control target key start
LH: loop header
LB: loop body
LE: loop exit
PB: predicated region body
PF: predicated region fallthrough
CT: control target
= control target key end

     0   :  { %s417_s12 = smov 0   ;;  %s440_s0 = inlined_call_operand.vmem [shape: f32[64,4], index: 0, kind: input, shape index: {}]   ;;  %s441_s1 = inlined_call_operand.vmem [shape: f32[4,16], index: 1, kind: input, shape index: {}]   ;;  %s442_s2 = inlined_call_operand.vmem [shape: f32[1,16], index: 2, kind: input, shape index: {}]   ;;  %s443_s3 = inlined_call_operand.vmem [shape: f32[64,16], index: 3, kind: output, shape index: {}]  }
   0x1 LB: > { %s349_s13 = sadd.s32 4294967295, %s395_s12   ;;  %p353_p0 = scmp.ge.s32.totalorder %s395_s12, 1  ;;  %s395_s12 = sphi %s417_s12, %s13_s12  }
   0x2   : > { %p138_p1 = scmp.lt.s32.totalorder %s395_s12, 3 }
   0x4   : > { %p139_p2 = pnand %p353_p0, %p138_p1 }
   0x5   : > { %s354_s16 = sshll.u32 (!%p139_p2), %s349_s13, 2 }
   0x6   : > { %142 = sbr.rel (%p139_p2) target bundleno = 214 (0xd6), region = 32  ;;  %p163_p3 = scmp.lt.s32.totalorder (!%p139_p2), %s354_s16, 7 }
   0xb   : > { %v178_v0 = vld [vmem:[%s441_s1] sm:$0xf]  ;;  %vm199_vm0 = vcmask 1043456   ;;  %s445_s16 = smov (!%p163_p3, %s354_s16), 7  ;;  %vm186_vm1 = vcmask 31744   ;;  %vm288_vm2 = vcmask 130048  }
   0xc   : > { %371 = vmatprep.subr.msk.mxu0 %vm199_vm0, %v178_v0  ;;  %379 = vmatprep.subr.msk.mxu1 %vm199_vm0, %v178_v0  ;;  %s355_s17 = sshll.u32 %s445_s16, 3  ;;  %v358_v7 = vld [vmem:[%s442_s2] ss:$0 sm:$0xff] }
   0xd   : > { %372 = vmatpush3.msk.msra.mxu0 %vm199_vm0, %v178_v0  ;;  %380 = vmatpush3.msk.msra.mxu1 %vm199_vm0, %v178_v0  ;;  %s166_s20 = scalar_lea.vmem %s440_s0, %s355_s17  ;;  %s172_s25 = scalar_lea.vmem %s443_s3, %s355_s17 }
   0xe   : > { %v174_v1 = vld [vmem:[%s166_s20] sm:$0xff]  ;;  %v176_v2 = vld [vmem:[%s166_s20 + $0x10] sm:$0xff]  ;;  %v175_v3 = vld [vmem:[%s166_s20 + $0x8] sm:$0xff] }
   0xf   : > { %373 = vmatprep.mubr.msk.f32.mxu0 %vm186_vm1, %v174_v1  ;;  %376 = vmatprep.mubr.msk.f32.mxu1 %vm186_vm1, %v176_v2  ;;  %v177_v4 = vld [vmem:[%s166_s20 + $0x18] sm:$0xff] }
  0x10   : > { %374 = vmatmul.mubr.msk.f32.vlgmr.msra.gmra.mxu0 %vm186_vm1, %v175_v3  ;;  %377 = vmatmul.mubr.msk.f32.vlgmr.msra.gmra.mxu1 %vm186_vm1, %v177_v4 }
  0xd0   : > { %v375_v5 = vpop.f32.mrf.mxu0  ;;  %v378_v6 = vpop.f32.mrf.mxu1 }
  0xd1   : > { %v275_v11 = vadd.f32 %v375_v5, %v358_v7  ;;  %v285_v13 = vadd.f32 %v378_v6, %v358_v7 }
  0xd2   : > { %v269_v8 = vpop.f32.mrf.mxu0  ;;  %v279_v9 = vpop.f32.mrf.mxu1 }
  0xd3   : > { %v270_v10 = vadd.f32 %v358_v7, %v269_v8  ;;  %v280_v12 = vadd.f32 %v358_v7, %v279_v9  ;;  %290 = vst.msk [vmem:[%s172_s25 + $0x8] sm:$0xff] %vm288_vm2, %v275_v11  ;;  %292 = vst.msk [vmem:[%s172_s25 + $0x18] sm:$0xff] %vm288_vm2, %v285_v13 }
  0xd5   : > { %289 = vst.msk [vmem:[%s172_s25] sm:$0xff] %vm288_vm2, %v270_v10  ;;  %291 = vst.msk [vmem:[%s172_s25 + $0x10] sm:$0xff] %vm288_vm2, %v280_v12 }
  0xd6 PF: > { %s13_s12 = sadd.s32 1, %s395_s12  }
  0xd7   : > { %p10_p4 = scmp.ge.s32.totalorder %s13_s12, 4  }
  0xd9   :  { %12 = sbr.rel (!%p10_p4) target bundleno = 1 (0x1), region = 62 }

// kernel: _lambda_.13
= control target key start
LH: loop header
LB: loop body
LE: loop exit
PB: predicated region body
PF: predicated region fallthrough
CT: control target
= control target key end

     0   :  { %s964_s18 = smov 0   ;;  %s1282_s0 = inlined_call_operand.vmem [shape: f32[192,35], index: 0, kind: input, shape index: {}]   ;;  %s1283_s1 = inlined_call_operand.vmem [shape: f32[35,16], index: 1, kind: input, shape index: {}]   ;;  %s1284_s2 = inlined_call_operand.vmem [shape: f32[1,16], index: 2, kind: input, shape index: {}]   ;;  %s1285_s3 = inlined_call_operand.vmem [shape: f32[1,16], index: 3, kind: input, shape index: {}]   ;;  %s1286_s4 = inlined_call_operand.vmem [shape: f32[1,16], index: 4, kind: input, shape index: {}]   ;;  %s1287_s5 = inlined_call_operand.vmem [shape: f32[192,16], index: 5, kind: output, shape index: {}]  }
   0x1 LB: > { %s790_s19 = sadd.s32 4294967295, %s932_s18   ;;  %p794_p0 = scmp.ge.s32.totalorder %s932_s18, 1  ;;  %s932_s18 = sphi %s964_s18, %s15_s18  }
   0x2   : > { %p188_p1 = scmp.lt.s32.totalorder %s932_s18, 3 }
   0x4   : > { %p189_p2 = pnand %p794_p0, %p188_p1 }
   0x5   : > { %s216_s24 = smul.u32 (!%p189_p2), 12, %s790_s19 }
   0x6   : > { %192 = sbr.rel (%p189_p2) target bundleno = 580 (0x244), region = 40 }
   0x7   : > { %p217_p3 = scmp.lt.s32.totalorder (!%p189_p2), %s216_s24, 23 }
   0xb   : > { %v244_v0 = vld [vmem:[%s1283_s1 + $0x20] sm:$0x7]  ;;  %vm289_vm0 = vcmask 1042432   ;;  %v243_v1 = vld [vmem:[%s1283_s1 + $0x18] sm:$0xff]  ;;  %v242_v2 = vld [vmem:[%s1283_s1 + $0x10] sm:$0xff]  ;;  %s1289_s24 = smov (!%p217_p3, %s216_s24), 23 }
   0xc   : > { %832 = vmatprep.subr.msk.mxu0 %vm289_vm0, %v244_v0  ;;  %860 = vmatprep.subr.msk.mxu1 %vm289_vm0, %v244_v0  ;;  %v241_v3 = vld [vmem:[%s1283_s1 + $0x8] sm:$0xff]  ;;  %v240_v4 = vld [vmem:[%s1283_s1] sm:$0xff]  ;;  %s795_s6 = sshll.u32 %s1289_s24, 3  ;;  %vm252_vm1 = vcmask 285696   ;;  %vm526_vm2 = vcmask 130048  }
   0xd   : > { %833 = vmatpush3.msk.msra.mxu0 %vm289_vm0, %v244_v0  ;;  %865 = vmatpush3.msk.msra.mxu1 %vm289_vm0, %v244_v0  ;;  %s220_s9 = scalar_lea.vmem %s1282_s0, %s795_s6  ;;  %v797_v17 = vld [vmem:[%s1284_s2] ss:$0 sm:$0xff]  ;;  %s1219_s19 = scalar_lea.vmem %s1287_s5, %s795_s6 }
   0xe   : > { %834 = vmatprep.subr.mxu0 %v243_v1  ;;  %861 = vmatprep.subr.mxu1 %v243_v1  ;;  %v228_v5 = vld [vmem:[%s220_s9] sm:$0xff]  ;;  %v234_v6 = vld [vmem:[%s220_s9 + $0x30] sm:$0xff]  ;;  %v229_v7 = vld [vmem:[%s220_s9 + $0x8] sm:$0xff] }
   0xf   : > { %835 = vmatpush3.msra.mxu0 %v243_v1  ;;  %866 = vmatpush3.msra.mxu1 %v243_v1  ;;  %v235_v8 = vld [vmem:[%s220_s9 + $0x38] sm:$0xff]  ;;  %v230_v9 = vld [vmem:[%s220_s9 + $0x10] sm:$0xff]  ;;  %v236_v10 = vld [vmem:[%s220_s9 + $0x40] sm:$0xff] }
  0x10   : > { %836 = vmatprep.subr.mxu0 %v242_v2  ;;  %862 = vmatprep.subr.mxu1 %v242_v2  ;;  %v231_v11 = vld [vmem:[%s220_s9 + $0x18] sm:$0xff]  ;;  %v237_v12 = vld [vmem:[%s220_s9 + $0x48] sm:$0xff]  ;;  %v232_v13 = vld [vmem:[%s220_s9 + $0x20] sm:$0xff] }
  0x11   : > { %837 = vmatpush3.msra.mxu0 %v242_v2  ;;  %867 = vmatpush3.msra.mxu1 %v242_v2  ;;  %v238_v14 = vld [vmem:[%s220_s9 + $0x50] sm:$0xff]  ;;  %v233_v15 = vld [vmem:[%s220_s9 + $0x28] sm:$0xff]  ;;  %v239_v16 = vld [vmem:[%s220_s9 + $0x58] sm:$0xff] }
  0x12   : > { %838 = vmatprep.subr.mxu0 %v241_v3  ;;  %863 = vmatprep.subr.mxu1 %v241_v3 }
  0x13   : > { %839 = vmatpush3.msra.mxu0 %v241_v3  ;;  %868 = vmatpush3.msra.mxu1 %v241_v3 }
  0x14   : > { %840 = vmatprep.subr.mxu0 %v240_v4  ;;  %864 = vmatprep.subr.mxu1 %v240_v4 }
  0x15   : > { %841 = vmatpush3.msra.mxu0 %v240_v4  ;;  %869 = vmatpush3.msra.mxu1 %v240_v4 }
  0x16   : > { %842 = vmatprep.mubr.msk.f32.mxu0 %vm252_vm1, %v228_v5  ;;  %851 = vmatprep.mubr.msk.f32.mxu1 %vm252_vm1, %v234_v6 }
  0x17   : > { %843 = vmatmul.mubr.msk.f32.vlgmr.msra.gmra.mxu0 %vm252_vm1, %v229_v7  ;;  %852 = vmatmul.mubr.msk.f32.vlgmr.msra.gmra.mxu1 %vm252_vm1, %v235_v8 }
  0x18   : > { %845 = vmatprep.mubr.msk.f32.mxu0 %vm252_vm1, %v230_v9  ;;  %854 = vmatprep.mubr.msk.f32.mxu1 %vm252_vm1, %v236_v10 }
  0x1b   : > { %846 = vmatmul.mubr.msk.f32.gmra.mxu0 %vm252_vm1, %v231_v11  ;;  %855 = vmatmul.mubr.msk.f32.gmra.mxu1 %vm252_vm1, %v237_v12 }
  0x1c   : > { %848 = vmatprep.mubr.msk.f32.mxu0 %vm252_vm1, %v232_v13  ;;  %857 = vmatprep.mubr.msk.f32.mxu1 %vm252_vm1, %v238_v14 }
  0x1f   : > { %849 = vmatmul.mubr.msk.f32.gmra.mxu0 %vm252_vm1, %v233_v15  ;;  %858 = vmatmul.mubr.msk.f32.gmra.mxu1 %vm252_vm1, %v239_v16 }
  0xd7   : > { %v844_v18 = vpop.f32.mrf.mxu0  ;;  %v853_v19 = vpop.f32.mrf.mxu1 }
  0xd8   : > { %v1010_v20 = vadd.f32 %v844_v18, %v797_v17  ;;  %v1012_v21 = vadd.f32 %v853_v19, %v797_v17 }
  0xd9   : > { %v359_v22 = vpop.f32.mrf.mxu0  ;;  %v389_v23 = vpop.f32.mrf.mxu1 }
  0xda   : > { %v431_v24 = vmul.f32 0.044715, %v1010_v20  ;;  %v437_v25 = vmul.f32 0.044715, %v1012_v21  ;;  %v1016_v26 = vadd.f32 %v797_v17, %v359_v22  ;;  %v1019_v30 = vadd.f32 %v797_v17, %v389_v23 }
  0xdb   : > { %v847_v27 = vpop.f32.mrf.mxu0  ;;  %v856_v28 = vpop.f32.mrf.mxu1 }
  0xdc   : > { %v430_v29 = vmul.f32 0.044715, %v1016_v26  ;;  %v1021_v31 = vadd.f32 %v847_v27, %v797_v17  ;;  %v1023_v32 = vadd.f32 %v856_v28, %v797_v17  ;;  %v449_v35 = vmul.f32 %v437_v25, %v1012_v21 }
  0xdd   : > { %v369_v33 = vpop.f32.mrf.mxu0  ;;  %v399_v34 = vpop.f32.mrf.mxu1  ;;  %v443_v36 = vmul.f32 %v431_v24, %v1010_v20  ;;  %v436_v44 = vmul.f32 0.044715, %v1019_v30 }
  0xde   : > { %v433_v37 = vmul.f32 0.044715, %v1021_v31  ;;  %v1028_v38 = vadd.f32 %v797_v17, %v369_v33  ;;  %v461_v41 = vmul.f32 %v449_v35, %v1012_v21  ;;  %v442_v43 = vmul.f32 %v430_v29, %v1016_v26 }
  0xdf   : > { %v850_v39 = vpop.f32.mrf.mxu0  ;;  %v859_v40 = vpop.f32.mrf.mxu1  ;;  %v455_v42 = vmul.f32 %v443_v36, %v1010_v20  ;;  %v439_v45 = vmul.f32 0.044715, %v1023_v32  ;;  %v1035_v46 = vadd.f32 %v797_v17, %v399_v34  ;;  %v448_v3 = vmul.f32 %v436_v44, %v1019_v30 }
  0xe0   : > { %v1037_v47 = vadd.f32 %v850_v39, %v797_v17  ;;  %v473_v50 = vadd.f32 %v461_v41, %v1012_v21  ;;  %v445_v52 = vmul.f32 %v433_v37, %v1021_v31  ;;  %v454_v53 = vmul.f32 %v442_v43, %v1016_v26 }
  0xe1   : > { %v379_v48 = vpop.f32.mrf.mxu0  ;;  %v409_v49 = vpop.f32.mrf.mxu1  ;;  %v467_v51 = vadd.f32 %v455_v42, %v1010_v20  ;;  %v432_v54 = vmul.f32 0.044715, %v1028_v38  ;;  %v1044_v55 = vadd.f32 %v859_v40, %v797_v17  ;;  %v438_v61 = vmul.f32 0.044715, %v1035_v46 }
  0xe2   : > { %v1046_v56 = vadd.f32 %v797_v17, %v379_v48  ;;  %v485_v57 = vmul.f32 0.7978846, %v473_v50  ;;  %v457_v59 = vmul.f32 %v445_v52, %v1021_v31  ;;  %v466_v60 = vadd.f32 %v454_v53, %v1016_v26 }
  0xe3   : > { %v479_v58 = vmul.f32 0.7978846, %v467_v51  ;;  %v435_v62 = vmul.f32 0.044715, %v1037_v47  ;;  %v1052_v63 = vadd.f32 %v797_v17, %v409_v49  ;;  %v451_v0 = vmul.f32 %v439_v45, %v1023_v32 }
  0xe4   : > { %878 = vtanh.f32 %v485_v57  ;;  %v469_v1 = vadd.f32 %v457_v59, %v1021_v31  ;;  %v478_v2 = vmul.f32 0.7978846, %v466_v60  ;;  %v434_v4 = vmul.f32 0.044715, %v1046_v56 }
  0xe5   : > { %880 = vtanh.f32 %v479_v58  ;;  %v463_v5 = vmul.f32 %v451_v0, %v1023_v32  ;;  %v444_v6 = vmul.f32 %v432_v54, %v1028_v38  ;;  %v441_v7 = vmul.f32 0.044715, %v1044_v55 }
  0xe6   : > { %v481_v8 = vmul.f32 0.7978846, %v469_v1  ;;  %882 = vtanh.f32 %v478_v2  ;;  %v460_v9 = vmul.f32 %v448_v3, %v1019_v30  ;;  %v450_v12 = vmul.f32 %v438_v61, %v1035_v46 }
  0xe7   : > { %v475_v10 = vadd.f32 %v463_v5, %v1023_v32  ;;  %v456_v11 = vmul.f32 %v444_v6, %v1028_v38  ;;  %v440_v13 = vmul.f32 0.044715, %v1052_v63  ;;  %v447_v15 = vmul.f32 %v435_v62, %v1037_v47 }
  0xe8   : > { %884 = vtanh.f32 %v481_v8  ;;  %v472_v14 = vadd.f32 %v460_v9, %v1019_v30  ;;  %v462_v18 = vmul.f32 %v450_v12, %v1035_v46  ;;  %v446_v19 = vmul.f32 %v434_v4, %v1046_v56 }
  0xe9   : > { %v487_v16 = vmul.f32 0.7978846, %v475_v10  ;;  %v468_v17 = vadd.f32 %v456_v11, %v1028_v38  ;;  %v459_v23 = vmul.f32 %v447_v15, %v1037_v47  ;;  %v453_v24 = vmul.f32 %v441_v7, %v1044_v55 }
  0xea   : > { %v484_v22 = vmul.f32 0.7978846, %v472_v14  ;;  %v474_v27 = vadd.f32 %v462_v18, %v1035_v46  ;;  %v458_v28 = vmul.f32 %v446_v19, %v1046_v56  ;;  %v452_v36 = vmul.f32 %v440_v13, %v1052_v63 }
  0xeb   : > { %886 = vtanh.f32 %v487_v16  ;;  %v480_v25 = vmul.f32 0.7978846, %v468_v17  ;;  %v471_v29 = vadd.f32 %v459_v23, %v1037_v47  ;;  %v465_v33 = vmul.f32 %v453_v24, %v1044_v55 }
  0xec   : > { %888 = vtanh.f32 %v484_v22  ;;  %v486_v34 = vmul.f32 0.7978846, %v474_v27  ;;  %v470_v35 = vadd.f32 %v458_v28, %v1046_v56  ;;  %v464_v41 = vmul.f32 %v452_v36, %v1052_v63 }
  0xed   : > { %890 = vtanh.f32 %v480_v25  ;;  %v483_v37 = vmul.f32 0.7978846, %v471_v29  ;;  %v477_v39 = vadd.f32 %v465_v33, %v1044_v55  ;;  %v425_v48 = vmul.f32 0.5, %v1012_v21 }
  0xee   : > { %892 = vtanh.f32 %v486_v34  ;;  %v482_v40 = vmul.f32 0.7978846, %v470_v35  ;;  %v476_v44 = vadd.f32 %v464_v41, %v1052_v63  ;;  %v419_v51 = vmul.f32 0.5, %v1010_v20 }
  0xef   : > { %894 = vtanh.f32 %v483_v37  ;;  %v489_v42 = vmul.f32 0.7978846, %v477_v39  ;;  %v418_v60 = vmul.f32 0.5, %v1016_v26  ;;  %v421_v61 = vmul.f32 0.5, %v1021_v31 }
  0xf0   : > { %896 = vtanh.f32 %v482_v40  ;;  %v488_v53 = vmul.f32 0.7978846, %v476_v44  ;;  %v427_v26 = vmul.f32 0.5, %v1023_v32  ;;  %v424_v31 = vmul.f32 0.5, %v1019_v30 }
  0xf1   : > { %v879_v43 = vpop.eup %878  ;;  %898 = vtanh.f32 %v489_v42  ;;  %v420_v32 = vmul.f32 0.5, %v1028_v38  ;;  %v426_v14 = vmul.f32 0.5, %v1035_v46  ;;  %v423_v38 = vmul.f32 0.5, %v1037_v47 }
  0xf2   : > { %v881_v45 = vpop.eup %880  ;;  %v509_v49 = vadd.f32 1.0, %v879_v43  ;;  %900 = vtanh.f32 %v488_v53  ;;  %v422_v25 = vmul.f32 0.5, %v1046_v56  ;;  %v429_v36 = vmul.f32 0.5, %v1044_v55 }
  0xf3   : > { %v883_v50 = vpop.eup %882  ;;  %v503_v52 = vadd.f32 1.0, %v881_v45  ;;  %v428_v37 = vmul.f32 0.5, %v1052_v63 }
  0xf4   : > { %v1084_v54 = vmul.f32 %v509_v49, %v425_v48  ;;  %v502_v57 = vadd.f32 1.0, %v883_v50 }
  0xf5   : > { %v885_v58 = vpop.eup %884  ;;  %v1086_v59 = vmul.f32 %v503_v52, %v419_v51 }
  0xf6   : > { %v548_v21 = vsel %vm526_vm2, %v1084_v54, 0.0  ;;  %v505_v62 = vadd.f32 1.0, %v885_v58  ;;  %v1094_v0 = vmul.f32 %v502_v57, %v418_v60 }
  0xf7   : > { %549 = vadd.xlane.f32.xlu1 %v548_v21  ;;  %v530_v20 = vsel %vm526_vm2, %v1086_v59, 0.0 }
  0xf8   : > { %v887_v1 = vpop.eup %886  ;;  %531 = vadd.xlane.f32.xlu0 %v530_v20  ;;  %v1096_v2 = vmul.f32 %v505_v62, %v421_v61  ;;  %v527_v8 = vsel %vm526_vm2, %v1094_v0, 0.0 }
  0xf9   : > { %v889_v3 = vpop.eup %888  ;;  %v511_v4 = vadd.f32 1.0, %v887_v1 }
  0xfa   : > { %v891_v5 = vpop.eup %890  ;;  %v536_v6 = vsel %vm526_vm2, %v1096_v2, 0.0  ;;  %v508_v7 = vadd.f32 1.0, %v889_v3 }
  0xfb   : > { %537 = vadd.xlane.f32.xlu1 %v536_v6  ;;  %v1104_v9 = vmul.f32 %v511_v4, %v427_v26  ;;  %v504_v10 = vadd.f32 1.0, %v891_v5  ;;  %v893_v11 = vpop.eup %892 }
  0xfc   : > { %528 = vadd.xlane.f32.xlu0 %v527_v8  ;;  %v520_v12 = vmul.f32 %v508_v7, %v424_v31  ;;  %v895_v13 = vpop.eup %894  ;;  %v510_v15 = vadd.f32 1.0, %v893_v11 }
  0xfd   : > { %v897_v16 = vpop.eup %896  ;;  %v554_v30 = vsel %vm526_vm2, %v1104_v9, 0.0  ;;  %v1110_v17 = vmul.f32 %v504_v10, %v420_v32  ;;  %v507_v18 = vadd.f32 1.0, %v895_v13 }
  0xfe   : > { %v899_v19 = vpop.eup %898  ;;  %v545_v22 = vsel %vm526_vm2, %v520_v12, 0.0  ;;  %v522_v23 = vmul.f32 %v510_v15, %v426_v14  ;;  %v506_v24 = vadd.f32 1.0, %v897_v16 }
  0xff   : > { %555 = vadd.xlane.f32.xlu1 %v554_v30  ;;  %v901_v46 = vpop.eup %900  ;;  %v533_v27 = vsel %vm526_vm2, %v1110_v17, 0.0  ;;  %v1117_v28 = vmul.f32 %v507_v18, %v423_v38  ;;  %v513_v29 = vadd.f32 1.0, %v899_v19 }
 0x100   : > { %546 = vadd.xlane.f32.xlu0 %v545_v22  ;;  %v551_v33 = vsel %vm526_vm2, %v522_v23, 0.0  ;;  %v518_v34 = vmul.f32 %v506_v24, %v422_v25  ;;  %v512_v35 = vadd.f32 1.0, %v901_v46 }
 0x101   : > { %v542_v47 = vsel %vm526_vm2, %v1117_v28, 0.0  ;;  %v1124_v56 = vmul.f32 %v513_v29, %v429_v36 }
 0x102   : > { %v539_v39 = vsel %vm526_vm2, %v518_v34, 0.0  ;;  %v1127_v40 = vmul.f32 %v512_v35, %v428_v37 }
 0x103   : > { %534 = vadd.xlane.f32.xlu1 %v533_v27  ;;  %v560_v41 = vsel %vm526_vm2, %v1124_v56, 0.0 }
 0x104   : > { %552 = vadd.xlane.f32.xlu0 %v551_v33  ;;  %v557_v55 = vsel %vm526_vm2, %v1127_v40, 0.0 }
 0x107   : > { %543 = vadd.xlane.f32.xlu1 %v542_v47 }
 0x108   : > { %540 = vadd.xlane.f32.xlu0 %v539_v39 }
 0x10b   : > { %561 = vadd.xlane.f32.xlu1 %v560_v41 }
 0x10c   : > { %558 = vadd.xlane.f32.xlu0 %v557_v55 }
 0x180   : > { %v550_v63 = vpop.xlane.xlu1 %549 }
 0x181   : > { %v571_v42 = vmul.f32 0.0625, %v550_v63  ;;  %v532_v43 = vpop.xlane.xlu0 %531 }
 0x182   : > { %v565_v44 = vmul.f32 0.0625, %v532_v43 }
 0x183   : > { %v1134_v45 = vsub.f32 %v1084_v54, %v571_v42 }
 0x184   : > { %v1137_v48 = vsub.f32 %v1086_v59, %v565_v44  ;;  %v538_v49 = vpop.xlane.xlu1 %537 }
 0x185   : > { %v567_v50 = vmul.f32 0.0625, %v538_v49  ;;  %v529_v51 = vpop.xlane.xlu0 %528  ;;  %v595_v57 = vmul.f32 %v1134_v45, %v1134_v45 }
 0x186   : > { %v564_v52 = vmul.f32 0.0625, %v529_v51  ;;  %v589_v53 = vmul.f32 %v1137_v48, %v1137_v48 }
 0x187   : > { %v1144_v58 = vsub.f32 %v1096_v2, %v567_v50  ;;  %v621_v1 = vsel %vm526_vm2, %v595_v57, 0.0 }
 0x188   : > { %v1147_v60 = vsub.f32 %v1094_v0, %v564_v52  ;;  %v556_v54 = vpop.xlane.xlu1 %555  ;;  %v603_v59 = vsel %vm526_vm2, %v589_v53, 0.0 }
 0x189   : > { %v573_v21 = vmul.f32 0.0625, %v556_v54  ;;  %604 = vadd.xlane.f32.xlu1 %v603_v59  ;;  %v547_v61 = vpop.xlane.xlu0 %546  ;;  %v591_v4 = vmul.f32 %v1144_v58, %v1144_v58 }
 0x18a   : > { %v570_v62 = vmul.f32 0.0625, %v547_v61  ;;  %v588_v20 = vmul.f32 %v1147_v60, %v1147_v60 }
 0x18b   : > { %v1154_v3 = vsub.f32 %v1104_v9, %v573_v21  ;;  %v609_v10 = vsel %vm526_vm2, %v591_v4, 0.0 }
 0x18c   : > { %v1156_v2 = vsub.f32 %v520_v12, %v570_v62  ;;  %v535_v26 = vpop.xlane.xlu1 %534  ;;  %v600_v0 = vsel %vm526_vm2, %v588_v20, 0.0 }
 0x18d   : > { %622 = vadd.xlane.f32.xlu1 %v621_v1  ;;  %v566_v5 = vmul.f32 0.0625, %v535_v26  ;;  %601 = vadd.xlane.f32.xlu0 %v600_v0  ;;  %v553_v6 = vpop.xlane.xlu0 %552  ;;  %v597_v32 = vmul.f32 %v1154_v3, %v1154_v3 }
 0x18e   : > { %v572_v31 = vmul.f32 0.0625, %v553_v6  ;;  %v594_v7 = vmul.f32 %v1156_v2, %v1156_v2 }
 0x18f   : > { %v1164_v8 = vsub.f32 %v1110_v17, %v566_v5  ;;  %v627_v19 = vsel %vm526_vm2, %v597_v32, 0.0 }
 0x190   : > { %v1166_v9 = vsub.f32 %v522_v23, %v572_v31  ;;  %v544_v11 = vpop.xlane.xlu1 %543  ;;  %v618_v12 = vsel %vm526_vm2, %v594_v7, 0.0  ;;  %v1205_v31 = vld [vmem:[%s1285_s3] ss:$0 sm:$0xff] }
 0x191   : > { %610 = vadd.xlane.f32.xlu1 %v609_v10  ;;  %v569_v13 = vmul.f32 0.0625, %v544_v11  ;;  %619 = vadd.xlane.f32.xlu0 %v618_v12  ;;  %v541_v14 = vpop.xlane.xlu0 %540  ;;  %v590_v15 = vmul.f32 %v1164_v8, %v1164_v8  ;;  %v1211_v12 = vld [vmem:[%s1286_s4] ss:$0 sm:$0xff] }
 0x192   : > { %v568_v16 = vmul.f32 0.0625, %v541_v14  ;;  %v596_v23 = vmul.f32 %v1166_v9, %v1166_v9 }
 0x193   : > { %v1175_v30 = vsub.f32 %v1117_v28, %v569_v13  ;;  %v606_v17 = vsel %vm526_vm2, %v590_v15, 0.0 }
 0x194   : > { %v1178_v18 = vsub.f32 %v518_v34, %v568_v16  ;;  %v562_v22 = vpop.xlane.xlu1 %561  ;;  %v624_v33 = vsel %vm526_vm2, %v596_v23, 0.0 }
 0x195   : > { %628 = vadd.xlane.f32.xlu1 %v627_v19  ;;  %v575_v24 = vmul.f32 0.0625, %v562_v22  ;;  %607 = vadd.xlane.f32.xlu0 %v606_v17  ;;  %v559_v38 = vpop.xlane.xlu0 %558  ;;  %v593_v25 = vmul.f32 %v1175_v30, %v1175_v30 }
 0x196   : > { %v574_v46 = vmul.f32 0.0625, %v559_v38  ;;  %v592_v34 = vmul.f32 %v1178_v18, %v1178_v18 }
 0x197   : > { %v1186_v27 = vsub.f32 %v1124_v56, %v575_v24  ;;  %v615_v28 = vsel %vm526_vm2, %v593_v25, 0.0 }
 0x198   : > { %v1190_v29 = vsub.f32 %v1127_v40, %v574_v46  ;;  %v612_v37 = vsel %vm526_vm2, %v592_v34, 0.0 }
 0x199   : > { %616 = vadd.xlane.f32.xlu1 %v615_v28  ;;  %625 = vadd.xlane.f32.xlu0 %v624_v33  ;;  %v599_v35 = vmul.f32 %v1186_v27, %v1186_v27 }
 0x19a   : > { %v598_v47 = vmul.f32 %v1190_v29, %v1190_v29 }
 0x19b   : > { %v633_v36 = vsel %vm526_vm2, %v599_v35, 0.0 }
 0x19c   : > { %v630_v56 = vsel %vm526_vm2, %v598_v47, 0.0 }
 0x19d   : > { %634 = vadd.xlane.f32.xlu1 %v633_v36  ;;  %613 = vadd.xlane.f32.xlu0 %v612_v37 }
 0x1a1   : > { %631 = vadd.xlane.f32.xlu0 %v630_v56 }
 0x212   : > { %v605_v39 = vpop.xlane.xlu1 %604 }
 0x213   : > { %v637_v40 = vmul.f32 0.0625, %v605_v39 }
 0x215   : > { %v649_v41 = vadd.f32 1e-05, %v637_v40 }
 0x216   : > { %v623_v55 = vpop.xlane.xlu1 %622  ;;  %v602_v63 = vpop.xlane.xlu0 %601 }
 0x217   : > { %902 = vrsqrt.f32 %v649_v41  ;;  %v643_v42 = vmul.f32 0.0625, %v623_v55  ;;  %v636_v43 = vmul.f32 0.0625, %v602_v63 }
 0x219   : > { %v655_v44 = vadd.f32 1e-05, %v643_v42  ;;  %v648_v49 = vadd.f32 1e-05, %v636_v43 }
 0x21a   : > { %v611_v50 = vpop.xlane.xlu1 %610  ;;  %v620_v51 = vpop.xlane.xlu0 %619 }
 0x21b   : > { %904 = vrsqrt.f32 %v655_v44  ;;  %v639_v52 = vmul.f32 0.0625, %v611_v50  ;;  %v642_v53 = vmul.f32 0.0625, %v620_v51 }
 0x21c   : > { %906 = vrsqrt.f32 %v648_v49 }
 0x21d   : > { %v651_v57 = vadd.f32 1e-05, %v639_v52  ;;  %v654_v54 = vadd.f32 1e-05, %v642_v53 }
 0x21e   : > { %v629_v59 = vpop.xlane.xlu1 %628  ;;  %v608_v21 = vpop.xlane.xlu0 %607 }
 0x21f   : > { %908 = vrsqrt.f32 %v651_v57  ;;  %v645_v61 = vmul.f32 0.0625, %v629_v59  ;;  %v638_v62 = vmul.f32 0.0625, %v608_v21 }
 0x220   : > { %910 = vrsqrt.f32 %v654_v54 }
 0x221   : > { %v657_v20 = vadd.f32 1e-05, %v645_v61  ;;  %v650_v1 = vadd.f32 1e-05, %v638_v62 }
 0x222   : > { %v617_v26 = vpop.xlane.xlu1 %616  ;;  %v626_v0 = vpop.xlane.xlu0 %625 }
 0x223   : > { %912 = vrsqrt.f32 %v657_v20  ;;  %v641_v4 = vmul.f32 0.0625, %v617_v26  ;;  %v644_v5 = vmul.f32 0.0625, %v626_v0 }
 0x224   : > { %v903_v6 = vpop.eup %902  ;;  %914 = vrsqrt.f32 %v650_v1 }
 0x225   : > { %v673_v7 = vmul.f32 %v903_v6, %v1137_v48  ;;  %v653_v10 = vadd.f32 1e-05, %v641_v4  ;;  %v656_v11 = vadd.f32 1e-05, %v644_v5 }
 0x226   : > { %v635_v32 = vpop.xlane.xlu1 %634  ;;  %v614_v13 = vpop.xlane.xlu0 %613 }
 0x227   : > { %v692_v14 = vmul.f32 %v1205_v31, %v673_v7  ;;  %916 = vrsqrt.f32 %v653_v10  ;;  %v647_v15 = vmul.f32 0.0625, %v635_v32  ;;  %v640_v16 = vmul.f32 0.0625, %v614_v13 }
 0x228   : > { %v905_v17 = vpop.eup %904  ;;  %918 = vrsqrt.f32 %v656_v11 }
 0x229   : > { %v907_v48 = vpop.eup %906  ;;  %v711_v19 = vadd.f32 %v1211_v12, %v692_v14  ;;  %v679_v22 = vmul.f32 %v905_v17, %v1134_v45  ;;  %v659_v23 = vadd.f32 1e-05, %v647_v15  ;;  %v652_v24 = vadd.f32 1e-05, %v640_v16 }
 0x22a   : > { %v672_v38 = vmul.f32 %v907_v48, %v1147_v60  ;;  %v632_v25 = vpop.xlane.xlu0 %631 }
 0x22b   : > { %723 = vst.msk [vmem:[%s1219_s19 + $0x8] sm:$0xff] %vm526_vm2, %v711_v19  ;;  %v698_v46 = vmul.f32 %v1205_v31, %v679_v22  ;;  %920 = vrsqrt.f32 %v659_v23  ;;  %v646_v28 = vmul.f32 0.0625, %v632_v25 }
 0x22c   : > { %v909_v33 = vpop.eup %908  ;;  %v691_v34 = vmul.f32 %v1205_v31, %v672_v38  ;;  %922 = vrsqrt.f32 %v652_v24 }
 0x22d   : > { %v911_v35 = vpop.eup %910  ;;  %v717_v45 = vadd.f32 %v1211_v12, %v698_v46  ;;  %v675_v36 = vmul.f32 %v909_v33, %v1144_v58  ;;  %v658_v37 = vadd.f32 1e-05, %v646_v28 }
 0x22e   : > { %v710_v60 = vadd.f32 %v1211_v12, %v691_v34  ;;  %v678_v47 = vmul.f32 %v911_v35, %v1156_v2 }
 0x22f   : > { %729 = vst.msk [vmem:[%s1219_s19 + $0x38] sm:$0xff] %vm526_vm2, %v717_v45  ;;  %v694_v56 = vmul.f32 %v1205_v31, %v675_v36  ;;  %924 = vrsqrt.f32 %v658_v37 }
 0x230   : > { %v913_v39 = vpop.eup %912  ;;  %722 = vst.msk [vmem:[%s1219_s19] sm:$0xff] %vm526_vm2, %v710_v60  ;;  %v697_v40 = vmul.f32 %v1205_v31, %v678_v47 }
 0x231   : > { %v915_v41 = vpop.eup %914  ;;  %v713_v58 = vadd.f32 %v1211_v12, %v694_v56  ;;  %v681_v55 = vmul.f32 %v913_v39, %v1154_v3 }
 0x232   : > { %v716_v63 = vadd.f32 %v1211_v12, %v697_v40  ;;  %v674_v2 = vmul.f32 %v915_v41, %v1164_v8 }
 0x233   : > { %725 = vst.msk [vmem:[%s1219_s19 + $0x18] sm:$0xff] %vm526_vm2, %v713_v58  ;;  %v700_v42 = vmul.f32 %v1205_v31, %v681_v55 }
 0x234   : > { %v917_v43 = vpop.eup %916  ;;  %728 = vst.msk [vmem:[%s1219_s19 + $0x30] sm:$0xff] %vm526_vm2, %v716_v63  ;;  %v693_v44 = vmul.f32 %v1205_v31, %v674_v2 }
 0x235   : > { %v919_v49 = vpop.eup %918  ;;  %v719_v50 = vadd.f32 %v1211_v12, %v700_v42  ;;  %v677_v3 = vmul.f32 %v917_v43, %v1175_v30 }
 0x236   : > { %v712_v51 = vadd.f32 %v1211_v12, %v693_v44  ;;  %v680_v8 = vmul.f32 %v919_v49, %v1166_v9 }
 0x237   : > { %731 = vst.msk [vmem:[%s1219_s19 + $0x48] sm:$0xff] %vm526_vm2, %v719_v50  ;;  %v696_v52 = vmul.f32 %v1205_v31, %v677_v3 }
 0x238   : > { %v921_v53 = vpop.eup %920  ;;  %724 = vst.msk [vmem:[%s1219_s19 + $0x10] sm:$0xff] %vm526_vm2, %v712_v51  ;;  %v699_v57 = vmul.f32 %v1205_v31, %v680_v8 }
 0x239   : > { %v923_v54 = vpop.eup %922  ;;  %v715_v59 = vadd.f32 %v1211_v12, %v696_v52  ;;  %v683_v30 = vmul.f32 %v921_v53, %v1186_v27 }
 0x23a   : > { %v718_v21 = vadd.f32 %v1211_v12, %v699_v57  ;;  %v676_v9 = vmul.f32 %v923_v54, %v1178_v18 }
 0x23b   : > { %727 = vst.msk [vmem:[%s1219_s19 + $0x28] sm:$0xff] %vm526_vm2, %v715_v59  ;;  %v702_v61 = vmul.f32 %v1205_v31, %v683_v30 }
 0x23c   : > { %v925_v62 = vpop.eup %924  ;;  %730 = vst.msk [vmem:[%s1219_s19 + $0x40] sm:$0xff] %vm526_vm2, %v718_v21  ;;  %v695_v20 = vmul.f32 %v1205_v31, %v676_v9 }
 0x23d   : > { %v721_v1 = vadd.f32 %v1211_v12, %v702_v61  ;;  %v682_v26 = vmul.f32 %v925_v62, %v1190_v29 }
 0x23e   : > { %v714_v0 = vadd.f32 %v1211_v12, %v695_v20 }
 0x23f   : > { %733 = vst.msk [vmem:[%s1219_s19 + $0x58] sm:$0xff] %vm526_vm2, %v721_v1  ;;  %v701_v27 = vmul.f32 %v1205_v31, %v682_v26 }
 0x240   : > { %726 = vst.msk [vmem:[%s1219_s19 + $0x20] sm:$0xff] %vm526_vm2, %v714_v0 }
 0x241   : > { %v720_v18 = vadd.f32 %v1211_v12, %v701_v27 }
 0x243   : > { %732 = vst.msk [vmem:[%s1219_s19 + $0x50] sm:$0xff] %vm526_vm2, %v720_v18 }
 0x244 PF: > { %s15_s18 = sadd.s32 1, %s932_s18  }
 0x245   : > { %p12_p4 = scmp.ge.s32.totalorder %s15_s18, 4  }
 0x247   :  { %14 = sbr.rel (!%p12_p4) target bundleno = 1 (0x1), region = 70 }

// kernel: sub.0
= control target key start
LH: loop header
LB: loop body
LE: loop exit
PB: predicated region body
PF: predicated region fallthrough
CT: control target
= control target key end

     0   :  { %s100_s0 = inlined_call_operand.vmem [shape: f32[32,6], index: 0, kind: input, shape index: {}]   ;;  %s101_s1 = inlined_call_operand.vmem [shape: f32[32,6], index: 1, kind: input, shape index: {}]   ;;  %s102_s2 = inlined_call_operand.vmem [shape: f32[32,6], index: 2, kind: output, shape index: {}]  }
   0x1   :  { %v3_v0 = vld [vmem:[%s100_s0] sm:$0xff]  ;;  %v40_v2 = vld [vmem:[%s100_s0 + $0x8] sm:$0xff]  ;;  %v43_v5 = vld [vmem:[%s100_s0 + $0x10] sm:$0xff] }
   0x2   :  { %v4_v1 = vld [vmem:[%s101_s1] sm:$0xff]  ;;  %v41_v4 = vld [vmem:[%s101_s1 + $0x8] sm:$0xff]  ;;  %v44_v6 = vld [vmem:[%s101_s1 + $0x10] sm:$0xff] }
   0x3   :  { %v7_v3 = vsub.f32 %v3_v0, %v4_v1  ;;  %v16_v7 = vsub.f32 %v40_v2, %v41_v4  ;;  %v26_v8 = vsub.f32 %v43_v5, %v44_v6  ;;  %v46_v9 = vld [vmem:[%s100_s0 + $0x18] sm:$0xff] }
   0x4   :  { %v47_v10 = vld [vmem:[%s101_s1 + $0x18] sm:$0xff] }
   0x5   :  { %9 = vst [vmem:[%s102_s2] sm:$0xff] %v7_v3  ;;  %v36_v11 = vsub.f32 %v46_v9, %v47_v10  ;;  %42 = vst [vmem:[%s102_s2 + $0x8] sm:$0xff] %v16_v7 }
   0x6   :  { %45 = vst [vmem:[%s102_s2 + $0x10] sm:$0xff] %v26_v8 }
   0x7   :  { %48 = vst [vmem:[%s102_s2 + $0x18] sm:$0xff] %v36_v11 }

// kernel: _lambda_.14
= control target key start
LH: loop header
LB: loop body
LE: loop exit
PB: predicated region body
PF: predicated region fallthrough
CT: control target
= control target key end

     0   :  { %s655_s21 = smov 0   ;;  %s713_s0 = inlined_call_operand.vmem [shape: f32[64,32], index: 0, kind: input, shape index: {}]   ;;  %s714_s1 = inlined_call_operand.vmem [shape: f32[64,16], index: 1, kind: input, shape index: {}]   ;;  %s715_s2 = inlined_call_operand.vmem [shape: f32[32,16], index: 2, kind: input, shape index: {}]   ;;  %s716_s3 = inlined_call_operand.vmem [shape: f32[1,16], index: 3, kind: input, shape index: {}]   ;;  %s717_s4 = inlined_call_operand.vmem [shape: f32[1,16], index: 4, kind: input, shape index: {}]   ;;  %s718_s5 = inlined_call_operand.vmem [shape: f32[1,16], index: 5, kind: input, shape index: {}]   ;;  %s719_s6 = inlined_call_operand.vmem [shape: f32[64,16], index: 6, kind: output, shape index: {}]  }
   0x1 LB: > { %s546_s22 = sadd.s32 4294967295, %s618_s21   ;;  %p550_p0 = scmp.ge.s32.totalorder %s618_s21, 1  ;;  %s618_s21 = sphi %s655_s21, %s16_s21  }
   0x2   : > { %p224_p1 = scmp.lt.s32.totalorder %s618_s21, 3 }
   0x4   : > { %p225_p2 = pnand %p550_p0, %p224_p1 }
   0x5   : > { %s551_s27 = sshll.u32 (!%p225_p2), %s546_s22, 2 }
   0x6   : > { %228 = sbr.rel (%p225_p2) target bundleno = 537 (0x219), region = 44  ;;  %p260_p3 = scmp.lt.s32.totalorder (!%p225_p2), %s551_s27, 7 }
   0xb   : > { %v284_v0 = vld [vmem:[%s715_s2 + $0x18] sm:$0xff]  ;;  %v283_v1 = vld [vmem:[%s715_s2 + $0x10] sm:$0xff]  ;;  %v282_v2 = vld [vmem:[%s715_s2 + $0x8] sm:$0xff]  ;;  %s721_s27 = smov (!%p260_p3, %s551_s27), 7  ;;  %vm292_vm0 = vcmask 261120   ;;  %vm390_vm1 = vcmask 130048  }
   0xc   : > { %574 = vmatprep.subr.mxu0 %v284_v0  ;;  %588 = vmatprep.subr.mxu1 %v284_v0  ;;  %v281_v3 = vld [vmem:[%s715_s2] sm:$0xff]  ;;  %s675_s8 = sshll.u32 %s721_s27, 3 }
   0xd   : > { %575 = vmatpush3.msra.mxu0 %v284_v0  ;;  %592 = vmatpush3.msra.mxu1 %v284_v0  ;;  %s263_s11 = scalar_lea.vmem %s713_s0, %s675_s8  ;;  %v557_v10 = vld [vmem:[%s716_s3] ss:$0 sm:$0xff]  ;;  %s269_s18 = scalar_lea.vmem %s714_s1, %s675_s8 }
   0xe   : > { %576 = vmatprep.subr.mxu0 %v283_v1  ;;  %589 = vmatprep.subr.mxu1 %v283_v1  ;;  %v277_v4 = vld [vmem:[%s263_s11] sm:$0xff]  ;;  %v279_v5 = vld [vmem:[%s263_s11 + $0x10] sm:$0xff]  ;;  %v278_v6 = vld [vmem:[%s263_s11 + $0x8] sm:$0xff]  ;;  %s275_s24 = scalar_lea.vmem %s719_s6, %s675_s8 }
   0xf   : > { %577 = vmatpush3.msra.mxu0 %v283_v1  ;;  %593 = vmatpush3.msra.mxu1 %v283_v1  ;;  %v280_v7 = vld [vmem:[%s263_s11 + $0x18] sm:$0xff]  ;;  %v562_v54 = vld [vmem:[%s717_s4] ss:$0 sm:$0xff] }
  0x10   : > { %578 = vmatprep.subr.mxu0 %v282_v2  ;;  %590 = vmatprep.subr.mxu1 %v282_v2  ;;  %v563_v56 = vld [vmem:[%s718_s5] ss:$0 sm:$0xff] }
  0x11   : > { %579 = vmatpush3.msra.mxu0 %v282_v2  ;;  %594 = vmatpush3.msra.mxu1 %v282_v2  ;;  %v466_v59 = vld [vmem:[%s269_s18] sm:$0xff] }
  0x12   : > { %580 = vmatprep.subr.mxu0 %v281_v3  ;;  %591 = vmatprep.subr.mxu1 %v281_v3 }
  0x13   : > { %581 = vmatpush3.msra.mxu0 %v281_v3  ;;  %595 = vmatpush3.msra.mxu1 %v281_v3  ;;  %v467_v3 = vld [vmem:[%s269_s18 + $0x8] sm:$0xff] }
  0x14   : > { %582 = vmatprep.mubr.msk.f32.mxu0 %vm292_vm0, %v277_v4  ;;  %585 = vmatprep.mubr.msk.f32.mxu1 %vm292_vm0, %v279_v5  ;;  %v468_v5 = vld [vmem:[%s269_s18 + $0x10] sm:$0xff] }
  0x15   : > { %583 = vmatmul.mubr.msk.f32.vlgmr.msra.gmra.mxu0 %vm292_vm0, %v278_v6  ;;  %586 = vmatmul.mubr.msk.f32.vlgmr.msra.gmra.mxu1 %vm292_vm0, %v280_v7 }
  0xd5   : > { %v584_v8 = vpop.f32.mrf.mxu0  ;;  %v587_v9 = vpop.f32.mrf.mxu1 }
  0xd6   : > { %v377_v15 = vadd.f32 %v584_v8, %v557_v10  ;;  %v387_v16 = vadd.f32 %v587_v9, %v557_v10 }
  0xd7   : > { %v371_v11 = vpop.f32.mrf.mxu0  ;;  %v381_v12 = vpop.f32.mrf.mxu1 }
  0xd8   : > { %v372_v13 = vadd.f32 %v557_v10, %v371_v11  ;;  %v382_v14 = vadd.f32 %v557_v10, %v381_v12  ;;  %v400_v19 = vsel %vm390_vm1, %v387_v16, 0.0  ;;  %v394_v20 = vsel %vm390_vm1, %v377_v15, 0.0  ;;  %v469_v11 = vld [vmem:[%s269_s18 + $0x18] sm:$0xff] }
  0xda   : > { %v397_v17 = vsel %vm390_vm1, %v382_v14, 0.0  ;;  %v391_v18 = vsel %vm390_vm1, %v372_v13, 0.0 }
  0xdb   : > { %398 = vadd.xlane.f32.xlu1 %v397_v17  ;;  %392 = vadd.xlane.f32.xlu0 %v391_v18 }
  0xdf   : > { %401 = vadd.xlane.f32.xlu1 %v400_v19  ;;  %395 = vadd.xlane.f32.xlu0 %v394_v20 }
 0x164   : > { %v399_v21 = vpop.xlane.xlu1 %398  ;;  %v393_v22 = vpop.xlane.xlu0 %392 }
 0x165   : > { %v406_v23 = vmul.f32 0.0625, %v399_v21  ;;  %v404_v24 = vmul.f32 0.0625, %v393_v22 }
 0x167   : > { %v410_v25 = vsub.f32 %v382_v14, %v406_v23  ;;  %v408_v26 = vsub.f32 %v372_v13, %v404_v24 }
 0x168   : > { %v402_v27 = vpop.xlane.xlu1 %401  ;;  %v396_v28 = vpop.xlane.xlu0 %395 }
 0x169   : > { %v407_v29 = vmul.f32 0.0625, %v402_v27  ;;  %v405_v30 = vmul.f32 0.0625, %v396_v28  ;;  %v412_v31 = vmul.f32 %v408_v26, %v408_v26  ;;  %v414_v35 = vmul.f32 %v410_v25, %v410_v25 }
 0x16b   : > { %v411_v32 = vsub.f32 %v387_v16, %v407_v29  ;;  %v409_v33 = vsub.f32 %v377_v15, %v405_v30  ;;  %v416_v34 = vsel %vm390_vm1, %v412_v31, 0.0  ;;  %v422_v37 = vsel %vm390_vm1, %v414_v35, 0.0 }
 0x16c   : > { %417 = vadd.xlane.f32.xlu0 %v416_v34 }
 0x16d   : > { %v413_v36 = vmul.f32 %v409_v33, %v409_v33  ;;  %v415_v39 = vmul.f32 %v411_v32, %v411_v32 }
 0x16f   : > { %v419_v38 = vsel %vm390_vm1, %v413_v36, 0.0  ;;  %v425_v40 = vsel %vm390_vm1, %v415_v39, 0.0 }
 0x170   : > { %423 = vadd.xlane.f32.xlu0 %v422_v37  ;;  %420 = vadd.xlane.f32.xlu1 %v419_v38 }
 0x174   : > { %426 = vadd.xlane.f32.xlu1 %v425_v40 }
 0x1f5   : > { %v418_v41 = vpop.xlane.xlu0 %417 }
 0x1f6   : > { %v428_v42 = vmul.f32 0.0625, %v418_v41 }
 0x1f8   : > { %v432_v43 = vadd.f32 1e-05, %v428_v42 }
 0x1f9   : > { %v421_v44 = vpop.xlane.xlu1 %420  ;;  %v424_v45 = vpop.xlane.xlu0 %423 }
 0x1fa   : > { %604 = vrsqrt.f32 %v432_v43  ;;  %v429_v46 = vmul.f32 0.0625, %v421_v44  ;;  %v430_v47 = vmul.f32 0.0625, %v424_v45 }
 0x1fc   : > { %v433_v48 = vadd.f32 1e-05, %v429_v46  ;;  %v434_v49 = vadd.f32 1e-05, %v430_v47 }
 0x1fd   : > { %v427_v50 = vpop.xlane.xlu1 %426 }
 0x1fe   : > { %606 = vrsqrt.f32 %v433_v48  ;;  %v431_v51 = vmul.f32 0.0625, %v427_v50 }
 0x1ff   : > { %608 = vrsqrt.f32 %v434_v49 }
 0x200   : > { %v435_v52 = vadd.f32 1e-05, %v431_v51 }
 0x202   : > { %610 = vrsqrt.f32 %v435_v52 }
 0x207   : > { %v605_v53 = vpop.eup %604 }
 0x208   : > { %v440_v55 = vmul.f32 %v605_v53, %v408_v26 }
 0x20a   : > { %v451_v57 = vmul.f32 %v562_v54, %v440_v55 }
 0x20b   : > { %v607_v58 = vpop.eup %606 }
 0x20c   : > { %v609_v60 = vpop.eup %608  ;;  %v462_v61 = vadd.f32 %v563_v56, %v451_v57  ;;  %v441_v62 = vmul.f32 %v607_v58, %v409_v33 }
 0x20d   : > { %v442_v63 = vmul.f32 %v609_v60, %v410_v25 }
 0x20e   : > { %v470_v0 = vadd.f32 %v466_v59, %v462_v61  ;;  %v452_v1 = vmul.f32 %v562_v54, %v441_v62 }
 0x20f   : > { %v611_v2 = vpop.eup %610  ;;  %v453_v4 = vmul.f32 %v562_v54, %v442_v63 }
 0x210   : > { %474 = vst.msk [vmem:[%s275_s24] sm:$0xff] %vm390_vm1, %v470_v0  ;;  %v463_v6 = vadd.f32 %v563_v56, %v452_v1  ;;  %v443_v7 = vmul.f32 %v611_v2, %v411_v32 }
 0x211   : > { %v464_v8 = vadd.f32 %v563_v56, %v453_v4 }
 0x212   : > { %v471_v9 = vadd.f32 %v467_v3, %v463_v6  ;;  %v454_v10 = vmul.f32 %v562_v54, %v443_v7 }
 0x213   : > { %v472_v12 = vadd.f32 %v468_v5, %v464_v8 }
 0x214   : > { %475 = vst.msk [vmem:[%s275_s24 + $0x8] sm:$0xff] %vm390_vm1, %v471_v9  ;;  %v465_v13 = vadd.f32 %v563_v56, %v454_v10 }
 0x215   : > { %476 = vst.msk [vmem:[%s275_s24 + $0x10] sm:$0xff] %vm390_vm1, %v472_v12 }
 0x216   : > { %v473_v14 = vadd.f32 %v469_v11, %v465_v13 }
 0x218   : > { %477 = vst.msk [vmem:[%s275_s24 + $0x18] sm:$0xff] %vm390_vm1, %v473_v14 }
 0x219 PF: > { %s16_s21 = sadd.s32 1, %s618_s21  }
 0x21a   : > { %p13_p4 = scmp.ge.s32.totalorder %s16_s21, 4  }
 0x21c   :  { %15 = sbr.rel (!%p13_p4) target bundleno = 1 (0x1), region = 77 }

// kernel: _lambda_.16
= control target key start
LH: loop header
LB: loop body
LE: loop exit
PB: predicated region body
PF: predicated region fallthrough
CT: control target
= control target key end

     0   :  { %s1080_s27 = smov 0   ;;  %s1082_s28 = smov 0   ;;  %s1194_s0 = inlined_call_operand.vmem [shape: f32[64,16], index: 0, kind: input, shape index: {}, may-alias: {0,8}]   ;;  %s1195_s1 = inlined_call_operand.vmem [shape: f32[1,16], index: 1, kind: input, shape index: {}]   ;;  %s1196_s2 = inlined_call_operand.vmem [shape: bf16[16,64], index: 2, kind: input, shape index: {}]   ;;  %s1197_s3 = inlined_call_operand.vmem [shape: f32[1,64], index: 3, kind: input, shape index: {}]   ;;  %s1198_s4 = inlined_call_operand.vmem [shape: bf16[16,64], index: 4, kind: input, shape index: {}]   ;;  %s1199_s5 = inlined_call_operand.vmem [shape: f32[1,64], index: 5, kind: input, shape index: {}]   ;;  %s1200_s6 = inlined_call_operand.vmem [shape: bf16[64,16], index: 6, kind: input, shape index: {}]   ;;  %s1201_s7 = inlined_call_operand.vmem [shape: f32[1,16], index: 7, kind: input, shape index: {}]   ;;  %s1202_s8 = inlined_call_operand.vmem [shape: f32[64,16], index: 8, kind: output, shape index: {}, may-alias: {0,8}]  }
   0x1   :  { %s1084_s29 = smov 0  }
   0x2 LB: > { %s30_s30 = sadd.s32 1, %s1029_s28  ;;  %p898_p0 = scmp.ge.s32.totalorder %s1033_s29, 1  ;;  %s1033_s29 = sphi %s1084_s29, %s18_s29   ;;  %s1029_s28 = sphi %s1082_s28, %s1204_s28   ;;  %s1025_s27 = sphi %s1080_s27, %s1203_s27  }
   0x3   : > { %p32_p1 = scmp.ge.s32.totalorder %s30_s30, 2  ;;  %p320_p2 = scmp.lt.s32.totalorder %s1033_s29, 3 }
   0x5   : > { %s1206_s30 = smov (%p32_p1, %s30_s30), 0  ;;  %p321_p3 = pnand %p898_p0, %p320_p2 }
   0x6   : > { %s899_s9 = sshll.u32 (!%p321_p3), %s1025_s27, 2 }
   0x7   : > { %324 = sbr.rel (%p321_p3) target bundleno = 639 (0x27f), region = 52  ;;  %p374_p4 = scmp.lt.s32.totalorder (!%p321_p3), %s899_s9, 7 }
   0xc   : > { %s1208_s9 = smov (!%p374_p4, %s899_s9), 7  ;;  %v1109_v0 = vld [vmem:[%s1201_s7] ss:$0 sm:$0xff]  ;;  %vm414_vm0 = vcmask 130048   ;;  %v983_v43 = vld [vmem:[%s1200_s6 + $0x18] sm:$0xff]   ;;  %v984_v44 = vld [vmem:[%s1200_s6 + $0x10] sm:$0xff]  }
   0xd   : > { %s900_s10 = sshll.u32 %s1208_s9, 3  ;;  %v981_v14 = vld [vmem:[%s1196_s2] sm:$0xff]   ;;  %945 = vmatprep.subr.bf16.mxu0 %v983_v43  ;;  %v985_v45 = vld [vmem:[%s1200_s6 + $0x8] sm:$0xff]   ;;  %vm657_vm1 = vcmask 523264  }
   0xe   : > { %s377_s13 = scalar_lea.vmem %s1194_s0, %s900_s10  ;;  %933 = vmatprep.subr.bf16.mxu1 %v981_v14  ;;  %v982_v15 = vld [vmem:[%s1198_s4] sm:$0xff]   ;;  %946 = vmatpush3.bf16.msra.mxu0 %v983_v43  ;;  %s403_s19 = scalar_lea.vmem %s1202_s8, %s900_s10 }
   0xf   : > { %v1111_v1 = vld [vmem:[%s377_s13 + $0x10] sm:$0xff]  ;;  %v406_v2 = vld [vmem:[%s377_s13] sm:$0xff]  ;;  %v1113_v3 = vld [vmem:[%s377_s13 + $0x18] sm:$0xff]  ;;  %934 = vmatpush3.bf16.msra.mxu1 %v981_v14  ;;  %947 = vmatprep.subr.bf16.mxu0 %v984_v44 }
  0x10   : > { %v412_v4 = vmul.f32 %v1111_v1, %v1111_v1  ;;  %v410_v5 = vmul.f32 %v406_v2, %v406_v2  ;;  %v724_v6 = vadd.f32 %v1109_v0, %v406_v2  ;;  %v413_v7 = vmul.f32 %v1113_v3, %v1113_v3  ;;  %v1120_v8 = vld [vmem:[%s377_s13 + $0x8] sm:$0xff]  ;;  %939 = vmatprep.subr.bf16.mxu1 %v982_v15  ;;  %v903_v33 = vld [vmem:[%s1195_s1] ss:$0 sm:$0xff] }
  0x11   : > { %v411_v9 = vmul.f32 %v1120_v8, %v1120_v8  ;;  %v986_v46 = vld [vmem:[%s1200_s6] sm:$0xff]  }
  0x12   : > { %v421_v10 = vsel %vm414_vm0, %v412_v4, 0.0  ;;  %v415_v11 = vsel %vm414_vm0, %v410_v5, 0.0  ;;  %728 = vst.msk [vmem:[#allocation2] sm:$0xff] %vm414_vm0, %v724_v6  ;;  %v424_v12 = vsel %vm414_vm0, %v413_v7, 0.0  ;;  %948 = vmatpush3.bf16.msra.mxu0 %v984_v44  ;;  %v904_v47 = vld [vmem:[%s1197_s3] ss:$0 sm:$0xff] }
  0x13   : > { %422 = vadd.xlane.f32.xlu1 %v421_v10  ;;  %416 = vadd.xlane.f32.xlu0 %v415_v11  ;;  %v418_v13 = vsel %vm414_vm0, %v411_v9, 0.0 }
  0x14   : > { %949 = vmatprep.subr.bf16.mxu0 %v985_v45 }
  0x16   : > { %950 = vmatpush3.bf16.msra.mxu0 %v985_v45 }
  0x17   : > { %425 = vadd.xlane.f32.xlu1 %v424_v12  ;;  %419 = vadd.xlane.f32.xlu0 %v418_v13 }
  0x18   : > { %951 = vmatprep.subr.bf16.mxu0 %v986_v46 }
  0x1a   : > { %952 = vmatpush3.bf16.msra.mxu0 %v986_v46 }
  0x9c   : > { %v423_v16 = vpop.xlane.xlu1 %422  ;;  %v417_v17 = vpop.xlane.xlu0 %416 }
  0x9d   : > { %v430_v18 = vmul.f32 0.0625, %v423_v16  ;;  %v428_v19 = vmul.f32 0.0625, %v417_v17 }
  0x9f   : > { %v434_v20 = vadd.f32 1.1920929e-07, %v430_v18  ;;  %v432_v21 = vadd.f32 1.1920929e-07, %v428_v19 }
  0xa0   : > { %v426_v22 = vpop.xlane.xlu1 %425  ;;  %v420_v23 = vpop.xlane.xlu0 %419 }
  0xa1   : > { %987 = vrsqrt.f32 %v434_v20  ;;  %v431_v24 = vmul.f32 0.0625, %v426_v22  ;;  %v429_v25 = vmul.f32 0.0625, %v420_v23 }
  0xa2   : > { %989 = vrsqrt.f32 %v432_v21  ;;  %v908_v21 = vld [vmem:[%s1199_s5] ss:$0 sm:$0xff] }
  0xa3   : > { %v435_v26 = vadd.f32 1.1920929e-07, %v431_v24  ;;  %v433_v27 = vadd.f32 1.1920929e-07, %v429_v25 }
  0xa5   : > { %991 = vrsqrt.f32 %v435_v26 }
  0xa6   : > { %993 = vrsqrt.f32 %v433_v27 }
  0xae   : > { %v988_v28 = vpop.eup %987 }
  0xaf   : > { %v990_v29 = vpop.eup %989  ;;  %v442_v30 = vmul.f32 %v988_v28, %v1111_v1 }
  0xb0   : > { %v440_v32 = vmul.f32 %v990_v29, %v406_v2 }
  0xb1   : > { %v453_v37 = vmul.f32 %v903_v33, %v442_v30 }
  0xb2   : > { %v992_v31 = vpop.eup %991  ;;  %v451_v39 = vmul.f32 %v903_v33, %v440_v32 }
  0xb3   : > { %v994_v34 = vpop.eup %993  ;;  %v443_v35 = vmul.f32 %v992_v31, %v1113_v3 }
  0xb4   : > { %v441_v36 = vmul.f32 %v994_v34, %v1120_v8 }
  0xb5   : > { %v454_v38 = vmul.f32 %v903_v33, %v443_v35  ;;  %v726_v35 = vadd.f32 %v1109_v0, %v1111_v1 }
  0xb6   : > { %v452_v40 = vmul.f32 %v903_v33, %v441_v36  ;;  %v727_v36 = vadd.f32 %v1109_v0, %v1113_v3 }
  0xb7   : > { %v456_v41 = vpack.c.bf16 %v454_v38, %v453_v37  ;;  %730 = vst.msk [vmem:[#allocation2 + $0x10] sm:$0xff] %vm414_vm0, %v726_v35  ;;  %v725_v37 = vadd.f32 %v1109_v0, %v1120_v8 }
  0xb8   : > { %v455_v42 = vpack.c.bf16 %v452_v40, %v451_v39  ;;  %731 = vst.msk [vmem:[#allocation2 + $0x18] sm:$0xff] %vm414_vm0, %v727_v36  ;;  %v732_v40 = vld [vmem:[#allocation2] sm:$0xff] }
  0xb9   : > { %729 = vst.msk [vmem:[#allocation2 + $0x8] sm:$0xff] %vm414_vm0, %v725_v37 }
  0xba   : > { %935 = vmatprep.mubr.msk.bf16.mxu1 %vm414_vm0, %v455_v42 }
  0xbb   : > { %936 = vmatmul.mubr.msk.bf16.vlgmr.msra.gmra.mxu1 %vm414_vm0, %v456_v41 }
  0xbc   : > { %941 = vmatprep.mubr.msk.bf16.mxu1 %vm414_vm0, %v455_v42  ;;  %940 = vmatpush3.bf16.msra.mxu1 %v982_v15 }
  0xbe   : > { %v734_v38 = vld [vmem:[#allocation2 + $0x10] sm:$0xff] }
  0xbf   : > { %v735_v43 = vld [vmem:[#allocation2 + $0x18] sm:$0xff] }
  0xc0   : > { %v733_v45 = vld [vmem:[#allocation2 + $0x8] sm:$0xff] }
  0xc3   : > { %942 = vmatmul.mubr.msk.bf16.vlgmr.msra.gmra.mxu1 %vm414_vm0, %v456_v41 }
 0x17b   : > { %v937_v48 = vpop.f32.mrf.mxu1 }
 0x17c   : > { %v521_v49 = vadd.f32 %v937_v48, %v904_v47 }
 0x17d   : > { %v512_v50 = vpop.f32.mrf.mxu1 }
 0x17e   : > { %v593_v51 = vsub.f32 0.0, %v521_v49  ;;  %v513_v52 = vadd.f32 %v904_v47, %v512_v50 }
 0x17f   : > { %v938_v53 = vpop.f32.mrf.mxu1 }
 0x180   : > { %v599_v54 = vmul.f32 1.442695, %v593_v51  ;;  %v591_v55 = vsub.f32 0.0, %v513_v52  ;;  %v524_v56 = vadd.f32 %v938_v53, %v904_v47 }
 0x181   : > { %v515_v57 = vpop.f32.mrf.mxu1 }
 0x182   : > { %995 = vpow2.f32 %v599_v54  ;;  %v595_v58 = vmul.f32 1.442695, %v591_v55  ;;  %v594_v59 = vsub.f32 0.0, %v524_v56  ;;  %v516_v60 = vadd.f32 %v904_v47, %v515_v57 }
 0x183   : > { %v943_v12 = vpop.f32.mrf.mxu1 }
 0x184   : > { %997 = vpow2.f32 %v595_v58  ;;  %v601_v61 = vmul.f32 1.442695, %v594_v59  ;;  %v592_v62 = vsub.f32 0.0, %v516_v60  ;;  %v585_v28 = vadd.f32 %v943_v12, %v908_v21 }
 0x185   : > { %v576_v13 = vpop.f32.mrf.mxu1 }
 0x186   : > { %999 = vpow2.f32 %v601_v61  ;;  %v597_v63 = vmul.f32 1.442695, %v592_v62  ;;  %v577_v26 = vadd.f32 %v908_v21, %v576_v13 }
 0x187   : > { %v944_v14 = vpop.f32.mrf.mxu1 }
 0x188   : > { %1001 = vpow2.f32 %v597_v63  ;;  %v588_v24 = vadd.f32 %v944_v14, %v908_v21 }
 0x189   : > { %v579_v18 = vpop.f32.mrf.mxu1 }
 0x18a   : > { %v580_v27 = vadd.f32 %v908_v21, %v579_v18 }
 0x18f   : > { %v996_v2 = vpop.eup %995 }
 0x190   : > { %v605_v5 = vadd.f32 1.0, %v996_v2 }
 0x191   : > { %v998_v4 = vpop.eup %997 }
 0x192   : > { %v603_v6 = vadd.f32 1.0, %v998_v4 }
 0x193   : > { %v1000_v7 = vpop.eup %999 }
 0x194   : > { %1003 = vrcp.f32 %v603_v6  ;;  %v606_v9 = vadd.f32 1.0, %v1000_v7 }
 0x195   : > { %v1002_v10 = vpop.eup %1001  ;;  %1005 = vrcp.f32 %v605_v5 }
 0x196   : > { %1007 = vrcp.f32 %v606_v9  ;;  %v604_v11 = vadd.f32 1.0, %v1002_v10 }
 0x198   : > { %1009 = vrcp.f32 %v604_v11 }
 0x1a1   : > { %v1004_v15 = vpop.eup %1003 }
 0x1a2   : > { %v1006_v16 = vpop.eup %1005  ;;  %v615_v19 = vmul.f32 %v1004_v15, %v513_v52 }
 0x1a3   : > { %v1008_v17 = vpop.eup %1007  ;;  %v617_v23 = vmul.f32 %v1006_v16, %v521_v49 }
 0x1a4   : > { %v618_v20 = vmul.f32 %v1008_v17, %v524_v56  ;;  %v619_v30 = vmul.f32 %v615_v19, %v577_v26 }
 0x1a5   : > { %v1010_v22 = vpop.eup %1009  ;;  %v621_v32 = vmul.f32 %v617_v23, %v585_v28 }
 0x1a6   : > { %v616_v25 = vmul.f32 %v1010_v22, %v516_v60  ;;  %v622_v29 = vmul.f32 %v618_v20, %v588_v24 }
 0x1a8   : > { %v620_v31 = vmul.f32 %v616_v25, %v580_v27  ;;  %v624_v34 = vpack.c.bf16 %v622_v29, %v621_v32 }
 0x1aa   : > { %v623_v33 = vpack.c.bf16 %v620_v31, %v619_v30 }
 0x1ac   : > { %953 = vmatprep.mubr.msk.bf16.mxu0 %vm657_vm1, %v623_v33 }
 0x1ad   : > { %954 = vmatmul.mubr.msk.bf16.vlgmr.msra.gmra.mxu0 %vm657_vm1, %v624_v34 }
 0x26d   : > { %v955_v39 = vpop.f32.mrf.mxu0 }
 0x26e   : > { %v738_v41 = vadd.f32 %v955_v39, %v734_v38 }
 0x26f   : > { %v698_v42 = vpop.f32.mrf.mxu0 }
 0x270   : > { %742 = vst.msk [vmem:[#allocation2 + $0x10] sm:$0xff] %vm414_vm0, %v738_v41  ;;  %v736_v1 = vadd.f32 %v732_v40, %v698_v42 }
 0x271   : > { %v956_v44 = vpop.f32.mrf.mxu0 }
 0x272   : > { %740 = vst.msk [vmem:[#allocation2] sm:$0xff] %vm414_vm0, %v736_v1  ;;  %v739_v3 = vadd.f32 %v956_v44, %v735_v43 }
 0x273   : > { %v701_v46 = vpop.f32.mrf.mxu0 }
 0x274   : > { %743 = vst.msk [vmem:[#allocation2 + $0x18] sm:$0xff] %vm414_vm0, %v739_v3  ;;  %v737_v0 = vadd.f32 %v733_v45, %v701_v46 }
 0x276   : > { %741 = vst.msk [vmem:[#allocation2 + $0x8] sm:$0xff] %vm414_vm0, %v737_v0 }
 0x277   : > { %v749_v48 = vld [vmem:[#allocation2 + $0x10] sm:$0xff] }
 0x278   : > { %753 = vst.msk [vmem:[%s403_s19 + $0x10] sm:$0xff] %vm414_vm0, %v749_v48 }
 0x279   : > { %v747_v8 = vld [vmem:[#allocation2] sm:$0xff] }
 0x27a   : > { %751 = vst.msk [vmem:[%s403_s19] sm:$0xff] %vm414_vm0, %v747_v8 }
 0x27b   : > { %v750_v49 = vld [vmem:[#allocation2 + $0x18] sm:$0xff] }
 0x27c   : > { %754 = vst.msk [vmem:[%s403_s19 + $0x18] sm:$0xff] %vm414_vm0, %v750_v49 }
 0x27d   : > { %v748_v47 = vld [vmem:[#allocation2 + $0x8] sm:$0xff] }
 0x27e   : > { %752 = vst.msk [vmem:[%s403_s19 + $0x8] sm:$0xff] %vm414_vm0, %v748_v47 }
 0x27f PF: > { %s18_s29 = sadd.s32 1, %s1033_s29   ;;  %s1203_s27 = smov %s1029_s28 }
 0x280   : > { %p15_p5 = scmp.ge.s32.totalorder %s18_s29, 4   ;;  %s1204_s28 = smov %s1206_s30 }
 0x282   :  { %17 = sbr.rel (!%p15_p5) target bundleno = 2 (0x2), region = 105 }

// kernel: _lambda_.17
= control target key start
LH: loop header
LB: loop body
LE: loop exit
PB: predicated region body
PF: predicated region fallthrough
CT: control target
= control target key end

     0   :  { %s467_s15 = smov 0   ;;  %s516_s0 = inlined_call_operand.vmem [shape: f32[32,38], index: 0, kind: input, shape index: {}]   ;;  %s517_s1 = inlined_call_operand.vmem [shape: f32[38,32], index: 1, kind: input, shape index: {}]   ;;  %s518_s2 = inlined_call_operand.vmem [shape: f32[1,32], index: 2, kind: input, shape index: {}]   ;;  %s519_s3 = inlined_call_operand.vmem [shape: f32[1,32], index: 3, kind: input, shape index: {}]   ;;  %s520_s4 = inlined_call_operand.vmem [shape: f32[32,32], index: 4, kind: output, shape index: {}]  }
   0x1 LB: > { %s386_s16 = sadd.s32 4294967295, %s440_s15   ;;  %p390_p0 = scmp.ge.s32.totalorder %s440_s15, 1  ;;  %s440_s15 = sphi %s467_s15, %s14_s15  }
   0x2   : > { %p163_p1 = scmp.lt.s32.totalorder %s440_s15, 3 }
   0x4   : > { %p164_p2 = pnand %p390_p0, %p163_p1 }
   0x5   : > { %s391_s21 = sshll.u32 (!%p164_p2), %s386_s16, 1 }
   0x6   : > { %167 = sbr.rel (%p164_p2) target bundleno = 387 (0x183), region = 36  ;;  %p190_p3 = scmp.lt.s32.totalorder (!%p164_p2), %s391_s21, 3 }
   0xb   : > { %v207_v0 = vld [vmem:[%s517_s1 + $0x20] sm:$0x3f]  ;;  %vm222_vm0 = vcmask 1045504   ;;  %v206_v1 = vld [vmem:[%s517_s1 + $0x18] sm:$0xff]  ;;  %v205_v2 = vld [vmem:[%s517_s1 + $0x10] sm:$0xff]  ;;  %s522_s21 = smov (!%p190_p3, %s391_s21), 3 }
   0xc   : > { %409 = vmatprep.subr.msk.mxu0 %vm222_vm0, %v207_v0  ;;  %v204_v3 = vld [vmem:[%s517_s1 + $0x8] sm:$0xff]  ;;  %s392_s26 = sshll.u32 %s522_s21, 3  ;;  %vm215_vm1 = vcmask 310272   ;;  %v203_v4 = vld [vmem:[%s517_s1] sm:$0xff]  ;;  %vm303_vm2 = vcmask 261120  }
   0xd   : > { %410 = vmatpush3.msk.msra.mxu0 %vm222_vm0, %v207_v0  ;;  %s193_s5 = scalar_lea.vmem %s516_s0, %s392_s26  ;;  %v395_v8 = vld [vmem:[%s518_s2] ss:$0 sm:$0xff]  ;;  %s199_s12 = scalar_lea.vmem %s520_s4, %s392_s26 }
   0xe   : > { %411 = vmatprep.subr.mxu0 %v206_v1  ;;  %v201_v5 = vld [vmem:[%s193_s5] sm:$0xff]  ;;  %v202_v6 = vld [vmem:[%s193_s5 + $0x8] sm:$0xff] }
   0xf   : > { %412 = vmatpush3.msra.mxu0 %v206_v1  ;;  %419 = vmatprep.mubr.msk.f32.mxu0 %vm215_vm1, %v201_v5  ;;  %v399_v23 = vld [vmem:[%s519_s3] ss:$0 sm:$0xff] }
  0x10   : > { %413 = vmatprep.subr.mxu0 %v205_v2 }
  0x11   : > { %414 = vmatpush3.msra.mxu0 %v205_v2 }
  0x12   : > { %415 = vmatprep.subr.mxu0 %v204_v3 }
  0x13   : > { %416 = vmatpush3.msra.mxu0 %v204_v3 }
  0x14   : > { %417 = vmatprep.subr.mxu0 %v203_v4 }
  0x15   : > { %418 = vmatpush3.msra.mxu0 %v203_v4 }
  0x16   : > { %420 = vmatmul.mubr.msk.f32.vlgmr.msra.gmra.mxu0 %vm215_vm1, %v202_v6 }
  0xd6   : > { %v421_v7 = vpop.f32.mrf.mxu0 }
  0xd7   : > { %v298_v10 = vadd.f32 %v421_v7, %v395_v8 }
  0xd8   : > { %v292_v9 = vpop.f32.mrf.mxu0 }
  0xd9   : > { %v293_v11 = vadd.f32 %v395_v8, %v292_v9  ;;  %v302_v14 = vmul.f32 %v298_v10, %v298_v10 }
  0xdb   : > { %v301_v12 = vmul.f32 %v293_v11, %v293_v11  ;;  %v307_v15 = vsel %vm303_vm2, %v302_v14, 0.0 }
  0xdd   : > { %v304_v13 = vsel %vm303_vm2, %v301_v12, 0.0 }
  0xde   : > { %305 = vadd.xlane.f32.xlu0 %v304_v13 }
  0xe2   : > { %308 = vadd.xlane.f32.xlu0 %v307_v15 }
 0x167   : > { %v306_v16 = vpop.xlane.xlu0 %305 }
 0x168   : > { %v311_v17 = vmul.f32 0.03125, %v306_v16 }
 0x16a   : > { %v313_v18 = vadd.f32 1.1920929e-07, %v311_v17 }
 0x16b   : > { %v309_v19 = vpop.xlane.xlu0 %308 }
 0x16c   : > { %430 = vrsqrt.f32 %v313_v18  ;;  %v312_v20 = vmul.f32 0.03125, %v309_v19 }
 0x16e   : > { %v314_v21 = vadd.f32 1.1920929e-07, %v312_v20 }
 0x170   : > { %432 = vrsqrt.f32 %v314_v21 }
 0x179   : > { %v431_v22 = vpop.eup %430 }
 0x17a   : > { %v317_v24 = vmul.f32 %v431_v22, %v293_v11 }
 0x17c   : > { %v326_v25 = vmul.f32 %v399_v23, %v317_v24 }
 0x17d   : > { %v433_v26 = vpop.eup %432 }
 0x17e   : > { %328 = vst.msk [vmem:[%s199_s12] sm:$0xff] %vm303_vm2, %v326_v25  ;;  %v318_v27 = vmul.f32 %v433_v26, %v298_v10 }
 0x180   : > { %v327_v28 = vmul.f32 %v399_v23, %v318_v27 }
 0x182   : > { %329 = vst.msk [vmem:[%s199_s12 + $0x8] sm:$0xff] %vm303_vm2, %v327_v28 }
 0x183 PF: > { %s14_s15 = sadd.s32 1, %s440_s15  }
 0x184   : > { %p11_p4 = scmp.ge.s32.totalorder %s14_s15, 4  }
 0x186   :  { %13 = sbr.rel (!%p11_p4) target bundleno = 1 (0x1), region = 66 }

// kernel: _lambda_.15
= control target key start
LH: loop header
LB: loop body
LE: loop exit
PB: predicated region body
PF: predicated region fallthrough
CT: control target
= control target key end

     0   :  { %15 = vsyncpa [#allocation4], 0  ;;  %s2861_s13 = smov 0   ;;  %s3196_s0 = inlined_call_operand.vmem [shape: f32[64,16], index: 0, kind: input, shape index: {}, may-alias: {0,10}]   ;;  %s3197_s1 = inlined_call_operand.vmem [shape: f32[64,3], index: 1, kind: input, shape index: {}]   ;;  %s3198_s2 = inlined_call_operand.vmem [shape: f32[1,16], index: 2, kind: input, shape index: {}]   ;;  %s3199_s3 = inlined_call_operand.vmem [shape: bf16[3,16], index: 3, kind: input, shape index: {}]   ;;  %s3200_s4 = inlined_call_operand.vmem [shape: f32[1,16], index: 4, kind: input, shape index: {}]   ;;  %s3201_s5 = inlined_call_operand.vmem [shape: bf16[16,48], index: 5, kind: input, shape index: {}]   ;;  %s3202_s6 = inlined_call_operand.vmem [shape: f32[1,48], index: 6, kind: input, shape index: {}]   ;;  %s3203_s7 = inlined_call_operand.vmem [shape: bf16[16,16], index: 7, kind: input, shape index: {}]   ;;  %s3204_s8 = inlined_call_operand.vmem [shape: f32[1,16], index: 8, kind: input, shape index: {}]   ;;  %s3205_s9 = inlined_call_operand.vmem [shape: f32[2], index: 9, kind: input, shape index: {}]   ;;  %s3206_s10 = inlined_call_operand.vmem [shape: f32[64,16], index: 10, kind: output, shape index: {}, may-alias: {0,10}]  }
   0x1 LB: > { %s2409_s14 = sadd.s32 4294967295, %s2793_s13   ;;  %p2411_p0 = scmp.ge.s32.totalorder %s2793_s13, 1  ;;  %s2793_s13 = sphi %s2861_s13, %s21_s13  }
   0x2   : > { %p272_p1 = scmp.lt.s32.totalorder %s2793_s13, 3  ;;  %s306_s17 = sshll.u32 %s3205_s9, 4  ;;  %s307_s17 = int_to_ptr.vmem [resolvable:$true] %s306_s17 }
   0x3   : > { %p2876_p3 = scmp.eq.s32.totalorder %s2409_s14, 0  ;;  %s2768_s20 = scalar_lea.vmem %s307_s17, 16 }
   0x4   : > { %p2872_p2 = pnand %p2411_p0, %p272_p1  ;;  %p2769_p6 = scmp.ne.s32.totalorder %s307_s17, %s2768_s20 }
   0x5   : > { %p2776_p10 = scmp.lt.s32.totalorder %s307_s17, %s307_s17  ;;  %p2777_p11 = scmp.lt.s32.totalorder %s2768_s20, %s2768_s20 }
   0x6   : > { %p2692_p4 = pneg %p2872_p2 }
   0x7   : > { %p2778_p12 = por %p2777_p11, %p2776_p10 }
   0x8   : > { %p2693_p5 = pnand %p2876_p3, %p2692_p4 }
   0xa   : > { %p2770_p7 = pneg %p2693_p5 }
   0xc   : > { %p2771_p8 = pnand %p2770_p7, %p2769_p6 }
   0xe   : > { %p2772_p9 = pneg %p2771_p8 }
  0x10   : > { %p2779_p13 = pnand %p2778_p12, %p2772_p9 }
  0x12   : > { %2782 = shalt.err (!%p2779_p13)
}
  0x13   : > { %s2795_s21 = smov [#allocation3]   ;;  %337 = sbr.rel (%p2872_p2) target bundleno = 2248 (0x8c8), region = 60 }
  0x14   : > { %2695 = dma.vmem_to_smem (!%p2693_p5), %s307_s17, 16, %s2795_s21, [#allocation4]  }
  0x18   : > { %2788 = dma.done.wait (%p2876_p3), [#allocation4], 16  }
  0x19   : > { %2790 = vsyncadd (%p2876_p3), [#allocation4], 4294967280 }
  0x1a   : > { %343 = sfence }
  0x1b   : > { %v493_v0 = vld [vmem:[%s3199_s3] sm:$0x3]  ;;  %vm500_vm0 = vcmask 1040384   ;;  %vm501_vm1 = vcmask 1041408   ;;  %s2416_s24 = sshll.u32 %s2409_s14, 2  ;;  %v2796_v1 = vmov 65535  }
  0x1c   : > { %v502_v2 = vsel %vm500_vm0, 4294967295, %v2796_v1  ;;  %p382_p0 = scmp.lt.s32.totalorder %s2416_s24, 7  ;;  %vm453_vm2 = vcmask 23552   ;;  %vm412_vm3 = vcmask 130048   ;;  %v2717_v59 = vld [vmem:[%s3201_s5] sm:$0xff]   ;;  %vm2798_vm4 = vmmov 0  }
  0x1d   : > { %v503_v3 = vsel %vm501_vm1, %v502_v2, 0  ;;  %2540 = vmatprep.subr.bf16.mxu1 %v2717_v59  ;;  %s2800_s21 = smov 112   ;;  %vm1320_vm5 = vcmask 64512   ;;  %s1515_s22 = sld [smem:[#allocation3]]  ;;  %vm1578_vm14 = vcmask 1043456   ;;  %vm2240_vm15 = vcmask 130112  }
  0x1e   : > { %v505_v4 = vand.u32 %v503_v3, %v493_v0  ;;  %s3210_s24 = smov (!%p382_p0, %s2416_s24), 7  ;;  %2541 = vmatpush3.bf16.msra.mxu1 %v2717_v59  ;;  %s2801_s23 = smov 96  }
  0x1f   : > { %s2893_s25 = sshll.u32 %s3210_s24, 3  ;;  %s2802_s24 = smov 104  }
  0x20   : > { %2534 = vmatprep.subr.bf16.mxu0 %v505_v4  ;;  %s391_s28 = scalar_lea.vmem %s3197_s1, %s2893_s25  ;;  %s2903_s11 = scalar_lea.vmem %s3196_s0, %s2893_s25 }
  0x21   : > { %2535 = vmatpush3.bf16.msra.mxu0 %v505_v4  ;;  %v404_v5 = vld [vmem:[%s391_s28] sm:$0xff]  ;;  %v405_v6 = vld [vmem:[%s391_s28 + $0x8] sm:$0xff]  ;;  %v406_v7 = vld [vmem:[%s391_s28 + $0x10] sm:$0xff]  ;;  %s2803_s26 = smov 120   ;;  %s2462_s27 = sld [smem:[#allocation3 + $0x1]] }
  0x22   : > { %v454_v8 = vsel %vm453_vm2, %v404_v5, 0.0  ;;  %v461_v9 = vsel %vm453_vm2, %v405_v6, 0.0  ;;  %v407_v10 = vld [vmem:[%s391_s28 + $0x18] sm:$0xff]  ;;  %v468_v11 = vsel %vm453_vm2, %v406_v7, 0.0  ;;  %v2909_v12 = vld [vmem:[%s2903_s11 + $0x10] sm:$0xff]  ;;  %v2912_v13 = vld [vmem:[%s2903_s11] sm:$0xff]  ;;  %s397_s18 = scalar_lea.vmem %s3206_s10, %s2893_s25 }
  0x23   : > { %v455_v14 = vrot.slane %v454_v8, 4  ;;  %v462_v15 = vrot.slane %v461_v9, 4  ;;  %v469_v16 = vrot.slane %v468_v11, 4  ;;  %v475_v17 = vsel %vm453_vm2, %v407_v10, 0.0  ;;  %v2916_v18 = vld [vmem:[%s2903_s11 + $0x18] sm:$0xff]  ;;  %v2919_v19 = vld [vmem:[%s2903_s11 + $0x8] sm:$0xff] }
  0x24   : > { %v476_v20 = vrot.slane %v475_v17, 4  ;;  %v410_v21 = vmul.f32 %v2909_v12, %v2909_v12  ;;  %v408_v22 = vmul.f32 %v2912_v13, %v2912_v13  ;;  %v411_v23 = vmul.f32 %v2916_v18, %v2916_v18  ;;  %s2804_s28 = smov 88   ;;  %s2805_s29 = smov 8  }
  0x25   : > { %v456_v24 = vadd.f32 %v455_v14, %v454_v8  ;;  %v463_v25 = vadd.f32 %v462_v15, %v461_v9  ;;  %v470_v26 = vadd.f32 %v469_v16, %v468_v11  ;;  %v409_v27 = vmul.f32 %v2919_v19, %v2919_v19 }
  0x26   : > { %v477_v28 = vadd.f32 %v476_v20, %v475_v17  ;;  %v419_v29 = vsel %vm412_vm3, %v410_v21, 0.0  ;;  %v413_v30 = vsel %vm412_vm3, %v408_v22, 0.0  ;;  %v422_v35 = vsel %vm412_vm3, %v411_v23, 0.0  ;;  %v2422_v17 = vld [vmem:[%s3198_s2] ss:$0 sm:$0xff] }
  0x27   : > { %v457_v31 = vrot.slane %v456_v24, 2  ;;  %v464_v32 = vrot.slane %v463_v25, 2  ;;  %v471_v33 = vrot.slane %v470_v26, 2  ;;  %420 = vadd.xlane.f32.xlu1 %v419_v29  ;;  %414 = vadd.xlane.f32.xlu0 %v413_v30  ;;  %v416_v36 = vsel %vm412_vm3, %v409_v27, 0.0 }
  0x28   : > { %v478_v34 = vrot.slane %v477_v28, 2 }
  0x29   : > { %v458_v37 = vadd.f32 %v457_v31, %v456_v24  ;;  %v465_v38 = vadd.f32 %v464_v32, %v463_v25  ;;  %v472_v39 = vadd.f32 %v471_v33, %v470_v26  ;;  %v2425_v31 = vld [vmem:[%s3200_s4] ss:$0 sm:$0xff] }
  0x2a   : > { %v479_v40 = vadd.f32 %v478_v34, %v477_v28 }
  0x2b   : > { %v459_v41 = vrot.slane %v458_v37, 1  ;;  %v466_v42 = vrot.slane %v465_v38, 1  ;;  %v473_v43 = vrot.slane %v472_v39, 1  ;;  %423 = vadd.xlane.f32.xlu1 %v422_v35  ;;  %417 = vadd.xlane.f32.xlu0 %v416_v36 }
  0x2c   : > { %v480_v44 = vrot.slane %v479_v40, 1 }
  0x2d   : > { %v460_v45 = vadd.f32 %v459_v41, %v458_v37  ;;  %v467_v46 = vadd.f32 %v466_v42, %v465_v38  ;;  %v474_v47 = vadd.f32 %v473_v43, %v472_v39  ;;  %v2799_v43 = vmov 1.0  }
  0x2e   : > { %v481_v48 = vadd.f32 %v480_v44, %v479_v40  ;;  %v2797_v40 = vmov 0.0  }
  0x2f   : > { %v483_v49 = vmul.f32 0.125, %v460_v45  ;;  %v484_v50 = vmul.f32 0.125, %v467_v46  ;;  %v485_v51 = vmul.f32 0.125, %v474_v47  ;;  %2546 = vmatprep.subr.mxu1 %v2797_v40  ;;  %2556 = vmatprep.subr.mxu0 %v2797_v40  ;;  %v2426_v46 = vld [vmem:[%s3202_s6] ss:$0 sm:$0xff] }
  0x30   : > { %v486_v52 = vmul.f32 0.125, %v481_v48 }
  0x31   : > { %v2933_v53 = vsub.f32 %v404_v5, %v483_v49  ;;  %v2935_v54 = vsub.f32 %v405_v6, %v484_v50  ;;  %v2937_v55 = vsub.f32 %v406_v7, %v485_v51 }
  0x32   : > { %v2939_v56 = vsub.f32 %v407_v10, %v486_v52 }
  0x33   : > { %v491_v57 = vpack.c.bf16 %v2935_v54, %v2933_v53  ;;  %v643_v39 = vmul.f32 %v2933_v53, %v2933_v53  ;;  %v645_v41 = vmul.f32 %v2937_v55, %v2937_v55  ;;  %v644_v42 = vmul.f32 %v2935_v54, %v2935_v54 }
  0x34   : > { %v492_v58 = vpack.c.bf16 %v2939_v56, %v2937_v55  ;;  %v646_v44 = vmul.f32 %v2939_v56, %v2939_v56 }
  0x35   : > { %2536 = vmatprep.mubr.msk.bf16.mxu0 %vm453_vm2, %v491_v57  ;;  %v653_v59 = vsel %vm453_vm2, %v645_v41, 0.0 }
  0x36   : > { %2537 = vmatmul.mubr.msk.bf16.vlgmr.msra.gmra.mxu0 %vm453_vm2, %v492_v58  ;;  %v647_v58 = vsel %vm453_vm2, %v643_v39, 0.0 }
  0x37   : > { %2557 = vmatpush3.xpose.msk.msra.mxu0 %vm453_vm2, %v645_v41  ;;  %2558 = vmatprep.mubr.msk.f32.mxu0 %vm2798_vm4, %v2797_v40 }
  0x38   : > { %2566 = vmatprep.subr.mxu0 %v2797_v40 }
  0x3e   : > { %2559 = vmatmul.mubr.msk.f32.vlgmr.msra.gmra.mxu0 %vm453_vm2, %v2799_v43 }
  0x3f   : > { %2567 = vmatpush3.xpose.msk.msra.mxu0 %vm453_vm2, %v2933_v53  ;;  %2568 = vmatprep.mubr.msk.f32.mxu0 %vm2798_vm4, %v2797_v40 }
  0x40   : > { %2576 = vmatprep.subr.mxu0 %v2797_v40 }
  0x42   : > { %2569 = vmatmul.mubr.msk.f32.vlgmr.msra.gmra.mxu0 %vm453_vm2, %v2933_v53 }
  0x43   : > { %2577 = vmatpush3.xpose.msk.msra.mxu0 %vm453_vm2, %v2937_v55  ;;  %2578 = vmatprep.mubr.msk.f32.mxu0 %vm2798_vm4, %v2797_v40 }
  0x44   : > { %2586 = vmatprep.subr.bf16.mxu0 %v2797_v40 }
  0x46   : > { %2579 = vmatmul.mubr.msk.f32.vlgmr.msra.gmra.mxu0 %vm453_vm2, %v2937_v55 }
  0x47   : > { %2588 = vmatprep.mubr.msk.bf16.mxu0 %vm2798_vm4, %v2797_v40 }
  0xb0   : > { %v421_v60 = vpop.xlane.xlu1 %420  ;;  %v415_v61 = vpop.xlane.xlu0 %414 }
  0xb1   : > { %v426_v63 = vmul.f32 0.0625, %v415_v61  ;;  %v428_v2 = vmul.f32 0.0625, %v421_v60  ;;  %v656_v60 = vsel %vm453_vm2, %v646_v44, 0.0  ;;  %v650_v61 = vsel %vm453_vm2, %v644_v42, 0.0 }
  0xb3   : > { %v430_v4 = vadd.f32 1.1920929e-07, %v426_v63  ;;  %v432_v6 = vadd.f32 1.1920929e-07, %v428_v2 }
  0xb4   : > { %v424_v62 = vpop.xlane.xlu1 %423  ;;  %v418_v0 = vpop.xlane.xlu0 %417 }
  0xb5   : > { %v429_v1 = vmul.f32 0.0625, %v424_v62  ;;  %v427_v3 = vmul.f32 0.0625, %v418_v0  ;;  %2719 = vrsqrt.f32 %v430_v4 }
  0xb7   : > { %v433_v5 = vadd.f32 1.1920929e-07, %v429_v1  ;;  %v431_v7 = vadd.f32 1.1920929e-07, %v427_v3 }
  0xb9   : > { %2721 = vrsqrt.f32 %v433_v5 }
  0xba   : > { %2723 = vrsqrt.f32 %v432_v6 }
  0xbb   : > { %2725 = vrsqrt.f32 %v431_v7 }
  0xc2   : > { %v2720_v8 = vpop.eup %2719 }
  0xc3   : > { %v438_v14 = vmul.f32 %v2720_v8, %v2912_v13 }
  0xc5   : > { %v449_v22 = vmul.f32 %v2422_v17, %v438_v14 }
  0xc6   : > { %v2722_v9 = vpop.eup %2721 }
  0xc7   : > { %v2724_v10 = vpop.eup %2723  ;;  %v441_v15 = vmul.f32 %v2722_v9, %v2916_v18 }
  0xc8   : > { %v2726_v11 = vpop.eup %2725  ;;  %v440_v16 = vmul.f32 %v2724_v10, %v2909_v12 }
  0xc9   : > { %v439_v20 = vmul.f32 %v2726_v11, %v2919_v19  ;;  %v452_v23 = vmul.f32 %v2422_v17, %v441_v15 }
  0xca   : > { %v451_v24 = vmul.f32 %v2422_v17, %v440_v16 }
  0xcb   : > { %v450_v26 = vmul.f32 %v2422_v17, %v439_v20 }
  0xf6   : > { %v2538_v21 = vpop.f32.mrf.mxu0 }
  0xf7   : > { %v558_v13 = vadd.f32 %v2538_v21, %v451_v24 }
  0xf8   : > { %v541_v25 = vpop.f32.mrf.mxu0 }
  0xf9   : > { %v556_v28 = vadd.f32 %v541_v25, %v449_v22  ;;  %v569_v36 = vadd.f32 %v2425_v31, %v558_v13 }
  0xfa   : > { %v2539_v27 = vpop.f32.mrf.mxu0 }
  0xfb   : > { %v559_v29 = vadd.f32 %v2539_v27, %v452_v23  ;;  %v567_v34 = vadd.f32 %v2425_v31, %v556_v28 }
  0xfc   : > { %v544_v30 = vpop.f32.mrf.mxu0 }
  0xfd   : > { %v557_v32 = vadd.f32 %v544_v30, %v450_v26  ;;  %v570_v33 = vadd.f32 %v2425_v31, %v559_v29  ;;  %v1246_v26 = vlaneseq }
  0xfe   : > { %v877_v0 = vpop.f32.mrf.mxu0 }
  0xff   : > { %v568_v35 = vadd.f32 %v2425_v31, %v557_v32  ;;  %v572_v38 = vpack.c.bf16 %v570_v33, %v569_v36  ;;  %v1247_v27 = vshrl.u32 %v1246_v26, 7 }
 0x100   : > { %v2560_v2 = vpop.f32.mrf.mxu0 }
 0x101   : > { %v571_v37 = vpack.c.bf16 %v568_v35, %v567_v34  ;;  %v1248_v28 = vsub.s32 0, %v1247_v27  ;;  %v1516_v2 = vstv %s1515_s22 }
 0x102   : > { %v1023_v4 = vpop.f32.mrf.mxu0 }
 0x103   : > { %2542 = vmatprep.mubr.msk.bf16.mxu1 %vm412_vm3, %v571_v37  ;;  %v1266_v13 = vmul.f32 2.0, %v1023_v4  ;;  %v1257_v31 = vrot.slane %v877_v0, %v1248_v28 }
 0x104   : > { %2543 = vmatmul.mubr.msk.bf16.vlgmr.msra.gmra.mxu1 %vm412_vm3, %v572_v38  ;;  %v2570_v6 = vpop.f32.mrf.mxu0 }
 0x105   : > { %2548 = vmatprep.mubr.msk.f32.mxu1 %vm2798_vm4, %v2797_v40  ;;  %2547 = vmatpush3.xpose.msk.msra.mxu1 %vm453_vm2, %v643_v39 }
 0x106   : > { %2551 = vmatprep.subr.mxu1 %v2797_v40  ;;  %v1169_v8 = vpop.f32.mrf.mxu0 }
 0x107   : > { %v1268_v34 = vmul.f32 2.0, %v1169_v8 }
 0x108   : > { %v2580_v10 = vpop.f32.mrf.mxu0 }
 0x10c   : > { %2549 = vmatmul.mubr.msk.f32.vlgmr.msra.gmra.mxu1 %vm453_vm2, %v2799_v43 }
 0x10d   : > { %2552 = vmatpush3.xpose.msk.msra.mxu1 %vm453_vm2, %v644_v42  ;;  %2553 = vmatprep.mubr.msk.f32.mxu1 %vm2798_vm4, %v2797_v40 }
 0x10e   : > { %2561 = vmatprep.subr.mxu1 %v2797_v40 }
 0x110   : > { %2554 = vmatmul.mubr.msk.f32.vlgmr.msra.gmra.mxu1 %vm453_vm2, %v2799_v43 }
 0x111   : > { %2562 = vmatpush3.xpose.msk.msra.mxu1 %vm453_vm2, %v646_v44  ;;  %2563 = vmatprep.mubr.msk.f32.mxu1 %vm2798_vm4, %v2797_v40 }
 0x112   : > { %2571 = vmatprep.subr.mxu1 %v2797_v40 }
 0x114   : > { %2564 = vmatmul.mubr.msk.f32.vlgmr.msra.gmra.mxu1 %vm453_vm2, %v2799_v43 }
 0x115   : > { %2572 = vmatpush3.xpose.msk.msra.mxu1 %vm453_vm2, %v2935_v54  ;;  %2573 = vmatprep.mubr.msk.f32.mxu1 %vm2798_vm4, %v2797_v40 }
 0x116   : > { %2581 = vmatprep.subr.mxu1 %v2797_v40 }
 0x118   : > { %2574 = vmatmul.mubr.msk.f32.vlgmr.msra.gmra.mxu1 %vm453_vm2, %v2935_v54 }
 0x119   : > { %2582 = vmatpush3.xpose.msk.msra.mxu1 %vm453_vm2, %v2939_v56  ;;  %2583 = vmatprep.mubr.msk.f32.mxu1 %vm2798_vm4, %v2797_v40 }
 0x11a   : > { %2592 = vmatprep.subr.bf16.mxu1 %v2797_v40 }
 0x11c   : > { %2584 = vmatmul.mubr.msk.f32.vlgmr.msra.gmra.mxu1 %vm453_vm2, %v2939_v56 }
 0x11d   : > { %2594 = vmatprep.mubr.msk.bf16.mxu1 %vm2798_vm4, %v2797_v40 }
 0x1c4   : > { %v2544_v45 = vpop.f32.mrf.mxu1 }
 0x1c5   : > { %v637_v53 = vadd.f32 %v2544_v45, %v2426_v46 }
 0x1c6   : > { %v628_v47 = vpop.f32.mrf.mxu1 }
 0x1c7   : > { %v629_v48 = vadd.f32 %v2426_v46, %v628_v47  ;;  %v3033_v55 = vpack.c.bf16 %v637_v53, %v637_v53 }
 0x1c8   : > { %v2545_v49 = vpop.f32.mrf.mxu1 }
 0x1c9   : > { %v3027_v50 = vpack.c.bf16 %v629_v48, %v629_v48  ;;  %v640_v56 = vadd.f32 %v2545_v49, %v2426_v46 }
 0x1ca   : > { %v631_v51 = vpop.f32.mrf.mxu1 }
 0x1cb   : > { %v632_v52 = vadd.f32 %v2426_v46, %v631_v51  ;;  %1318 = vrot.lane.b32.xlu0 %v3027_v50, %s2800_s21  ;;  %v3036_v57 = vpack.c.bf16 %v640_v56, %v640_v56 }
 0x1cc   : > { %v731_v62 = vpop.f32.mrf.mxu1 }
 0x1cd   : > { %v3030_v54 = vpack.c.bf16 %v632_v52, %v632_v52  ;;  %v1249_v29 = vrot.slane %v731_v62, %v1248_v28 }
 0x1ce   : > { %v2550_v63 = vpop.f32.mrf.mxu1 }
 0x1cf   : > { %1367 = vrot.lane.b32.xlu1 %v3030_v54, %s2800_s21 }
 0x1d0   : > { %v804_v1 = vpop.f32.mrf.mxu1 }
 0x1d1   : > { %v1253_v44 = vrot.slane %v804_v1, %v1248_v28 }
 0x1d2   : > { %v2555_v3 = vpop.f32.mrf.mxu1 }
 0x1d3   : > { %1415 = vrot.lane.b32.xlu1 %v3033_v55, %s2800_s21 }
 0x1d4   : > { %v950_v5 = vpop.f32.mrf.mxu1 }
 0x1d5   : > { %v1261_v36 = vrot.slane %v950_v5, %v1248_v28 }
 0x1d6   : > { %v2565_v7 = vpop.f32.mrf.mxu1 }
 0x1d7   : > { %1463 = vrot.lane.b32.xlu1 %v3036_v57, %s2800_s21 }
 0x1d8   : > { %v1096_v9 = vpop.f32.mrf.mxu1 }
 0x1d9   : > { %v1267_v45 = vmul.f32 2.0, %v1096_v9 }
 0x1da   : > { %v2575_v11 = vpop.f32.mrf.mxu1 }
 0x1dc   : > { %v1242_v14 = vpop.f32.mrf.mxu1 }
 0x1dd   : > { %v1269_v38 = vmul.f32 2.0, %v1242_v14 }
 0x1de   : > { %v2585_v15 = vpop.f32.mrf.mxu1 }
 0x1ea   : > { %648 = vadd.xlane.f32.xlu0 %v647_v58 }
 0x1ee   : > { %654 = vadd.xlane.f32.xlu0 %v653_v59 }
 0x1f2   : > { %657 = vadd.xlane.f32.xlu0 %v656_v60 }
 0x1fb   : > { %651 = vadd.xlane.f32.xlu1 %v650_v61 }
 0x23d   : > { %v1319_v16 = vpop.permute.xlu0 %1318 }
 0x23e   : > { %v1325_v17 = vsel %vm1320_vm5, %v1319_v16, 0 }
 0x23f   : > { %2587 = vmatpush3.bf16.xpose.msra.mxu0 %v1325_v17 }
 0x240   : > { %2598 = vmatprep.subr.bf16.mxu0 %v2797_v40 }
 0x241   : > { %v1368_v20 = vpop.permute.xlu1 %1367 }
 0x242   : > { %v1373_v21 = vsel %vm1320_vm5, %v1368_v20, 0 }
 0x243   : > { %2593 = vmatpush3.bf16.xpose.msra.mxu1 %v1373_v21 }
 0x244   : > { %2604 = vmatprep.subr.bf16.mxu1 %v2797_v40 }
 0x245   : > { %v1416_v22 = vpop.permute.xlu1 %1415 }
 0x246   : > { %v1421_v23 = vsel %vm1320_vm5, %v1416_v22, 0  ;;  %2589 = vmatmul.mubr.msk.bf16.vlgmr.msra.gmra.mxu0 %vm1320_vm5, %v3027_v50 }
 0x247   : > { %2599 = vmatpush3.bf16.xpose.msra.mxu0 %v1421_v23  ;;  %2600 = vmatprep.mubr.msk.bf16.mxu0 %vm2798_vm4, %v2797_v40 }
 0x248   : > { %2610 = vmatprep.subr.bf16.mxu0 %v2797_v40 }
 0x249   : > { %v1464_v24 = vpop.permute.xlu1 %1463 }
 0x24a   : > { %v1469_v25 = vsel %vm1320_vm5, %v1464_v24, 0  ;;  %2595 = vmatmul.mubr.msk.bf16.vlgmr.msra.gmra.mxu1 %vm1320_vm5, %v3030_v54 }
 0x24b   : > { %2605 = vmatpush3.bf16.xpose.msra.mxu1 %v1469_v25  ;;  %2606 = vmatprep.mubr.msk.bf16.mxu1 %vm2798_vm4, %v2797_v40 }
 0x24c   : > { %2616 = vmatprep.subr.bf16.mxu1 %v2797_v40 }
 0x24e   : > { %2601 = vmatmul.mubr.msk.bf16.vlgmr.msra.gmra.mxu0 %vm1320_vm5, %v3033_v55 }
 0x24f   : > { %2612 = vmatprep.mubr.msk.bf16.mxu0 %vm2798_vm4, %v2797_v40 }
 0x252   : > { %2607 = vmatmul.mubr.msk.bf16.vlgmr.msra.gmra.mxu1 %vm1320_vm5, %v3036_v57 }
 0x253   : > { %2618 = vmatprep.mubr.msk.bf16.mxu1 %vm2798_vm4, %v2797_v40 }
 0x273   : > { %v649_v30 = vpop.xlane.xlu0 %648 }
 0x274   : > { %v1262_v32 = vadd.f32 %v1249_v29, %v649_v30 }
 0x276   : > { %v1270_v33 = vsub.f32 %v1262_v32, %v1266_v13 }
 0x277   : > { %v655_v35 = vpop.xlane.xlu0 %654 }
 0x278   : > { %v1264_v37 = vadd.f32 %v1257_v31, %v655_v35  ;;  %v1274_v49 = vmax.f32 %v1270_v33, 0.0 }
 0x27a   : > { %v1272_v39 = vsub.f32 %v1264_v37, %v1268_v34  ;;  %2727 = vrsqrt.f32 %v1274_v49  ;;  %vm1280_vm6 = vcmp.eq.f32.partialorder %v1274_v49, inf  ;;  %v1283_v61 = vand.u32 2147483648, %v1274_v49 }
 0x27b   : > { %v658_v41 = vpop.xlane.xlu0 %657  ;;  %vm1282_vm7 = vcmp.eq.f32.partialorder %v1274_v49, 0.0 }
 0x27c   : > { %v1265_v42 = vadd.f32 %v1261_v36, %v658_v41  ;;  %v1276_v52 = vmax.f32 %v1272_v39, 0.0 }
 0x27e   : > { %v1273_v43 = vsub.f32 %v1265_v42, %v1269_v38  ;;  %vm1294_vm9 = vcmp.eq.f32.partialorder %v1276_v52, inf  ;;  %v1297_v7 = vand.u32 2147483648, %v1276_v52  ;;  %vm1296_vm11 = vcmp.eq.f32.partialorder %v1276_v52, 0.0 }
 0x280   : > { %v1277_v53 = vmax.f32 %v1273_v43, 0.0 }
 0x282   : > { %vm1301_vm12 = vcmp.eq.f32.partialorder %v1277_v53, inf  ;;  %v1304_v27 = vand.u32 2147483648, %v1277_v53  ;;  %vm1303_vm13 = vcmp.eq.f32.partialorder %v1277_v53, 0.0 }
 0x284   : > { %v652_v46 = vpop.xlane.xlu1 %651 }
 0x285   : > { %v1263_v47 = vadd.f32 %v1253_v44, %v652_v46 }
 0x287   : > { %v1271_v48 = vsub.f32 %v1263_v47, %v1267_v45  ;;  %v2728_v56 = vpop.eup %2727 }
 0x288   : > { %v1279_v58 = vmul.f32 %v2728_v56, %v1274_v49 }
 0x289   : > { %v1275_v51 = vmax.f32 %v1271_v48, 0.0 }
 0x28a   : > { %v1281_v62 = vsel %vm1280_vm6, %v1274_v49, %v1279_v58 }
 0x28b   : > { %2729 = vrsqrt.f32 %v1275_v51  ;;  %vm1287_vm8 = vcmp.eq.f32.partialorder %v1275_v51, inf  ;;  %v3067_v1 = vsel %vm1282_vm7, %v1283_v61, %v1281_v62  ;;  %v1290_v3 = vand.u32 2147483648, %v1275_v51 }
 0x28c   : > { %2731 = vrsqrt.f32 %v1276_v52  ;;  %vm1289_vm10 = vcmp.eq.f32.partialorder %v1275_v51, 0.0  ;;  %v1517_v9 = vmul.f32 %v1516_v2, %v3067_v1 }
 0x28d   : > { %2733 = vrsqrt.f32 %v1277_v53 }
 0x298   : > { %v2730_v59 = vpop.eup %2729 }
 0x299   : > { %v2732_v60 = vpop.eup %2731  ;;  %v1286_v63 = vmul.f32 %v2730_v59, %v1275_v51 }
 0x29a   : > { %v1293_v0 = vmul.f32 %v2732_v60, %v1276_v52  ;;  %v2734_v5 = vpop.eup %2733 }
 0x29b   : > { %v1288_v4 = vsel %vm1287_vm8, %v1275_v51, %v1286_v63  ;;  %v1300_v16 = vmul.f32 %v2734_v5, %v1277_v53 }
 0x29c   : > { %v1295_v10 = vsel %vm1294_vm9, %v1276_v52, %v1293_v0  ;;  %v3070_v14 = vsel %vm1289_vm10, %v1290_v3, %v1288_v4 }
 0x29d   : > { %v3072_v21 = vsel %vm1296_vm11, %v1297_v7, %v1295_v10  ;;  %v1518_v24 = vmul.f32 %v1516_v2, %v3070_v14  ;;  %v1302_v13 = vsel %vm1301_vm12, %v1277_v53, %v1300_v16 }
 0x29e   : > { %v1519_v29 = vmul.f32 %v1516_v2, %v3072_v21  ;;  %v3078_v36 = vsel %vm1303_vm13, %v1304_v27, %v1302_v13 }
 0x29f   : > { %v1520_v43 = vmul.f32 %v1516_v2, %v3078_v36 }
 0x306   : > { %v1361_v6 = vpop.f32.mrf.mxu0 }
 0x307   : > { %v1511_v8 = vmul.f32 0.35355338, %v1361_v6 }
 0x308   : > { %v2590_v11 = vpop.f32.mrf.mxu0 }
 0x309   : > { %v1521_v15 = vadd.f32 %v1517_v9, %v1511_v8 }
 0x30a   : > { %v1364_v17 = vpop.f32.mrf.mxu0  ;;  %v1409_v20 = vpop.f32.mrf.mxu1 }
 0x30b   : > { %v1512_v22 = vmul.f32 0.35355338, %v1409_v20  ;;  %v1525_v23 = vsel %vm1320_vm5, %v1521_v15, -inf }
 0x30c   : > { %v2591_v25 = vpop.f32.mrf.mxu0  ;;  %v2596_v26 = vpop.f32.mrf.mxu1  ;;  %1526 = vmax.xlane.f32.xlu0 %v1525_v23 }
 0x30d   : > { %v1522_v28 = vadd.f32 %v1518_v24, %v1512_v22 }
 0x30e   : > { %v1412_v30 = vpop.f32.mrf.mxu1  ;;  %v1457_v31 = vpop.f32.mrf.mxu0 }
 0x30f   : > { %v1513_v32 = vmul.f32 0.35355338, %v1457_v31  ;;  %v1528_v33 = vsel %vm1320_vm5, %v1522_v28, -inf }
 0x310   : > { %v2597_v34 = vpop.f32.mrf.mxu1  ;;  %1529 = vmax.xlane.f32.xlu1 %v1528_v33  ;;  %v2602_v35 = vpop.f32.mrf.mxu0 }
 0x311   : > { %v1523_v37 = vadd.f32 %v1519_v29, %v1513_v32 }
 0x312   : > { %v1460_v38 = vpop.f32.mrf.mxu0  ;;  %v1505_v39 = vpop.f32.mrf.mxu1 }
 0x313   : > { %v1514_v41 = vmul.f32 0.35355338, %v1505_v39  ;;  %v1531_v42 = vsel %vm1320_vm5, %v1523_v37, -inf }
 0x314   : > { %v2603_v44 = vpop.f32.mrf.mxu0  ;;  %v2608_v45 = vpop.f32.mrf.mxu1  ;;  %1532 = vmax.xlane.f32.xlu0 %v1531_v42 }
 0x315   : > { %v1524_v46 = vadd.f32 %v1520_v43, %v1514_v41 }
 0x316   : > { %v1508_v47 = vpop.f32.mrf.mxu1 }
 0x317   : > { %v1534_v48 = vsel %vm1320_vm5, %v1524_v46, -inf }
 0x318   : > { %v2609_v49 = vpop.f32.mrf.mxu1  ;;  %1535 = vmax.xlane.f32.xlu1 %v1534_v48 }
 0x329   : > { %1622 = vrot.lane.b32.xlu1 %v3030_v54, %s2801_s23 }
 0x32d   : > { %1670 = vrot.lane.b32.xlu1 %v3033_v55, %s2801_s23 }
 0x331   : > { %1718 = vrot.lane.b32.xlu1 %v3036_v57, %s2801_s23 }
 0x395   : > { %v1527_v51 = vpop.xlane.xlu0 %1526 }
 0x396   : > { %v1537_v52 = vsub.f32 %v1521_v15, %v1527_v51 }
 0x398   : > { %v1541_v53 = vmul.f32 1.442695, %v1537_v52 }
 0x399   : > { %v1530_v56 = vpop.xlane.xlu1 %1529 }
 0x39a   : > { %2735 = vpow2.f32 %v1541_v53  ;;  %v1538_v58 = vsub.f32 %v1522_v28, %v1530_v56 }
 0x39c   : > { %v1543_v59 = vmul.f32 1.442695, %v1538_v58 }
 0x39d   : > { %v1533_v4 = vpop.xlane.xlu0 %1532 }
 0x39e   : > { %2737 = vpow2.f32 %v1543_v59  ;;  %v1539_v5 = vsub.f32 %v1523_v37, %v1533_v4 }
 0x3a0   : > { %v1545_v6 = vmul.f32 1.442695, %v1539_v5 }
 0x3a1   : > { %v1536_v60 = vpop.xlane.xlu1 %1535 }
 0x3a2   : > { %v1540_v7 = vsub.f32 %v1524_v46, %v1536_v60  ;;  %2739 = vpow2.f32 %v1545_v6 }
 0x3a4   : > { %v1547_v8 = vmul.f32 1.442695, %v1540_v7 }
 0x3a5   : > { %v1623_v61 = vpop.permute.xlu1 %1622 }
 0x3a6   : > { %v1628_v62 = vsel %vm1578_vm14, %v1623_v61, 0  ;;  %2741 = vpow2.f32 %v1547_v8 }
 0x3a7   : > { %v2736_v63 = vpop.eup %2735  ;;  %2617 = vmatpush3.bf16.msra.mxu1 %v1628_v62 }
 0x3a8   : > { %v1549_v0 = vsel %vm1320_vm5, %v2736_v63, 0.0  ;;  %2628 = vmatprep.subr.bf16.mxu1 %v2797_v40 }
 0x3a9   : > { %1550 = vadd.xlane.f32.xlu0 %v1549_v0  ;;  %v1671_v16 = vpop.permute.xlu1 %1670 }
 0x3aa   : > { %v1676_v29 = vsel %vm1578_vm14, %v1671_v16, 0 }
 0x3ab   : > { %v2738_v2 = vpop.eup %2737 }
 0x3ac   : > { %v1552_v3 = vsel %vm1320_vm5, %v2738_v2, 0.0 }
 0x3ad   : > { %1553 = vadd.xlane.f32.xlu1 %v1552_v3  ;;  %v1719_v17 = vpop.permute.xlu1 %1718 }
 0x3ae   : > { %v1724_v31 = vsel %vm1578_vm14, %v1719_v17, 0 }
 0x3af   : > { %v2740_v9 = vpop.eup %2739 }
 0x3b0   : > { %v1555_v10 = vsel %vm1320_vm5, %v2740_v9, 0.0 }
 0x3b3   : > { %v2742_v11 = vpop.eup %2741 }
 0x3b4   : > { %v1558_v15 = vsel %vm1320_vm5, %v2742_v11, 0.0 }
 0x3be   : > { %1822 = vrot.lane.b32.xlu1 %v3030_v54, %s2802_s24 }
 0x3bf   : > { %1573 = vrot.lane.b32.xlu0 %v3027_v50, %s2801_s23 }
 0x3de   : > { %1556 = vadd.xlane.f32.xlu0 %v1555_v10 }
 0x3e2   : > { %1559 = vadd.xlane.f32.xlu1 %v1558_v15 }
 0x3f3   : > { %1820 = vrot.lane.b32.xlu1 %v3030_v54, %s2803_s26 }
 0x3f4   : > { %1772 = vrot.lane.b32.xlu0 %v3027_v50, %s2802_s24 }
 0x3f7   : > { %1922 = vrot.lane.b32.xlu1 %v3036_v57, %s2802_s24 }
 0x3f8   : > { %1770 = vrot.lane.b32.xlu0 %v3027_v50, %s2803_s26 }
 0x3fb   : > { %1920 = vrot.lane.b32.xlu1 %v3036_v57, %s2803_s26 }
 0x3fc   : > { %1872 = vrot.lane.b32.xlu0 %v3033_v55, %s2802_s24 }
 0x400   : > { %1870 = vrot.lane.b32.xlu0 %v3033_v55, %s2803_s26 }
 0x432   : > { %v1551_v20 = vpop.xlane.xlu0 %1550 }
 0x433   : > { %2743 = vrcp.f32 %v1551_v20 }
 0x436   : > { %v1554_v22 = vpop.xlane.xlu1 %1553  ;;  %v1574_v23 = vpop.permute.xlu0 %1573 }
 0x437   : > { %2745 = vrcp.f32 %v1554_v22  ;;  %v1580_v24 = vsel %vm1578_vm14, %v1574_v23, 0 }
 0x438   : > { %2611 = vmatpush3.bf16.msra.mxu0 %v1580_v24 }
 0x439   : > { %2622 = vmatprep.subr.bf16.mxu0 %v2797_v40 }
 0x43a   : > { %v1823_v32 = vpop.permute.xlu1 %1822 }
 0x43b   : > { %v1828_v47 = vsel %vm1320_vm5, %v1823_v32, 0 }
 0x440   : > { %v2744_v25 = vpop.eup %2743 }
 0x441   : > { %v1565_v26 = vmul.f32 %v2744_v25, %v2736_v63 }
 0x443   : > { %v1569_v27 = vpack.c.bf16 %v1565_v26, %v1565_v26 }
 0x444   : > { %v2746_v28 = vpop.eup %2745 }
 0x445   : > { %2613 = vmatmul.mubr.msk.bf16.vlgmr.msra.gmra.mxu0 %vm1320_vm5, %v1569_v27  ;;  %v1566_v13 = vmul.f32 %v2746_v28, %v2738_v2 }
 0x446   : > { %2623 = vmatpush3.bf16.msra.mxu0 %v1676_v29  ;;  %2624 = vmatprep.mubr.msk.bf16.mxu0 %vm2798_vm4, %v2797_v40 }
 0x447   : > { %v1570_v30 = vpack.c.bf16 %v1566_v13, %v1566_v13  ;;  %2634 = vmatprep.subr.bf16.mxu0 %v2797_v40 }
 0x449   : > { %2619 = vmatmul.mubr.msk.bf16.vlgmr.msra.gmra.mxu1 %vm1320_vm5, %v1570_v30 }
 0x44a   : > { %2629 = vmatpush3.bf16.msra.mxu1 %v1724_v31  ;;  %2630 = vmatprep.mubr.msk.bf16.mxu1 %vm2798_vm4, %v2797_v40 }
 0x44b   : > { %2640 = vmatprep.subr.bf16.mxu1 %v2797_v40 }
 0x467   : > { %v1557_v33 = vpop.xlane.xlu0 %1556 }
 0x468   : > { %2747 = vrcp.f32 %v1557_v33 }
 0x46b   : > { %v1560_v34 = vpop.xlane.xlu1 %1559  ;;  %v1773_v35 = vpop.permute.xlu0 %1772 }
 0x46c   : > { %2749 = vrcp.f32 %v1560_v34  ;;  %v1778_v43 = vsel %vm1320_vm5, %v1773_v35, 0 }
 0x46f   : > { %v1771_v42 = vpop.permute.xlu0 %1770  ;;  %v1821_v46 = vpop.permute.xlu1 %1820 }
 0x473   : > { %v1873_v48 = vpop.permute.xlu0 %1872  ;;  %v1923_v51 = vpop.permute.xlu1 %1922 }
 0x474   : > { %v1878_v49 = vsel %vm1320_vm5, %v1873_v48, 0  ;;  %v1928_v52 = vsel %vm1320_vm5, %v1923_v51, 0 }
 0x475   : > { %v2748_v37 = vpop.eup %2747 }
 0x476   : > { %v1567_v38 = vmul.f32 %v2748_v37, %v2740_v9  ;;  %v1975_v9 = vstv %s2462_s27 }
 0x477   : > { %v1871_v53 = vpop.permute.xlu0 %1870  ;;  %v1921_v56 = vpop.permute.xlu1 %1920  ;;  %v1976_v16 = vmul.f32 %v1975_v9, %v3067_v1  ;;  %v1977_v27 = vmul.f32 %v1975_v9, %v3070_v14  ;;  %v1978_v1 = vmul.f32 %v1975_v9, %v3072_v21 }
 0x478   : > { %v1571_v39 = vpack.c.bf16 %v1567_v38, %v1567_v38 }
 0x479   : > { %v2750_v41 = vpop.eup %2749 }
 0x47a   : > { %2625 = vmatmul.mubr.msk.bf16.vlgmr.msra.gmra.mxu0 %vm1320_vm5, %v1571_v39  ;;  %v1568_v44 = vmul.f32 %v2750_v41, %v2742_v11 }
 0x47b   : > { %2635 = vmatpush3.bf16.xpose.msra.mxu0 %v1778_v43  ;;  %2636 = vmatprep.mubr.msk.bf16.mxu0 %vm2798_vm4, %v2797_v40 }
 0x47c   : > { %v1572_v45 = vpack.c.bf16 %v1568_v44, %v1568_v44  ;;  %2646 = vmatprep.subr.bf16.mxu0 %v2797_v40 }
 0x47e   : > { %2631 = vmatmul.mubr.msk.bf16.vlgmr.msra.gmra.mxu1 %vm1320_vm5, %v1572_v45 }
 0x47f   : > { %2641 = vmatpush3.bf16.xpose.msra.mxu1 %v1828_v47  ;;  %2642 = vmatprep.mubr.msk.bf16.mxu1 %vm2798_vm4, %v2797_v40 }
 0x480   : > { %2652 = vmatprep.subr.bf16.mxu1 %v2797_v40 }
 0x482   : > { %2637 = vmatmul.mubr.msk.bf16.vlgmr.msra.gmra.mxu0 %vm1320_vm5, %v1771_v42  ;;  %v1979_v42 = vmul.f32 %v1975_v9, %v3078_v36 }
 0x483   : > { %2647 = vmatpush3.bf16.xpose.msra.mxu0 %v1878_v49  ;;  %2648 = vmatprep.mubr.msk.bf16.mxu0 %vm2798_vm4, %v2797_v40 }
 0x484   : > { %2658 = vmatprep.subr.bf16.mxu0 %v2797_v40 }
 0x486   : > { %2643 = vmatmul.mubr.msk.bf16.vlgmr.msra.gmra.mxu1 %vm1320_vm5, %v1821_v46 }
 0x487   : > { %2653 = vmatpush3.bf16.xpose.msra.mxu1 %v1928_v52  ;;  %2654 = vmatprep.mubr.msk.bf16.mxu1 %vm2798_vm4, %v2797_v40 }
 0x488   : > { %2664 = vmatprep.subr.bf16.mxu1 %v2797_v40 }
 0x48a   : > { %2649 = vmatmul.mubr.msk.bf16.vlgmr.msra.gmra.mxu0 %vm1320_vm5, %v1871_v53 }
 0x48b   : > { %2660 = vmatprep.mubr.msk.bf16.mxu0 %vm2798_vm4, %v2797_v40 }
 0x48e   : > { %2655 = vmatmul.mubr.msk.bf16.vlgmr.msra.gmra.mxu1 %vm1320_vm5, %v1921_v56 }
 0x48f   : > { %2666 = vmatprep.mubr.msk.bf16.mxu1 %vm2798_vm4, %v2797_v40 }
 0x505   : > { %v1616_v58 = vpop.f32.mrf.mxu0 }
 0x506   : > { %1766 = vst.msk [vmem:[#allocation2] sm:$0xff] %vm1320_vm5, %v1616_v58 }
 0x507   : > { %v2614_v59 = vpop.f32.mrf.mxu0 }
 0x509   : > { %v1619_v60 = vpop.f32.mrf.mxu0  ;;  %v1664_v61 = vpop.f32.mrf.mxu1 }
 0x50a   : > { %1767 = vst.msk [vmem:[#allocation2 + $0x8] sm:$0xff] %vm1320_vm5, %v1664_v61 }
 0x50b   : > { %v2615_v62 = vpop.f32.mrf.mxu0  ;;  %v2620_v63 = vpop.f32.mrf.mxu1 }
 0x50d   : > { %v1667_v0 = vpop.f32.mrf.mxu1 }
 0x50f   : > { %v2621_v2 = vpop.f32.mrf.mxu1 }
 0x53a   : > { %v1712_v3 = vpop.f32.mrf.mxu0 }
 0x53b   : > { %1768 = vst.msk [vmem:[#allocation2 + $0x10] sm:$0xff] %vm1320_vm5, %v1712_v3 }
 0x53c   : > { %v2626_v4 = vpop.f32.mrf.mxu0 }
 0x53e   : > { %v1715_v5 = vpop.f32.mrf.mxu0  ;;  %v1760_v6 = vpop.f32.mrf.mxu1 }
 0x53f   : > { %1769 = vst.msk [vmem:[#allocation2 + $0x18] sm:$0xff] %vm1320_vm5, %v1760_v6 }
 0x540   : > { %v2627_v7 = vpop.f32.mrf.mxu0  ;;  %v2632_v8 = vpop.f32.mrf.mxu1 }
 0x542   : > { %v1763_v10 = vpop.f32.mrf.mxu1  ;;  %v1814_v11 = vpop.f32.mrf.mxu0 }
 0x543   : > { %v1970_v15 = vmul.f32 0.35355338, %v1814_v11 }
 0x544   : > { %v2633_v17 = vpop.f32.mrf.mxu1  ;;  %v2638_v20 = vpop.f32.mrf.mxu0 }
 0x545   : > { %v1980_v22 = vadd.f32 %v1976_v16, %v1970_v15 }
 0x546   : > { %v1817_v23 = vpop.f32.mrf.mxu0  ;;  %v1864_v24 = vpop.f32.mrf.mxu1 }
 0x547   : > { %v1971_v25 = vmul.f32 0.35355338, %v1864_v24  ;;  %v1984_v26 = vsel %vm1320_vm5, %v1980_v22, -inf }
 0x548   : > { %v2644_v28 = vpop.f32.mrf.mxu1  ;;  %1985 = vmax.xlane.f32.xlu0 %v1984_v26  ;;  %v2639_v29 = vpop.f32.mrf.mxu0 }
 0x549   : > { %v1981_v13 = vadd.f32 %v1977_v27, %v1971_v25 }
 0x54a   : > { %v1867_v30 = vpop.f32.mrf.mxu1  ;;  %v1914_v31 = vpop.f32.mrf.mxu0 }
 0x54b   : > { %v1972_v32 = vmul.f32 0.35355338, %v1914_v31  ;;  %v1987_v33 = vsel %vm1320_vm5, %v1981_v13, -inf }
 0x54c   : > { %1988 = vmax.xlane.f32.xlu1 %v1987_v33  ;;  %v2645_v34 = vpop.f32.mrf.mxu1  ;;  %v2650_v35 = vpop.f32.mrf.mxu0 }
 0x54d   : > { %v1982_v37 = vadd.f32 %v1978_v1, %v1972_v32 }
 0x54e   : > { %v1917_v38 = vpop.f32.mrf.mxu0  ;;  %v1964_v39 = vpop.f32.mrf.mxu1 }
 0x54f   : > { %v1973_v41 = vmul.f32 0.35355338, %v1964_v39  ;;  %v1990_v14 = vsel %vm1320_vm5, %v1982_v37, -inf }
 0x550   : > { %v2656_v43 = vpop.f32.mrf.mxu1  ;;  %1991 = vmax.xlane.f32.xlu0 %v1990_v14  ;;  %v2651_v44 = vpop.f32.mrf.mxu0 }
 0x551   : > { %v1983_v45 = vadd.f32 %v1979_v42, %v1973_v41  ;;  %v2718_v44 = vld [vmem:[%s3203_s7] sm:$0xff]  }
 0x552   : > { %v1967_v46 = vpop.f32.mrf.mxu1 }
 0x553   : > { %v1993_v47 = vsel %vm1320_vm5, %v1983_v45, -inf }
 0x554   : > { %v2657_v48 = vpop.f32.mrf.mxu1  ;;  %1994 = vmax.xlane.f32.xlu0 %v1993_v47 }
 0x5d1   : > { %v1986_v21 = vpop.xlane.xlu0 %1985 }
 0x5d2   : > { %v1996_v49 = vsub.f32 %v1980_v22, %v1986_v21 }
 0x5d4   : > { %v2000_v51 = vmul.f32 1.442695, %v1996_v49 }
 0x5d5   : > { %v1989_v52 = vpop.xlane.xlu1 %1988 }
 0x5d6   : > { %2751 = vpow2.f32 %v2000_v51  ;;  %v1997_v53 = vsub.f32 %v1981_v13, %v1989_v52 }
 0x5d8   : > { %v2002_v56 = vmul.f32 1.442695, %v1997_v53 }
 0x5d9   : > { %v1992_v58 = vpop.xlane.xlu0 %1991 }
 0x5da   : > { %2753 = vpow2.f32 %v2002_v56  ;;  %v1998_v59 = vsub.f32 %v1982_v37, %v1992_v58 }
 0x5dc   : > { %v2004_v36 = vmul.f32 1.442695, %v1998_v59 }
 0x5dd   : > { %v1995_v3 = vpop.xlane.xlu0 %1994 }
 0x5de   : > { %2755 = vpow2.f32 %v2004_v36  ;;  %v1999_v4 = vsub.f32 %v1983_v45, %v1995_v3  ;;  %v2767_v3 = vld [vmem:[%s2903_s11] sm:$0xff] }
 0x5e0   : > { %v2006_v5 = vmul.f32 1.442695, %v1999_v4 }
 0x5e2   : > { %2757 = vpow2.f32 %v2006_v5 }
 0x5e3   : > { %v2752_v60 = vpop.eup %2751 }
 0x5e4   : > { %v2008_v61 = vsel %vm1320_vm5, %v2752_v60, 0.0 }
 0x5e5   : > { %2009 = vadd.xlane.f32.xlu0 %v2008_v61 }
 0x5e7   : > { %v2754_v62 = vpop.eup %2753 }
 0x5e8   : > { %v2011_v63 = vsel %vm1320_vm5, %v2754_v62, 0.0 }
 0x5e9   : > { %2012 = vadd.xlane.f32.xlu1 %v2011_v63 }
 0x5eb   : > { %v2756_v0 = vpop.eup %2755 }
 0x5ec   : > { %v2014_v2 = vsel %vm1320_vm5, %v2756_v0, 0.0 }
 0x5ed   : > { %2015 = vadd.xlane.f32.xlu0 %v2014_v2 }
 0x5ef   : > { %v2758_v6 = vpop.eup %2757 }
 0x5f0   : > { %v2017_v7 = vsel %vm1320_vm5, %v2758_v6, 0.0 }
 0x5fa   : > { %2080 = vrot.lane.b32.xlu1 %v3030_v54, %s2804_s28 }
 0x5fe   : > { %2128 = vrot.lane.b32.xlu1 %v3033_v55, %s2804_s28 }
 0x603   : > { %2032 = vrot.lane.b32.xlu0 %v3027_v50, %s2804_s28 }
 0x622   : > { %2018 = vadd.xlane.f32.xlu1 %v2017_v7 }
 0x633   : > { %2176 = vrot.lane.b32.xlu1 %v3036_v57, %s2804_s28 }
 0x66e   : > { %v2010_v8 = vpop.xlane.xlu0 %2009 }
 0x66f   : > { %2759 = vrcp.f32 %v2010_v8 }
 0x672   : > { %v2013_v9 = vpop.xlane.xlu1 %2012 }
 0x673   : > { %2761 = vrcp.f32 %v2013_v9 }
 0x676   : > { %v2081_v10 = vpop.permute.xlu1 %2080  ;;  %v2016_v54 = vpop.xlane.xlu0 %2015 }
 0x677   : > { %v2086_v55 = vsel %vm1578_vm14, %v2081_v10, 0  ;;  %2763 = vrcp.f32 %v2016_v54 }
 0x678   : > { %2665 = vmatpush3.bf16.msra.mxu1 %v2086_v55 }
 0x679   : > { %2676 = vmatprep.subr.bf16.mxu1 %v2797_v40 }
 0x67a   : > { %v2033_v50 = vpop.permute.xlu0 %2032  ;;  %v2129_v16 = vpop.permute.xlu1 %2128 }
 0x67b   : > { %v2038_v11 = vsel %vm1578_vm14, %v2033_v50, 0  ;;  %v2134_v22 = vsel %vm1578_vm14, %v2129_v16, 0 }
 0x67c   : > { %v2760_v15 = vpop.eup %2759  ;;  %2659 = vmatpush3.bf16.msra.mxu0 %v2038_v11 }
 0x67d   : > { %2670 = vmatprep.subr.bf16.mxu0 %v2797_v40  ;;  %v2024_v57 = vmul.f32 %v2760_v15, %v2752_v60 }
 0x67f   : > { %v2028_v17 = vpack.c.bf16 %v2024_v57, %v2024_v57 }
 0x680   : > { %v2762_v20 = vpop.eup %2761 }
 0x681   : > { %2661 = vmatmul.mubr.msk.bf16.vlgmr.msra.gmra.mxu0 %vm1320_vm5, %v2028_v17  ;;  %v2025_v23 = vmul.f32 %v2762_v20, %v2754_v62  ;;  %v2467_v62 = vld [vmem:[%s3204_s8] ss:$0 sm:$0xff] }
 0x682   : > { %2671 = vmatpush3.bf16.msra.mxu0 %v2134_v22  ;;  %2672 = vmatprep.mubr.msk.bf16.mxu0 %vm2798_vm4, %v2797_v40 }
 0x683   : > { %v2029_v24 = vpack.c.bf16 %v2025_v23, %v2025_v23  ;;  %2682 = vmatprep.subr.bf16.mxu0 %v2718_v44 }
 0x684   : > { %v2764_v25 = vpop.eup %2763 }
 0x685   : > { %2667 = vmatmul.mubr.msk.bf16.vlgmr.msra.gmra.mxu1 %vm1320_vm5, %v2029_v24  ;;  %v2026_v26 = vmul.f32 %v2764_v25, %v2756_v0 }
 0x686   : > { %2678 = vmatprep.mubr.msk.bf16.mxu1 %vm2798_vm4, %v2797_v40 }
 0x687   : > { %v2030_v27 = vpack.c.bf16 %v2026_v26, %v2026_v26 }
 0x689   : > { %2673 = vmatmul.mubr.msk.bf16.vlgmr.msra.gmra.mxu0 %vm1320_vm5, %v2030_v27 }
 0x68a   : > { %2683 = vmatpush3.bf16.msra.mxu0 %v2718_v44 }
 0x6ab   : > { %v2019_v28 = vpop.xlane.xlu1 %2018 }
 0x6ac   : > { %2765 = vrcp.f32 %v2019_v28 }
 0x6af   : > { %v2177_v29 = vpop.permute.xlu1 %2176 }
 0x6b0   : > { %v2182_v13 = vsel %vm1578_vm14, %v2177_v29, 0 }
 0x6b1   : > { %2677 = vmatpush3.bf16.msra.mxu1 %v2182_v13 }
 0x6b9   : > { %v2766_v30 = vpop.eup %2765 }
 0x6ba   : > { %v2027_v31 = vmul.f32 %v2766_v30, %v2758_v6 }
 0x6bc   : > { %v2031_v32 = vpack.c.bf16 %v2027_v31, %v2027_v31 }
 0x6be   : > { %2679 = vmatmul.mubr.msk.bf16.vlgmr.msra.gmra.mxu1 %vm1320_vm5, %v2031_v32 }
 0x741   : > { %v2074_v33 = vpop.f32.mrf.mxu0 }
 0x742   : > { %2228 = vrot.lane.b32.xlu0 %v2074_v33, %s2805_s29 }
 0x743   : > { %v2662_v1 = vpop.f32.mrf.mxu0 }
 0x745   : > { %v2077_v34 = vpop.f32.mrf.mxu0  ;;  %v2122_v40 = vpop.f32.mrf.mxu1 }
 0x746   : > { %2230 = vrot.lane.b32.xlu1 %v2122_v40, %s2805_s29 }
 0x747   : > { %v2663_v35 = vpop.f32.mrf.mxu0  ;;  %v2668_v37 = vpop.f32.mrf.mxu1 }
 0x749   : > { %v2125_v38 = vpop.f32.mrf.mxu1  ;;  %v2170_v39 = vpop.f32.mrf.mxu0 }
 0x74a   : > { %2232 = vrot.lane.b32.xlu0 %v2170_v39, %s2805_s29 }
 0x74b   : > { %v2669_v41 = vpop.f32.mrf.mxu1  ;;  %v2674_v14 = vpop.f32.mrf.mxu0 }
 0x74d   : > { %v2173_v42 = vpop.f32.mrf.mxu0 }
 0x74f   : > { %v2675_v43 = vpop.f32.mrf.mxu0 }
 0x77e   : > { %v2218_v45 = vpop.f32.mrf.mxu1 }
 0x77f   : > { %2234 = vrot.lane.b32.xlu1 %v2218_v45, %s2805_s29 }
 0x780   : > { %v2680_v46 = vpop.f32.mrf.mxu1 }
 0x782   : > { %v2221_v47 = vpop.f32.mrf.mxu1 }
 0x784   : > { %v2681_v48 = vpop.f32.mrf.mxu1 }
 0x7b4   : > { %v2229_v21 = vpop.permute.xlu0 %2228 }
 0x7b5   : > { %2241 = vst.msk [vmem:[#allocation2] sm:$0xff] %vm2240_vm15, %v2229_v21 }
 0x7b8   : > { %v2231_v49 = vpop.permute.xlu1 %2230 }
 0x7b9   : > { %2242 = vst.msk [vmem:[#allocation2 + $0x8] sm:$0xff] %vm2240_vm15, %v2231_v49 }
 0x7bc   : > { %v2233_v51 = vpop.permute.xlu0 %2232  ;;  %v2245_v52 = vld [vmem:[#allocation2] sm:$0xff] }
 0x7bd   : > { %2243 = vst.msk [vmem:[#allocation2 + $0x10] sm:$0xff] %vm2240_vm15, %v2233_v51 }
 0x7c0   : > { %v2246_v53 = vld [vmem:[#allocation2 + $0x8] sm:$0xff] }
 0x7c1   : > { %v2249_v56 = vpack.c.bf16 %v2246_v53, %v2245_v52 }
 0x7c3   : > { %2684 = vmatprep.mubr.msk.bf16.mxu0 %vm412_vm3, %v2249_v56 }
 0x7c4   : > { %v2247_v59 = vld [vmem:[#allocation2 + $0x10] sm:$0xff] }
 0x7f1   : > { %v2235_v58 = vpop.permute.xlu1 %2234 }
 0x7f2   : > { %2244 = vst.msk [vmem:[#allocation2 + $0x18] sm:$0xff] %vm2240_vm15, %v2235_v58 }
 0x7f9   : > { %v2248_v36 = vld [vmem:[#allocation2 + $0x18] sm:$0xff] }
 0x7fa   : > { %v2250_v60 = vpack.c.bf16 %v2248_v36, %v2247_v59 }
 0x7fc   : > { %2685 = vmatmul.mubr.msk.bf16.vlgmr.msra.gmra.mxu0 %vm412_vm3, %v2250_v60 }
 0x8bc   : > { %v2686_v61 = vpop.f32.mrf.mxu0 }
 0x8bd   : > { %v2315_v5 = vadd.f32 %v2686_v61, %v2467_v62 }
 0x8be   : > { %v2306_v63 = vpop.f32.mrf.mxu0 }
 0x8bf   : > { %v2307_v0 = vadd.f32 %v2467_v62, %v2306_v63  ;;  %v2323_v10 = vadd.f32 %v2315_v5, %v2909_v12 }
 0x8c0   : > { %v2687_v2 = vpop.f32.mrf.mxu0 }
 0x8c1   : > { %v2321_v4 = vadd.f32 %v2767_v3, %v2307_v0  ;;  %v2318_v7 = vadd.f32 %v2687_v2, %v2467_v62  ;;  %2327 = vst.msk [vmem:[%s397_s18 + $0x10] sm:$0xff] %vm412_vm3, %v2323_v10 }
 0x8c2   : > { %v2309_v6 = vpop.f32.mrf.mxu0 }
 0x8c3   : > { %2325 = vst.msk [vmem:[%s397_s18] sm:$0xff] %vm412_vm3, %v2321_v4  ;;  %v2310_v8 = vadd.f32 %v2467_v62, %v2309_v6  ;;  %v2324_v54 = vadd.f32 %v2318_v7, %v2916_v18 }
 0x8c5   : > { %v2322_v9 = vadd.f32 %v2310_v8, %v2919_v19  ;;  %2328 = vst.msk [vmem:[%s397_s18 + $0x18] sm:$0xff] %vm412_vm3, %v2324_v54 }
 0x8c7   : > { %2326 = vst.msk [vmem:[%s397_s18 + $0x8] sm:$0xff] %vm412_vm3, %v2322_v9 }
 0x8c8 PF: > { %s21_s13 = sadd.s32 1, %s2793_s13  }
 0x8c9   : > { %p18_p1 = scmp.ge.s32.totalorder %s21_s13, 4  }
 0x8cb   :  { %20 = sbr.rel (!%p18_p1) target bundleno = 1 (0x1), region = 98 }
 0x8d0   :  { %2351 = vsyncpa [#allocation4], 1 }
 0x8d1   :  { %2353 = vsyncpa [#allocation4 + $0x1], 1 }

// kernel: _lambda_.20
= control target key start
LH: loop header
LB: loop body
LE: loop exit
PB: predicated region body
PF: predicated region fallthrough
CT: control target
= control target key end

     0   :  { %s404_s12 = smov 0   ;;  %s439_s0 = inlined_call_operand.vmem [shape: f32[32,38], index: 0, kind: input, shape index: {}]   ;;  %s440_s1 = inlined_call_operand.vmem [shape: f32[38,32], index: 1, kind: input, shape index: {}]   ;;  %s441_s2 = inlined_call_operand.vmem [shape: f32[1,32], index: 2, kind: input, shape index: {}]   ;;  %s442_s3 = inlined_call_operand.vmem [shape: f32[32,32], index: 3, kind: output, shape index: {}]  }
   0x1 LB: > { %s333_s13 = sadd.s32 4294967295, %s382_s12   ;;  %p337_p0 = scmp.ge.s32.totalorder %s382_s12, 1  ;;  %s382_s12 = sphi %s404_s12, %s13_s12  }
   0x2   : > { %p138_p1 = scmp.lt.s32.totalorder %s382_s12, 3 }
   0x4   : > { %p139_p2 = pnand %p337_p0, %p138_p1 }
   0x5   : > { %s338_s18 = sshll.u32 (!%p139_p2), %s333_s13, 1 }
   0x6   : > { %142 = sbr.rel (%p139_p2) target bundleno = 220 (0xdc), region = 32  ;;  %p163_p3 = scmp.lt.s32.totalorder (!%p139_p2), %s338_s18, 3 }
   0xb   : > { %v180_v0 = vld [vmem:[%s440_s1 + $0x20] sm:$0x3f]  ;;  %vm195_vm0 = vcmask 1045504   ;;  %v179_v1 = vld [vmem:[%s440_s1 + $0x18] sm:$0xff]  ;;  %v178_v2 = vld [vmem:[%s440_s1 + $0x10] sm:$0xff]  ;;  %s444_s18 = smov (!%p163_p3, %s338_s18), 3 }
   0xc   : > { %355 = vmatprep.subr.msk.mxu0 %vm195_vm0, %v180_v0  ;;  %v177_v3 = vld [vmem:[%s440_s1 + $0x8] sm:$0xff]  ;;  %s339_s23 = sshll.u32 %s444_s18, 3  ;;  %vm188_vm1 = vcmask 310272   ;;  %v176_v4 = vld [vmem:[%s440_s1] sm:$0xff]  ;;  %vm274_vm2 = vcmask 261120  }
   0xd   : > { %356 = vmatpush3.msk.msra.mxu0 %vm195_vm0, %v180_v0  ;;  %s166_s28 = scalar_lea.vmem %s439_s0, %s339_s23  ;;  %v342_v8 = vld [vmem:[%s441_s2] ss:$0 sm:$0xff]  ;;  %s172_s6 = scalar_lea.vmem %s442_s3, %s339_s23 }
   0xe   : > { %357 = vmatprep.subr.mxu0 %v179_v1  ;;  %v174_v5 = vld [vmem:[%s166_s28] sm:$0xff]  ;;  %v175_v6 = vld [vmem:[%s166_s28 + $0x8] sm:$0xff] }
   0xf   : > { %358 = vmatpush3.msra.mxu0 %v179_v1  ;;  %365 = vmatprep.mubr.msk.f32.mxu0 %vm188_vm1, %v174_v5 }
  0x10   : > { %359 = vmatprep.subr.mxu0 %v178_v2 }
  0x11   : > { %360 = vmatpush3.msra.mxu0 %v178_v2 }
  0x12   : > { %361 = vmatprep.subr.mxu0 %v177_v3 }
  0x13   : > { %362 = vmatpush3.msra.mxu0 %v177_v3 }
  0x14   : > { %363 = vmatprep.subr.mxu0 %v176_v4 }
  0x15   : > { %364 = vmatpush3.msra.mxu0 %v176_v4 }
  0x16   : > { %366 = vmatmul.mubr.msk.f32.vlgmr.msra.gmra.mxu0 %vm188_vm1, %v175_v6 }
  0xd6   : > { %v367_v7 = vpop.f32.mrf.mxu0 }
  0xd7   : > { %v271_v11 = vadd.f32 %v367_v7, %v342_v8 }
  0xd8   : > { %v265_v9 = vpop.f32.mrf.mxu0 }
  0xd9   : > { %v266_v10 = vadd.f32 %v342_v8, %v265_v9  ;;  %276 = vst.msk [vmem:[%s172_s6 + $0x8] sm:$0xff] %vm274_vm2, %v271_v11 }
  0xdb   : > { %275 = vst.msk [vmem:[%s172_s6] sm:$0xff] %vm274_vm2, %v266_v10 }
  0xdc PF: > { %s13_s12 = sadd.s32 1, %s382_s12  }
  0xdd   : > { %p10_p4 = scmp.ge.s32.totalorder %s13_s12, 4  }
  0xdf   :  { %12 = sbr.rel (!%p10_p4) target bundleno = 1 (0x1), region = 62 }

// kernel: _lambda_.19
= control target key start
LH: loop header
LB: loop body
LE: loop exit
PB: predicated region body
PF: predicated region fallthrough
CT: control target
= control target key end

     0   :  { %s1057_s27 = smov 0   ;;  %s1059_s28 = smov 0   ;;  %s1168_s0 = inlined_call_operand.vmem [shape: f32[32,32], index: 0, kind: input, shape index: {}, may-alias: {0,8}]   ;;  %s1169_s1 = inlined_call_operand.vmem [shape: f32[1,32], index: 1, kind: input, shape index: {}]   ;;  %s1170_s2 = inlined_call_operand.vmem [shape: bf16[32,128], index: 2, kind: input, shape index: {}]   ;;  %s1171_s3 = inlined_call_operand.vmem [shape: f32[1,128], index: 3, kind: input, shape index: {}]   ;;  %s1172_s4 = inlined_call_operand.vmem [shape: bf16[32,128], index: 4, kind: input, shape index: {}]   ;;  %s1173_s5 = inlined_call_operand.vmem [shape: f32[1,128], index: 5, kind: input, shape index: {}]   ;;  %s1174_s6 = inlined_call_operand.vmem [shape: bf16[128,32], index: 6, kind: input, shape index: {}]   ;;  %s1175_s7 = inlined_call_operand.vmem [shape: f32[1,32], index: 7, kind: input, shape index: {}]   ;;  %s1176_s8 = inlined_call_operand.vmem [shape: f32[32,32], index: 8, kind: output, shape index: {}, may-alias: {0,8}]  }
   0x1   :  { %s1061_s29 = smov 0  }
   0x2 LB: > { %s30_s30 = sadd.s32 1, %s1004_s28  ;;  %p860_p0 = scmp.ge.s32.totalorder %s1008_s29, 1  ;;  %s1008_s29 = sphi %s1061_s29, %s18_s29   ;;  %s1004_s28 = sphi %s1059_s28, %s1178_s28   ;;  %s1000_s27 = sphi %s1057_s27, %s1177_s27  }
   0x3   : > { %p32_p1 = scmp.ge.s32.totalorder %s30_s30, 2  ;;  %p320_p2 = scmp.lt.s32.totalorder %s1008_s29, 3 }
   0x5   : > { %s1180_s30 = smov (%p32_p1, %s30_s30), 0  ;;  %p321_p3 = pnand %p860_p0, %p320_p2 }
   0x6   : > { %s861_s9 = sshll.u32 (!%p321_p3), %s1000_s27, 1 }
   0x7   : > { %324 = sbr.rel (%p321_p3) target bundleno = 632 (0x278), region = 52  ;;  %p374_p4 = scmp.lt.s32.totalorder (!%p321_p3), %s861_s9, 3 }
   0xc   : > { %s1182_s9 = smov (!%p374_p4, %s861_s9), 3  ;;  %v1080_v0 = vld [vmem:[%s1175_s7] ss:$0 sm:$0xff]  ;;  %vm410_vm0 = vcmask 261120   ;;  %v962_v8 = vld [vmem:[%s1170_s2 + $0x8] sm:$0xff]   ;;  %v1010_v9 = vmov 0.0  }
   0xd   : > { %s862_s12 = sshll.u32 %s1182_s9, 3  ;;  %900 = vmatprep.subr.bf16.mxu1 %v1010_v9  ;;  %vm1011_vm1 = vmmov 0   ;;  %v963_v10 = vld [vmem:[%s1170_s2] sm:$0xff]   ;;  %916 = vmatprep.subr.bf16.mxu0 %v1010_v9  ;;  %v964_v24 = vld [vmem:[%s1172_s4 + $0x8] sm:$0xff]   ;;  %v966_v27 = vld [vmem:[%s1174_s6 + $0x38] sm:$0xff]  }
   0xe   : > { %s377_s15 = scalar_lea.vmem %s1168_s0, %s862_s12  ;;  %904 = vmatprep.mubr.msk.bf16.mxu1 %vm1011_vm1, %v1010_v9  ;;  %901 = vmatpush3.bf16.msra.mxu1 %v962_v8  ;;  %v865_v20 = vld [vmem:[%s1169_s1] ss:$0 sm:$0xff]  ;;  %v967_v28 = vld [vmem:[%s1174_s6 + $0x30] sm:$0xff]   ;;  %v968_v29 = vld [vmem:[%s1174_s6 + $0x28] sm:$0xff]   ;;  %s403_s14 = scalar_lea.vmem %s1176_s8, %s862_s12 }
   0xf   : > { %v406_v1 = vld [vmem:[%s377_s15] sm:$0xff]  ;;  %v1088_v2 = vld [vmem:[%s377_s15 + $0x8] sm:$0xff]  ;;  %902 = vmatprep.subr.bf16.mxu1 %v1010_v9  ;;  %932 = vmatprep.mubr.msk.bf16.mxu0 %vm1011_vm1, %v1010_v9  ;;  %v970_v31 = vld [vmem:[%s1174_s6 + $0x18] sm:$0xff]  }
  0x10   : > { %v408_v3 = vmul.f32 %v406_v1, %v406_v1  ;;  %v700_v4 = vadd.f32 %v1080_v0, %v406_v1  ;;  %v409_v5 = vmul.f32 %v1088_v2, %v1088_v2  ;;  %v965_v26 = vld [vmem:[%s1172_s4] sm:$0xff]   ;;  %917 = vmatpush3.bf16.msra.mxu0 %v966_v27  ;;  %v971_v32 = vld [vmem:[%s1174_s6 + $0x10] sm:$0xff]   ;;  %v972_v33 = vld [vmem:[%s1174_s6 + $0x8] sm:$0xff]  }
  0x11   : > { %918 = vmatprep.subr.bf16.mxu0 %v1010_v9  ;;  %v969_v30 = vld [vmem:[%s1174_s6 + $0x20] sm:$0xff]  }
  0x12   : > { %v411_v6 = vsel %vm410_vm0, %v408_v3, 0.0  ;;  %702 = vst.msk [vmem:[#allocation2] sm:$0xff] %vm410_vm0, %v700_v4  ;;  %v414_v7 = vsel %vm410_vm0, %v409_v5, 0.0  ;;  %903 = vmatpush3.bf16.msra.mxu1 %v963_v10  ;;  %v973_v34 = vld [vmem:[%s1174_s6] sm:$0xff]  }
  0x13   : > { %412 = vadd.xlane.f32.xlu0 %v411_v6  ;;  %908 = vmatprep.subr.bf16.mxu1 %v1010_v9  ;;  %v866_v35 = vld [vmem:[%s1171_s3] ss:$0 sm:$0xff] }
  0x14   : > { %919 = vmatpush3.bf16.msra.mxu0 %v967_v28  ;;  %v870_v55 = vld [vmem:[%s1173_s5] ss:$0 sm:$0xff] }
  0x15   : > { %920 = vmatprep.subr.bf16.mxu0 %v1010_v9 }
  0x17   : > { %415 = vadd.xlane.f32.xlu0 %v414_v7 }
  0x18   : > { %921 = vmatpush3.bf16.msra.mxu0 %v968_v29 }
  0x19   : > { %922 = vmatprep.subr.bf16.mxu0 %v1010_v9  ;;  %v704_v3 = vld [vmem:[#allocation2] sm:$0xff] }
  0x1c   : > { %923 = vmatpush3.bf16.msra.mxu0 %v969_v30 }
  0x1d   : > { %924 = vmatprep.subr.bf16.mxu0 %v1010_v9 }
  0x20   : > { %925 = vmatpush3.bf16.msra.mxu0 %v970_v31 }
  0x21   : > { %926 = vmatprep.subr.bf16.mxu0 %v1010_v9 }
  0x24   : > { %927 = vmatpush3.bf16.msra.mxu0 %v971_v32 }
  0x25   : > { %928 = vmatprep.subr.bf16.mxu0 %v1010_v9 }
  0x28   : > { %929 = vmatpush3.bf16.msra.mxu0 %v972_v33 }
  0x29   : > { %930 = vmatprep.subr.bf16.mxu0 %v1010_v9 }
  0x2c   : > { %931 = vmatpush3.bf16.msra.mxu0 %v973_v34 }
  0x9c   : > { %v413_v11 = vpop.xlane.xlu0 %412 }
  0x9d   : > { %v418_v12 = vmul.f32 0.03125, %v413_v11 }
  0x9f   : > { %v420_v13 = vadd.f32 1.1920929e-07, %v418_v12 }
  0xa0   : > { %v416_v14 = vpop.xlane.xlu0 %415 }
  0xa1   : > { %974 = vrsqrt.f32 %v420_v13  ;;  %v419_v15 = vmul.f32 0.03125, %v416_v14 }
  0xa3   : > { %v421_v16 = vadd.f32 1.1920929e-07, %v419_v15 }
  0xa5   : > { %976 = vrsqrt.f32 %v421_v16 }
  0xae   : > { %v975_v17 = vpop.eup %974 }
  0xaf   : > { %v424_v18 = vmul.f32 %v975_v17, %v406_v1  ;;  %v701_v1 = vadd.f32 %v1080_v0, %v1088_v2 }
  0xb1   : > { %v433_v22 = vmul.f32 %v865_v20, %v424_v18  ;;  %703 = vst.msk [vmem:[#allocation2 + $0x8] sm:$0xff] %vm410_vm0, %v701_v1 }
  0xb2   : > { %v977_v19 = vpop.eup %976 }
  0xb3   : > { %v425_v21 = vmul.f32 %v977_v19, %v1088_v2 }
  0xb5   : > { %v434_v23 = vmul.f32 %v865_v20, %v425_v21 }
  0xb7   : > { %v435_v25 = vpack.c.bf16 %v434_v23, %v433_v22 }
  0xb8   : > { %v705_v7 = vld [vmem:[#allocation2 + $0x8] sm:$0xff] }
  0xb9   : > { %905 = vmatmul.mubr.msk.bf16.vlgmr.msra.gmra.mxu1 %vm410_vm0, %v435_v25 }
  0xba   : > { %909 = vmatpush3.bf16.msra.mxu1 %v964_v24  ;;  %912 = vmatprep.mubr.msk.bf16.mxu1 %vm1011_vm1, %v1010_v9 }
  0xbb   : > { %910 = vmatprep.subr.bf16.mxu1 %v1010_v9 }
  0xbe   : > { %911 = vmatpush3.bf16.msra.mxu1 %v965_v26 }
  0xc1   : > { %913 = vmatmul.mubr.msk.bf16.vlgmr.msra.gmra.mxu1 %vm410_vm0, %v435_v25 }
 0x179   : > { %v496_v36 = vpop.f32.mrf.mxu1 }
 0x17a   : > { %v497_v37 = vadd.f32 %v866_v35, %v496_v36 }
 0x17b   : > { %v906_v38 = vpop.f32.mrf.mxu1 }
 0x17c   : > { %v567_v39 = vsub.f32 0.0, %v497_v37 }
 0x17d   : > { %v499_v40 = vpop.f32.mrf.mxu1 }
 0x17e   : > { %v569_v41 = vmul.f32 1.442695, %v567_v39  ;;  %v500_v42 = vadd.f32 %v866_v35, %v499_v40 }
 0x17f   : > { %v907_v43 = vpop.f32.mrf.mxu1 }
 0x180   : > { %978 = vpow2.f32 %v569_v41  ;;  %v568_v44 = vsub.f32 0.0, %v500_v42 }
 0x181   : > { %v560_v45 = vpop.f32.mrf.mxu1 }
 0x182   : > { %v571_v46 = vmul.f32 1.442695, %v568_v44  ;;  %v561_v59 = vadd.f32 %v870_v55, %v560_v45 }
 0x183   : > { %v914_v47 = vpop.f32.mrf.mxu1 }
 0x184   : > { %980 = vpow2.f32 %v571_v46 }
 0x185   : > { %v563_v48 = vpop.f32.mrf.mxu1 }
 0x186   : > { %v564_v60 = vadd.f32 %v870_v55, %v563_v48 }
 0x187   : > { %v915_v49 = vpop.f32.mrf.mxu1 }
 0x18d   : > { %v979_v50 = vpop.eup %978 }
 0x18e   : > { %v573_v51 = vadd.f32 1.0, %v979_v50 }
 0x190   : > { %982 = vrcp.f32 %v573_v51 }
 0x191   : > { %v981_v52 = vpop.eup %980 }
 0x192   : > { %v574_v53 = vadd.f32 1.0, %v981_v52 }
 0x194   : > { %984 = vrcp.f32 %v574_v53 }
 0x19d   : > { %v983_v54 = vpop.eup %982 }
 0x19e   : > { %v579_v56 = vmul.f32 %v983_v54, %v497_v37 }
 0x1a0   : > { %v581_v61 = vmul.f32 %v579_v56, %v561_v59 }
 0x1a1   : > { %v985_v57 = vpop.eup %984 }
 0x1a2   : > { %v580_v58 = vmul.f32 %v985_v57, %v500_v42 }
 0x1a4   : > { %v582_v62 = vmul.f32 %v580_v58, %v564_v60 }
 0x1a6   : > { %v583_v63 = vpack.c.bf16 %v582_v62, %v581_v61 }
 0x1a8   : > { %933 = vmatmul.mubr.bf16.vlgmr.msra.gmra.mxu0 %v583_v63 }
 0x268   : > { %v682_v4 = vpop.f32.mrf.mxu0 }
 0x269   : > { %v706_v5 = vadd.f32 %v704_v3, %v682_v4 }
 0x26a   : > { %v934_v6 = vpop.f32.mrf.mxu0 }
 0x26b   : > { %708 = vst.msk [vmem:[#allocation2] sm:$0xff] %vm410_vm0, %v706_v5 }
 0x26c   : > { %v685_v8 = vpop.f32.mrf.mxu0 }
 0x26d   : > { %v707_v9 = vadd.f32 %v705_v7, %v685_v8 }
 0x26e   : > { %v935_v10 = vpop.f32.mrf.mxu0 }
 0x26f   : > { %709 = vst.msk [vmem:[#allocation2 + $0x8] sm:$0xff] %vm410_vm0, %v707_v9 }
 0x272   : > { %v713_v0 = vld [vmem:[#allocation2] sm:$0xff] }
 0x273   : > { %715 = vst.msk [vmem:[%s403_s14] sm:$0xff] %vm410_vm0, %v713_v0 }
 0x276   : > { %v714_v2 = vld [vmem:[#allocation2 + $0x8] sm:$0xff] }
 0x277   : > { %716 = vst.msk [vmem:[%s403_s14 + $0x8] sm:$0xff] %vm410_vm0, %v714_v2 }
 0x278 PF: > { %s18_s29 = sadd.s32 1, %s1008_s29   ;;  %s1177_s27 = smov %s1004_s28 }
 0x279   : > { %p15_p5 = scmp.ge.s32.totalorder %s18_s29, 4   ;;  %s1178_s28 = smov %s1180_s30 }
 0x27b   :  { %17 = sbr.rel (!%p15_p5) target bundleno = 2 (0x2), region = 105 }

// kernel: _lambda_.18
= control target key start
LH: loop header
LB: loop body
LE: loop exit
PB: predicated region body
PF: predicated region fallthrough
CT: control target
= control target key end

     0   :  { %15 = vsyncpa [#allocation4], 0  ;;  %s2755_s0 = inlined_call_operand.vmem [shape: f32[32,32], index: 0, kind: input, shape index: {}, may-alias: {0,10}]   ;;  %s2756_s1 = inlined_call_operand.vmem [shape: f32[32,3], index: 1, kind: input, shape index: {}]   ;;  %s2757_s2 = inlined_call_operand.vmem [shape: f32[1,32], index: 2, kind: input, shape index: {}]   ;;  %s2758_s3 = inlined_call_operand.vmem [shape: bf16[3,32], index: 3, kind: input, shape index: {}]   ;;  %s2759_s4 = inlined_call_operand.vmem [shape: f32[1,32], index: 4, kind: input, shape index: {}]   ;;  %s2760_s5 = inlined_call_operand.vmem [shape: bf16[32,96], index: 5, kind: input, shape index: {}]   ;;  %s2761_s6 = inlined_call_operand.vmem [shape: f32[1,96], index: 6, kind: input, shape index: {}]   ;;  %s2762_s7 = inlined_call_operand.vmem [shape: bf16[32,32], index: 7, kind: input, shape index: {}]   ;;  %s2763_s8 = inlined_call_operand.vmem [shape: f32[1,32], index: 8, kind: input, shape index: {}]   ;;  %s2764_s9 = inlined_call_operand.vmem [shape: f32[2], index: 9, kind: input, shape index: {}]   ;;  %s2765_s10 = inlined_call_operand.vmem [shape: f32[32,32], index: 10, kind: output, shape index: {}, may-alias: {0,10}]  }
   0x1   :  { %s40_s15 = sshll.u32 %s2764_s9, 4  ;;  %s41_s15 = int_to_ptr.vmem [resolvable:$true] %s40_s15 }
   0x2   :  { %s2339_s16 = scalar_lea.vmem %s41_s15, 16  ;;  %p2344_p1 = scmp.lt.s32.totalorder %s41_s15, %s41_s15 }
   0x3   :  { %p2340_p0 = scmp.ne.s32.totalorder %s41_s15, %s2339_s16  ;;  %p2345_p2 = scmp.lt.s32.totalorder %s2339_s16, %s2339_s16 }
   0x5   :  { %p2346_p3 = por %p2345_p2, %p2344_p1 }
   0x7   :  { %p2347_p4 = pnand %p2346_p3, %p2340_p0 }
   0x9   :  { %2350 = shalt.err (!%p2347_p4)
}
   0xa   :  { %s2353_s17 = smov [#allocation3]  }
   0xb   :  { %43 = dma.vmem_to_smem %s41_s15, 16, %s2353_s17, [#allocation4]  }
   0xc   :  { %2351 = dma.done.wait [#allocation4], 16  }
   0xd   :  { %2352 = vsyncadd [#allocation4], 4294967280 }
   0xe   :  { %47 = sfence }
   0xf   :  { %v142_v0 = vld [vmem:[%s2758_s3] sm:$0x3]  ;;  %vm149_vm0 = vcmask 1040384   ;;  %vm150_vm1 = vcmask 1041408   ;;  %v2354_v2 = vmov 65535   ;;  %v54_v4 = vld [vmem:[%s2756_s1 + $0x8] sm:$0xff] }
  0x10   :  { %v53_v1 = vld [vmem:[%s2756_s1] sm:$0xff]  ;;  %v151_v3 = vsel %vm149_vm0, 4294967295, %v2354_v2  ;;  %vm102_vm2 = vcmask 23552   ;;  %v55_v5 = vld [vmem:[%s2756_s1 + $0x10] sm:$0xff]  ;;  %v56_v6 = vld [vmem:[%s2756_s1 + $0x18] sm:$0xff]  ;;  %vm61_vm3 = vcmask 261120  }
  0x11   :  { %v152_v7 = vsel %vm150_vm1, %v151_v3, 0  ;;  %v103_v8 = vsel %vm102_vm2, %v53_v1, 0.0  ;;  %v110_v9 = vsel %vm102_vm2, %v54_v4, 0.0  ;;  %v117_v10 = vsel %vm102_vm2, %v55_v5, 0.0  ;;  %v2443_v11 = vld [vmem:[%s2755_s0 + $0x10] sm:$0xff]  ;;  %v2448_v12 = vld [vmem:[%s2755_s0] sm:$0xff] }
  0x12   :  { %v154_v13 = vand.u32 %v152_v7, %v142_v0  ;;  %v104_v14 = vrot.slane %v103_v8, 4  ;;  %v111_v15 = vrot.slane %v110_v9, 4  ;;  %v118_v16 = vrot.slane %v117_v10, 4  ;;  %v2453_v17 = vld [vmem:[%s2755_s0 + $0x18] sm:$0xff]  ;;  %v2458_v18 = vld [vmem:[%s2755_s0 + $0x8] sm:$0xff]  ;;  %v2284_v60 = vld [vmem:[%s2760_s5] sm:$0xff]  }
  0x13   :  { %v124_v19 = vsel %vm102_vm2, %v56_v6, 0.0  ;;  %v59_v20 = vmul.f32 %v2443_v11, %v2443_v11  ;;  %v57_v21 = vmul.f32 %v2448_v12, %v2448_v12  ;;  %v60_v22 = vmul.f32 %v2453_v17, %v2453_v17  ;;  %v2283_v59 = vld [vmem:[%s2760_s5 + $0x8] sm:$0xff]   ;;  %s2358_s9 = smov 96   ;;  %s2359_s20 = smov 64  }
  0x14   :  { %2114 = vmatprep.subr.bf16.mxu0 %v154_v13  ;;  %v105_v23 = vadd.f32 %v104_v14, %v103_v8  ;;  %v112_v24 = vadd.f32 %v111_v15, %v110_v9  ;;  %v119_v25 = vadd.f32 %v118_v16, %v117_v10  ;;  %v125_v26 = vrot.slane %v124_v19, 4  ;;  %2120 = vmatprep.subr.bf16.mxu1 %v2283_v59  ;;  %s2360_s21 = smov 80   ;;  %s2361_s22 = smov 112  }
  0x15   :  { %2115 = vmatpush3.bf16.msra.mxu0 %v154_v13  ;;  %v68_v27 = vsel %vm61_vm3, %v59_v20, 0.0  ;;  %v62_v28 = vsel %vm61_vm3, %v57_v21, 0.0  ;;  %v58_v29 = vmul.f32 %v2458_v18, %v2458_v18  ;;  %v71_v34 = vsel %vm61_vm3, %v60_v22, 0.0  ;;  %2121 = vmatpush3.bf16.msra.mxu1 %v2283_v59  ;;  %v2000_v20 = vld [vmem:[%s2757_s2] ss:$0 sm:$0xff]  ;;  %s2041_s23 = sld [smem:[#allocation3 + $0x1]] }
  0x16   :  { %v106_v30 = vrot.slane %v105_v23, 2  ;;  %v113_v31 = vrot.slane %v112_v24, 2  ;;  %v120_v32 = vrot.slane %v119_v25, 2  ;;  %v126_v33 = vadd.f32 %v125_v26, %v124_v19  ;;  %69 = vadd.xlane.f32.xlu1 %v68_v27  ;;  %63 = vadd.xlane.f32.xlu0 %v62_v28  ;;  %s2362_s24 = smov 48   ;;  %s2363_s25 = smov 16  }
  0x17   :  { %v65_v35 = vsel %vm61_vm3, %v58_v29, 0.0  ;;  %2122 = vmatprep.subr.bf16.mxu1 %v2284_v60  ;;  %vm2356_vm4 = vmmov 0   ;;  %vm977_vm5 = vcmask 130048   ;;  %vm1182_vm12 = vcmask 64512  }
  0x18   :  { %v107_v36 = vadd.f32 %v106_v30, %v105_v23  ;;  %v114_v37 = vadd.f32 %v113_v31, %v112_v24  ;;  %v121_v38 = vadd.f32 %v120_v32, %v119_v25  ;;  %v127_v39 = vrot.slane %v126_v33, 2 }
  0x19   :  { %2123 = vmatpush3.bf16.msra.mxu1 %v2284_v60  ;;  %vm1236_vm15 = vcmask 1043456   ;;  %vm1898_vm0 = vcmask 261248  }
  0x1a   :  { %v108_v40 = vrot.slane %v107_v36, 1  ;;  %v115_v41 = vrot.slane %v114_v37, 1  ;;  %v122_v42 = vrot.slane %v121_v38, 1  ;;  %v128_v43 = vadd.f32 %v127_v39, %v126_v33  ;;  %72 = vadd.xlane.f32.xlu1 %v71_v34  ;;  %66 = vadd.xlane.f32.xlu0 %v65_v35 }
  0x1c   :  { %v109_v44 = vadd.f32 %v108_v40, %v107_v36  ;;  %v116_v45 = vadd.f32 %v115_v41, %v114_v37  ;;  %v123_v46 = vadd.f32 %v122_v42, %v121_v38  ;;  %v129_v47 = vrot.slane %v128_v43, 1 }
  0x1d   :  { %v2355_v38 = vmov 0.0   ;;  %v2357_v41 = vmov 1.0  }
  0x1e   :  { %v132_v48 = vmul.f32 0.125, %v109_v44  ;;  %v133_v49 = vmul.f32 0.125, %v116_v45  ;;  %v130_v50 = vadd.f32 %v129_v47, %v128_v43  ;;  %v134_v51 = vmul.f32 0.125, %v123_v46  ;;  %2128 = vmatprep.subr.mxu0 %v2355_v38  ;;  %2138 = vmatprep.subr.mxu1 %v2355_v38  ;;  %v2004_v44 = vld [vmem:[%s2761_s6] ss:$0 sm:$0xff]  ;;  %s1172_s6 = sld [smem:[#allocation3]] }
  0x20   :  { %v2473_v52 = vsub.f32 %v53_v1, %v132_v48  ;;  %v2475_v53 = vsub.f32 %v54_v4, %v133_v49  ;;  %v135_v54 = vmul.f32 0.125, %v130_v50  ;;  %v2477_v55 = vsub.f32 %v55_v5, %v134_v51 }
  0x22   :  { %v140_v56 = vpack.c.bf16 %v2475_v53, %v2473_v52  ;;  %v2481_v57 = vsub.f32 %v56_v6, %v135_v54  ;;  %v300_v37 = vmul.f32 %v2473_v52, %v2473_v52  ;;  %v302_v39 = vmul.f32 %v2477_v55, %v2477_v55 }
  0x23   :  { %v301_v40 = vmul.f32 %v2475_v53, %v2475_v53 }
  0x24   :  { %2116 = vmatprep.mubr.msk.bf16.mxu0 %vm102_vm2, %v140_v56  ;;  %v141_v58 = vpack.c.bf16 %v2481_v57, %v2477_v55  ;;  %v303_v42 = vmul.f32 %v2481_v57, %v2481_v57  ;;  %v304_v56 = vsel %vm102_vm2, %v300_v37, 0.0 }
  0x25   :  { %v307_v59 = vsel %vm102_vm2, %v301_v40, 0.0 }
  0x26   :  { %2117 = vmatmul.mubr.msk.bf16.vlgmr.msra.gmra.mxu0 %vm102_vm2, %v141_v58  ;;  %v313_v58 = vsel %vm102_vm2, %v303_v42, 0.0 }
  0x27   :  { %2130 = vmatprep.mubr.msk.f32.mxu0 %vm2356_vm4, %v2355_v38  ;;  %2129 = vmatpush3.xpose.msk.msra.mxu0 %vm102_vm2, %v300_v37 }
  0x28   :  { %2133 = vmatprep.subr.mxu0 %v2355_v38 }
  0x2e   :  { %2131 = vmatmul.mubr.msk.f32.vlgmr.msra.gmra.mxu0 %vm102_vm2, %v2357_v41 }
  0x2f   :  { %2134 = vmatpush3.xpose.msk.msra.mxu0 %vm102_vm2, %v301_v40  ;;  %2135 = vmatprep.mubr.msk.f32.mxu0 %vm2356_vm4, %v2355_v38 }
  0x30   :  { %2143 = vmatprep.subr.mxu0 %v2355_v38 }
  0x32   :  { %2136 = vmatmul.mubr.msk.f32.vlgmr.msra.gmra.mxu0 %vm102_vm2, %v2357_v41 }
  0x33   :  { %2144 = vmatpush3.xpose.msk.msra.mxu0 %vm102_vm2, %v303_v42  ;;  %2145 = vmatprep.mubr.msk.f32.mxu0 %vm2356_vm4, %v2355_v38 }
  0x34   :  { %2153 = vmatprep.subr.mxu0 %v2355_v38 }
  0x36   :  { %2146 = vmatmul.mubr.msk.f32.vlgmr.msra.gmra.mxu0 %vm102_vm2, %v2357_v41 }
  0x37   :  { %2154 = vmatpush3.xpose.msk.msra.mxu0 %vm102_vm2, %v2475_v53  ;;  %2155 = vmatprep.mubr.msk.f32.mxu0 %vm2356_vm4, %v2355_v38 }
  0x38   :  { %2163 = vmatprep.subr.mxu0 %v2355_v38 }
  0x3a   :  { %2156 = vmatmul.mubr.msk.f32.vlgmr.msra.gmra.mxu0 %vm102_vm2, %v2475_v53 }
  0x3b   :  { %2164 = vmatpush3.xpose.msk.msra.mxu0 %vm102_vm2, %v2481_v57  ;;  %2165 = vmatprep.mubr.msk.f32.mxu0 %vm2356_vm4, %v2355_v38 }
  0x3c   :  { %2174 = vmatprep.subr.bf16.mxu0 %v2355_v38 }
  0x3e   :  { %2166 = vmatmul.mubr.msk.f32.vlgmr.msra.gmra.mxu0 %vm102_vm2, %v2481_v57  ;;  %v310_v57 = vsel %vm102_vm2, %v302_v39, 0.0 }
  0x3f   :  { %2176 = vmatprep.mubr.msk.bf16.mxu0 %vm2356_vm4, %v2355_v38 }
  0x9f   :  { %v70_v61 = vpop.xlane.xlu1 %69  ;;  %v64_v62 = vpop.xlane.xlu0 %63 }
  0xa0   :  { %v75_v0 = vmul.f32 0.03125, %v64_v62  ;;  %v77_v3 = vmul.f32 0.03125, %v70_v61 }
  0xa2   :  { %v79_v5 = vadd.f32 1.1920929e-07, %v75_v0  ;;  %v81_v7 = vadd.f32 1.1920929e-07, %v77_v3 }
  0xa3   :  { %v73_v63 = vpop.xlane.xlu1 %72  ;;  %v67_v1 = vpop.xlane.xlu0 %66 }
  0xa4   :  { %v78_v2 = vmul.f32 0.03125, %v73_v63  ;;  %v76_v4 = vmul.f32 0.03125, %v67_v1  ;;  %2287 = vrsqrt.f32 %v79_v5 }
  0xa6   :  { %v82_v6 = vadd.f32 1.1920929e-07, %v78_v2  ;;  %v80_v8 = vadd.f32 1.1920929e-07, %v76_v4 }
  0xa8   :  { %2289 = vrsqrt.f32 %v82_v6 }
  0xa9   :  { %2291 = vrsqrt.f32 %v81_v7 }
  0xaa   :  { %2293 = vrsqrt.f32 %v80_v8 }
  0xb1   :  { %v2288_v9 = vpop.eup %2287 }
  0xb2   :  { %v87_v15 = vmul.f32 %v2288_v9, %v2448_v12 }
  0xb4   :  { %v98_v23 = vmul.f32 %v2000_v20, %v87_v15 }
  0xb5   :  { %v2290_v10 = vpop.eup %2289 }
  0xb6   :  { %v2292_v13 = vpop.eup %2291  ;;  %v90_v16 = vmul.f32 %v2290_v10, %v2453_v17 }
  0xb7   :  { %v2294_v14 = vpop.eup %2293  ;;  %v89_v19 = vmul.f32 %v2292_v13, %v2443_v11  ;;  %v2003_v11 = vld [vmem:[%s2759_s4] ss:$0 sm:$0xff] }
  0xb8   :  { %v88_v21 = vmul.f32 %v2294_v14, %v2458_v18  ;;  %v101_v24 = vmul.f32 %v2000_v20, %v90_v16 }
  0xb9   :  { %v100_v25 = vmul.f32 %v2000_v20, %v89_v19 }
  0xba   :  { %v99_v27 = vmul.f32 %v2000_v20, %v88_v21 }
  0xe6   :  { %v2118_v22 = vpop.f32.mrf.mxu0 }
  0xe7   :  { %v207_v12 = vadd.f32 %v2118_v22, %v100_v25 }
  0xe8   :  { %v190_v26 = vpop.f32.mrf.mxu0 }
  0xe9   :  { %v205_v29 = vadd.f32 %v190_v26, %v98_v23  ;;  %v218_v18 = vadd.f32 %v2003_v11, %v207_v12 }
  0xea   :  { %v2119_v28 = vpop.f32.mrf.mxu0 }
  0xeb   :  { %v208_v30 = vadd.f32 %v2119_v28, %v101_v24  ;;  %v216_v33 = vadd.f32 %v2003_v11, %v205_v29  ;;  %v903_v24 = vlaneseq }
  0xec   :  { %v193_v31 = vpop.f32.mrf.mxu0 }
  0xed   :  { %v206_v17 = vadd.f32 %v193_v31, %v99_v27  ;;  %v219_v32 = vadd.f32 %v2003_v11, %v208_v30  ;;  %v904_v25 = vshrl.u32 %v903_v24, 7 }
  0xee   :  { %v388_v60 = vpop.f32.mrf.mxu0 }
  0xef   :  { %v217_v34 = vadd.f32 %v2003_v11, %v206_v17  ;;  %v221_v36 = vpack.c.bf16 %v219_v32, %v218_v18  ;;  %v905_v26 = vsub.s32 0, %v904_v25 }
  0xf0   :  { %v2132_v61 = vpop.f32.mrf.mxu0 }
  0xf1   :  { %v220_v35 = vpack.c.bf16 %v217_v34, %v216_v33  ;;  %v906_v27 = vrot.slane %v388_v60, %v905_v26  ;;  %v1173_v61 = vstv %s1172_s6 }
  0xf2   :  { %v461_v63 = vpop.f32.mrf.mxu0 }
  0xf3   :  { %2124 = vmatprep.mubr.msk.bf16.mxu1 %vm61_vm3, %v220_v35 }
  0xf4   :  { %2125 = vmatmul.mubr.msk.bf16.vlgmr.msra.gmra.mxu1 %vm61_vm3, %v221_v36  ;;  %v2137_v1 = vpop.f32.mrf.mxu0 }
  0xf5   :  { %2139 = vmatpush3.xpose.msk.msra.mxu1 %vm102_vm2, %v302_v39  ;;  %2140 = vmatprep.mubr.msk.f32.mxu1 %vm2356_vm4, %v2355_v38  ;;  %v910_v39 = vrot.slane %v461_v63, %v905_v26 }
  0xf6   :  { %2148 = vmatprep.subr.mxu1 %v2355_v38  ;;  %v607_v3 = vpop.f32.mrf.mxu0 }
  0xf7   :  { %v918_v32 = vrot.slane %v607_v3, %v905_v26 }
  0xf8   :  { %v2147_v5 = vpop.f32.mrf.mxu0 }
  0xfa   :  { %v753_v7 = vpop.f32.mrf.mxu0 }
  0xfb   :  { %v924_v40 = vmul.f32 2.0, %v753_v7 }
  0xfc   :  { %2141 = vmatmul.mubr.msk.f32.vlgmr.msra.gmra.mxu1 %vm102_vm2, %v2357_v41  ;;  %v2157_v9 = vpop.f32.mrf.mxu0 }
  0xfd   :  { %2149 = vmatpush3.xpose.msk.msra.mxu1 %vm102_vm2, %v2473_v52  ;;  %2150 = vmatprep.mubr.msk.f32.mxu1 %vm2356_vm4, %v2355_v38 }
  0xfe   :  { %2158 = vmatprep.subr.mxu1 %v2355_v38  ;;  %v899_v10 = vpop.f32.mrf.mxu0 }
  0xff   :  { %v926_v34 = vmul.f32 2.0, %v899_v10 }
 0x100   :  { %2151 = vmatmul.mubr.msk.f32.vlgmr.msra.gmra.mxu1 %vm102_vm2, %v2473_v52  ;;  %v2167_v13 = vpop.f32.mrf.mxu0 }
 0x101   :  { %2159 = vmatpush3.xpose.msk.msra.mxu1 %vm102_vm2, %v2477_v55  ;;  %2160 = vmatprep.mubr.msk.f32.mxu1 %vm2356_vm4, %v2355_v38 }
 0x102   :  { %2168 = vmatprep.subr.bf16.mxu1 %v2355_v38 }
 0x104   :  { %2161 = vmatmul.mubr.msk.f32.vlgmr.msra.gmra.mxu1 %vm102_vm2, %v2477_v55 }
 0x105   :  { %2170 = vmatprep.mubr.msk.bf16.mxu1 %vm2356_vm4, %v2355_v38 }
 0x1b4   :  { %v2126_v43 = vpop.f32.mrf.mxu1 }
 0x1b5   :  { %v294_v51 = vadd.f32 %v2126_v43, %v2004_v44 }
 0x1b6   :  { %v285_v45 = vpop.f32.mrf.mxu1 }
 0x1b7   :  { %v286_v46 = vadd.f32 %v2004_v44, %v285_v45  ;;  %v2576_v53 = vpack.c.bf16 %v294_v51, %v294_v51 }
 0x1b8   :  { %v2127_v47 = vpop.f32.mrf.mxu1 }
 0x1b9   :  { %v2570_v48 = vpack.c.bf16 %v286_v46, %v286_v46  ;;  %v297_v54 = vadd.f32 %v2127_v47, %v2004_v44 }
 0x1ba   :  { %v288_v49 = vpop.f32.mrf.mxu1 }
 0x1bb   :  { %v289_v50 = vadd.f32 %v2004_v44, %v288_v49  ;;  %975 = vrot.lane.b32.xlu0 %v2570_v48, %s2358_s9  ;;  %v2579_v55 = vpack.c.bf16 %v297_v54, %v297_v54 }
 0x1bc   :  { %v534_v62 = vpop.f32.mrf.mxu1 }
 0x1bd   :  { %v2573_v52 = vpack.c.bf16 %v289_v50, %v289_v50  ;;  %v914_v30 = vrot.slane %v534_v62, %v905_v26 }
 0x1be   :  { %v2142_v0 = vpop.f32.mrf.mxu1 }
 0x1bf   :  { %1024 = vrot.lane.b32.xlu1 %v2573_v52, %s2358_s9 }
 0x1c0   :  { %v680_v2 = vpop.f32.mrf.mxu1 }
 0x1c1   :  { %v923_v28 = vmul.f32 2.0, %v680_v2 }
 0x1c2   :  { %v2152_v4 = vpop.f32.mrf.mxu1 }
 0x1c3   :  { %1072 = vrot.lane.b32.xlu1 %v2576_v53, %s2358_s9 }
 0x1c4   :  { %v826_v6 = vpop.f32.mrf.mxu1 }
 0x1c5   :  { %v925_v11 = vmul.f32 2.0, %v826_v6 }
 0x1c6   :  { %v2162_v8 = vpop.f32.mrf.mxu1 }
 0x1c7   :  { %1120 = vrot.lane.b32.xlu1 %v2579_v55, %s2358_s9 }
 0x1da   :  { %305 = vadd.xlane.f32.xlu0 %v304_v56 }
 0x1de   :  { %311 = vadd.xlane.f32.xlu0 %v310_v57 }
 0x1e2   :  { %314 = vadd.xlane.f32.xlu0 %v313_v58 }
 0x1eb   :  { %308 = vadd.xlane.f32.xlu1 %v307_v59 }
 0x22d   :  { %v976_v14 = vpop.permute.xlu0 %975 }
 0x22e   :  { %v982_v15 = vsel %vm977_vm5, %v976_v14, 0 }
 0x22f   :  { %2169 = vmatpush3.bf16.xpose.msra.mxu1 %v982_v15 }
 0x230   :  { %2180 = vmatprep.subr.bf16.mxu1 %v2355_v38 }
 0x231   :  { %v1025_v16 = vpop.permute.xlu1 %1024 }
 0x232   :  { %v1030_v19 = vsel %vm977_vm5, %v1025_v16, 0 }
 0x233   :  { %2175 = vmatpush3.bf16.xpose.msra.mxu0 %v1030_v19 }
 0x234   :  { %2186 = vmatprep.subr.bf16.mxu0 %v2355_v38 }
 0x235   :  { %v1073_v20 = vpop.permute.xlu1 %1072 }
 0x236   :  { %v1078_v21 = vsel %vm977_vm5, %v1073_v20, 0  ;;  %2171 = vmatmul.mubr.msk.bf16.vlgmr.msra.gmra.mxu1 %vm977_vm5, %v2570_v48 }
 0x237   :  { %2181 = vmatpush3.bf16.xpose.msra.mxu1 %v1078_v21  ;;  %2182 = vmatprep.mubr.msk.bf16.mxu1 %vm2356_vm4, %v2355_v38 }
 0x238   :  { %2192 = vmatprep.subr.bf16.mxu1 %v2355_v38 }
 0x239   :  { %v1121_v22 = vpop.permute.xlu1 %1120 }
 0x23a   :  { %v1126_v23 = vsel %vm977_vm5, %v1121_v22, 0  ;;  %2177 = vmatmul.mubr.msk.bf16.vlgmr.msra.gmra.mxu0 %vm977_vm5, %v2573_v52 }
 0x23b   :  { %2187 = vmatpush3.bf16.xpose.msra.mxu0 %v1126_v23  ;;  %2188 = vmatprep.mubr.msk.bf16.mxu0 %vm2356_vm4, %v2355_v38 }
 0x23c   :  { %2198 = vmatprep.subr.bf16.mxu0 %v2355_v38 }
 0x23e   :  { %2183 = vmatmul.mubr.msk.bf16.vlgmr.msra.gmra.mxu1 %vm977_vm5, %v2576_v53 }
 0x23f   :  { %2194 = vmatprep.mubr.msk.bf16.mxu1 %vm2356_vm4, %v2355_v38 }
 0x242   :  { %2189 = vmatmul.mubr.msk.bf16.vlgmr.msra.gmra.mxu0 %vm977_vm5, %v2579_v55 }
 0x243   :  { %2200 = vmatprep.mubr.msk.bf16.mxu0 %vm2356_vm4, %v2355_v38 }
 0x263   :  { %v306_v29 = vpop.xlane.xlu0 %305 }
 0x264   :  { %v919_v12 = vadd.f32 %v906_v27, %v306_v29 }
 0x266   :  { %v927_v31 = vsub.f32 %v919_v12, %v923_v28 }
 0x267   :  { %v312_v17 = vpop.xlane.xlu0 %311 }
 0x268   :  { %v921_v33 = vadd.f32 %v914_v30, %v312_v17  ;;  %v931_v44 = vmax.f32 %v927_v31, 0.0 }
 0x26a   :  { %v929_v18 = vsub.f32 %v921_v33, %v925_v11  ;;  %2295 = vrsqrt.f32 %v931_v44  ;;  %vm937_vm6 = vcmp.eq.f32.partialorder %v931_v44, inf  ;;  %v940_v56 = vand.u32 2147483648, %v931_v44 }
 0x26b   :  { %v315_v35 = vpop.xlane.xlu0 %314  ;;  %vm939_vm7 = vcmp.eq.f32.partialorder %v931_v44, 0.0 }
 0x26c   :  { %v922_v36 = vadd.f32 %v918_v32, %v315_v35  ;;  %v933_v46 = vmax.f32 %v929_v18, 0.0 }
 0x26e   :  { %v930_v37 = vsub.f32 %v922_v36, %v926_v34  ;;  %vm951_vm9 = vcmp.eq.f32.partialorder %v933_v46, inf  ;;  %v954_v2 = vand.u32 2147483648, %v933_v46  ;;  %vm953_vm11 = vcmp.eq.f32.partialorder %v933_v46, 0.0 }
 0x270   :  { %v934_v47 = vmax.f32 %v930_v37, 0.0 }
 0x272   :  { %vm958_vm13 = vcmp.eq.f32.partialorder %v934_v47, inf  ;;  %v961_v22 = vand.u32 2147483648, %v934_v47  ;;  %vm960_vm14 = vcmp.eq.f32.partialorder %v934_v47, 0.0 }
 0x274   :  { %v309_v41 = vpop.xlane.xlu1 %308 }
 0x275   :  { %v920_v42 = vadd.f32 %v910_v39, %v309_v41 }
 0x277   :  { %v928_v43 = vsub.f32 %v920_v42, %v924_v40  ;;  %v2296_v49 = vpop.eup %2295 }
 0x278   :  { %v936_v50 = vmul.f32 %v2296_v49, %v931_v44 }
 0x279   :  { %v932_v45 = vmax.f32 %v928_v43, 0.0 }
 0x27a   :  { %v938_v57 = vsel %vm937_vm6, %v931_v44, %v936_v50 }
 0x27b   :  { %2297 = vrsqrt.f32 %v932_v45  ;;  %vm944_vm8 = vcmp.eq.f32.partialorder %v932_v45, inf  ;;  %v2610_v60 = vsel %vm939_vm7, %v940_v56, %v938_v57  ;;  %v947_v62 = vand.u32 2147483648, %v932_v45 }
 0x27c   :  { %2299 = vrsqrt.f32 %v933_v46  ;;  %vm946_vm10 = vcmp.eq.f32.partialorder %v932_v45, 0.0  ;;  %v1174_v4 = vmul.f32 %v1173_v61, %v2610_v60 }
 0x27d   :  { %2301 = vrsqrt.f32 %v934_v47 }
 0x288   :  { %v2298_v51 = vpop.eup %2297 }
 0x289   :  { %v2300_v54 = vpop.eup %2299  ;;  %v943_v58 = vmul.f32 %v2298_v51, %v932_v45 }
 0x28a   :  { %v950_v59 = vmul.f32 %v2300_v54, %v933_v46  ;;  %v2302_v0 = vpop.eup %2301 }
 0x28b   :  { %v945_v63 = vsel %vm944_vm8, %v932_v45, %v943_v58  ;;  %v957_v9 = vmul.f32 %v2302_v0, %v934_v47 }
 0x28c   :  { %v952_v5 = vsel %vm951_vm9, %v933_v46, %v950_v59  ;;  %v2613_v7 = vsel %vm946_vm10, %v947_v62, %v945_v63 }
 0x28d   :  { %v2615_v14 = vsel %vm953_vm11, %v954_v2, %v952_v5  ;;  %v1175_v19 = vmul.f32 %v1173_v61, %v2613_v7  ;;  %v959_v25 = vsel %vm958_vm13, %v934_v47, %v957_v9 }
 0x28e   :  { %v1176_v24 = vmul.f32 %v1173_v61, %v2615_v14  ;;  %v2621_v31 = vsel %vm960_vm14, %v961_v22, %v959_v25 }
 0x28f   :  { %v1177_v18 = vmul.f32 %v1173_v61, %v2621_v31 }
 0x2f6   :  { %v1018_v1 = vpop.f32.mrf.mxu1 }
 0x2f7   :  { %v1168_v3 = vmul.f32 0.25, %v1018_v1 }
 0x2f8   :  { %v2172_v6 = vpop.f32.mrf.mxu1 }
 0x2f9   :  { %v1178_v8 = vadd.f32 %v1174_v4, %v1168_v3 }
 0x2fa   :  { %v1021_v10 = vpop.f32.mrf.mxu1  ;;  %v1066_v13 = vpop.f32.mrf.mxu0 }
 0x2fb   :  { %v1169_v15 = vmul.f32 0.25, %v1066_v13  ;;  %v1183_v16 = vsel %vm1182_vm12, %v1178_v8, -inf }
 0x2fc   :  { %v2173_v20 = vpop.f32.mrf.mxu1  ;;  %v2178_v21 = vpop.f32.mrf.mxu0  ;;  %1184 = vmax.xlane.f32.xlu0 %v1183_v16 }
 0x2fd   :  { %v1179_v23 = vadd.f32 %v1175_v19, %v1169_v15 }
 0x2fe   :  { %v1069_v26 = vpop.f32.mrf.mxu0  ;;  %v1114_v27 = vpop.f32.mrf.mxu1 }
 0x2ff   :  { %v1170_v28 = vmul.f32 0.25, %v1114_v27  ;;  %v1186_v29 = vsel %vm1182_vm12, %v1179_v23, -inf }
 0x300   :  { %v2179_v30 = vpop.f32.mrf.mxu0  ;;  %1187 = vmax.xlane.f32.xlu1 %v1186_v29  ;;  %v2184_v12 = vpop.f32.mrf.mxu1 }
 0x301   :  { %v1180_v11 = vadd.f32 %v1176_v24, %v1170_v28 }
 0x302   :  { %v1117_v17 = vpop.f32.mrf.mxu1  ;;  %v1162_v32 = vpop.f32.mrf.mxu0 }
 0x303   :  { %v1171_v33 = vmul.f32 0.25, %v1162_v32  ;;  %v1189_v34 = vsel %vm1182_vm12, %v1180_v11, -inf }
 0x304   :  { %v2185_v35 = vpop.f32.mrf.mxu1  ;;  %v2190_v36 = vpop.f32.mrf.mxu0  ;;  %1190 = vmax.xlane.f32.xlu0 %v1189_v34 }
 0x305   :  { %v1181_v37 = vadd.f32 %v1177_v18, %v1171_v33 }
 0x306   :  { %v1165_v39 = vpop.f32.mrf.mxu0 }
 0x307   :  { %v1192_v40 = vsel %vm1182_vm12, %v1181_v37, -inf }
 0x308   :  { %v2191_v41 = vpop.f32.mrf.mxu0  ;;  %1193 = vmax.xlane.f32.xlu1 %v1192_v40 }
 0x319   :  { %1280 = vrot.lane.b32.xlu1 %v2573_v52, %s2359_s20 }
 0x31d   :  { %1328 = vrot.lane.b32.xlu1 %v2576_v53, %s2359_s20 }
 0x321   :  { %1376 = vrot.lane.b32.xlu1 %v2579_v55, %s2359_s20 }
 0x385   :  { %v1185_v42 = vpop.xlane.xlu0 %1184 }
 0x386   :  { %v1195_v43 = vsub.f32 %v1178_v8, %v1185_v42 }
 0x388   :  { %v1199_v44 = vmul.f32 1.442695, %v1195_v43 }
 0x389   :  { %v1188_v45 = vpop.xlane.xlu1 %1187 }
 0x38a   :  { %2303 = vpow2.f32 %v1199_v44  ;;  %v1196_v46 = vsub.f32 %v1179_v23, %v1188_v45 }
 0x38c   :  { %v1201_v47 = vmul.f32 1.442695, %v1196_v46 }
 0x38d   :  { %v1191_v59 = vpop.xlane.xlu0 %1190 }
 0x38e   :  { %2305 = vpow2.f32 %v1201_v47  ;;  %v1197_v61 = vsub.f32 %v1180_v11, %v1191_v59 }
 0x390   :  { %v1203_v62 = vmul.f32 1.442695, %v1197_v61 }
 0x391   :  { %v1194_v49 = vpop.xlane.xlu1 %1193 }
 0x392   :  { %v1198_v63 = vsub.f32 %v1181_v37, %v1194_v49  ;;  %2307 = vpow2.f32 %v1203_v62  ;;  %v1633_v62 = vstv %s2041_s23 }
 0x394   :  { %v1205_v0 = vmul.f32 1.442695, %v1198_v63 }
 0x395   :  { %v1281_v50 = vpop.permute.xlu1 %1280 }
 0x396   :  { %v1286_v51 = vsel %vm1236_vm15, %v1281_v50, 0  ;;  %2309 = vpow2.f32 %v1205_v0 }
 0x397   :  { %v2304_v54 = vpop.eup %2303  ;;  %2199 = vmatpush3.bf16.msra.mxu0 %v1286_v51 }
 0x398   :  { %v1207_v56 = vsel %vm1182_vm12, %v2304_v54, 0.0  ;;  %2210 = vmatprep.subr.bf16.mxu0 %v2355_v38 }
 0x399   :  { %1208 = vadd.xlane.f32.xlu0 %v1207_v56  ;;  %v1329_v5 = vpop.permute.xlu1 %1328 }
 0x39a   :  { %v1334_v21 = vsel %vm1236_vm15, %v1329_v5, 0 }
 0x39b   :  { %v2306_v57 = vpop.eup %2305 }
 0x39c   :  { %v1210_v58 = vsel %vm1182_vm12, %v2306_v57, 0.0 }
 0x39d   :  { %1211 = vadd.xlane.f32.xlu1 %v1210_v58  ;;  %v1377_v6 = vpop.permute.xlu1 %1376 }
 0x39e   :  { %v1382_v24 = vsel %vm1236_vm15, %v1377_v6, 0 }
 0x39f   :  { %v2308_v1 = vpop.eup %2307 }
 0x3a0   :  { %v1213_v2 = vsel %vm1182_vm12, %v2308_v1, 0.0 }
 0x3a3   :  { %v2310_v3 = vpop.eup %2309 }
 0x3a4   :  { %v1216_v4 = vsel %vm1182_vm12, %v2310_v3, 0.0 }
 0x3ae   :  { %1480 = vrot.lane.b32.xlu1 %v2573_v52, %s2360_s21 }
 0x3af   :  { %1231 = vrot.lane.b32.xlu0 %v2570_v48, %s2359_s20 }
 0x3ce   :  { %1214 = vadd.xlane.f32.xlu0 %v1213_v2  ;;  %v1634_v2 = vmul.f32 %v1633_v62, %v2610_v60  ;;  %v1636_v60 = vmul.f32 %v1633_v62, %v2615_v14 }
 0x3d2   :  { %1217 = vadd.xlane.f32.xlu1 %v1216_v4 }
 0x3e3   :  { %1478 = vrot.lane.b32.xlu1 %v2573_v52, %s2361_s22 }
 0x3e4   :  { %1430 = vrot.lane.b32.xlu0 %v2570_v48, %s2360_s21 }
 0x3e7   :  { %1580 = vrot.lane.b32.xlu1 %v2579_v55, %s2360_s21 }
 0x3e8   :  { %1428 = vrot.lane.b32.xlu0 %v2570_v48, %s2361_s22 }
 0x3eb   :  { %1578 = vrot.lane.b32.xlu1 %v2579_v55, %s2361_s22 }
 0x3ec   :  { %1530 = vrot.lane.b32.xlu0 %v2576_v53, %s2360_s21 }
 0x3f0   :  { %1528 = vrot.lane.b32.xlu0 %v2576_v53, %s2361_s22 }
 0x422   :  { %v1209_v8 = vpop.xlane.xlu0 %1208 }
 0x423   :  { %2311 = vrcp.f32 %v1209_v8 }
 0x426   :  { %v1212_v9 = vpop.xlane.xlu1 %1211  ;;  %v1232_v10 = vpop.permute.xlu0 %1231 }
 0x427   :  { %2313 = vrcp.f32 %v1212_v9  ;;  %v1238_v13 = vsel %vm1236_vm15, %v1232_v10, 0 }
 0x428   :  { %2193 = vmatpush3.bf16.msra.mxu1 %v1238_v13  ;;  %v1635_v13 = vmul.f32 %v1633_v62, %v2613_v7 }
 0x429   :  { %2204 = vmatprep.subr.bf16.mxu1 %v2355_v38 }
 0x42a   :  { %v1481_v25 = vpop.permute.xlu1 %1480 }
 0x42b   :  { %v1486_v35 = vsel %vm977_vm5, %v1481_v25, 0 }
 0x430   :  { %v2312_v15 = vpop.eup %2311 }
 0x431   :  { %v1223_v16 = vmul.f32 %v2312_v15, %v2304_v54 }
 0x433   :  { %v1227_v19 = vpack.c.bf16 %v1223_v16, %v1223_v16 }
 0x434   :  { %v2314_v20 = vpop.eup %2313 }
 0x435   :  { %2195 = vmatmul.mubr.msk.bf16.vlgmr.msra.gmra.mxu1 %vm1182_vm12, %v1227_v19  ;;  %v1224_v22 = vmul.f32 %v2314_v20, %v2306_v57 }
 0x436   :  { %2205 = vmatpush3.bf16.msra.mxu1 %v1334_v21  ;;  %2206 = vmatprep.mubr.msk.bf16.mxu1 %vm2356_vm4, %v2355_v38 }
 0x437   :  { %v1228_v23 = vpack.c.bf16 %v1224_v22, %v1224_v22  ;;  %2216 = vmatprep.subr.bf16.mxu1 %v2355_v38 }
 0x439   :  { %2201 = vmatmul.mubr.msk.bf16.vlgmr.msra.gmra.mxu0 %vm1182_vm12, %v1228_v23 }
 0x43a   :  { %2211 = vmatpush3.bf16.msra.mxu0 %v1382_v24  ;;  %2212 = vmatprep.mubr.msk.bf16.mxu0 %vm2356_vm4, %v2355_v38 }
 0x43b   :  { %2222 = vmatprep.subr.bf16.mxu0 %v2355_v38 }
 0x457   :  { %v1215_v26 = vpop.xlane.xlu0 %1214 }
 0x458   :  { %2315 = vrcp.f32 %v1215_v26 }
 0x45b   :  { %v1218_v27 = vpop.xlane.xlu1 %1217  ;;  %v1431_v28 = vpop.permute.xlu0 %1430 }
 0x45c   :  { %2317 = vrcp.f32 %v1218_v27  ;;  %v1436_v32 = vsel %vm977_vm5, %v1431_v28, 0 }
 0x45f   :  { %v1429_v17 = vpop.permute.xlu0 %1428  ;;  %v1479_v18 = vpop.permute.xlu1 %1478 }
 0x463   :  { %v1531_v36 = vpop.permute.xlu0 %1530  ;;  %v1581_v39 = vpop.permute.xlu1 %1580 }
 0x464   :  { %v1536_v37 = vsel %vm977_vm5, %v1531_v36, 0  ;;  %v1586_v40 = vsel %vm977_vm5, %v1581_v39, 0 }
 0x465   :  { %v2316_v29 = vpop.eup %2315 }
 0x466   :  { %v1225_v30 = vmul.f32 %v2316_v29, %v2308_v1 }
 0x467   :  { %v1529_v41 = vpop.permute.xlu0 %1528  ;;  %v1579_v42 = vpop.permute.xlu1 %1578 }
 0x468   :  { %v1229_v12 = vpack.c.bf16 %v1225_v30, %v1225_v30  ;;  %v1637_v30 = vmul.f32 %v1633_v62, %v2621_v31 }
 0x469   :  { %v2318_v11 = vpop.eup %2317 }
 0x46a   :  { %2207 = vmatmul.mubr.msk.bf16.vlgmr.msra.gmra.mxu1 %vm1182_vm12, %v1229_v12  ;;  %v1226_v33 = vmul.f32 %v2318_v11, %v2310_v3 }
 0x46b   :  { %2217 = vmatpush3.bf16.xpose.msra.mxu1 %v1436_v32  ;;  %2218 = vmatprep.mubr.msk.bf16.mxu1 %vm2356_vm4, %v2355_v38 }
 0x46c   :  { %v1230_v34 = vpack.c.bf16 %v1226_v33, %v1226_v33  ;;  %2228 = vmatprep.subr.bf16.mxu1 %v2355_v38 }
 0x46e   :  { %2213 = vmatmul.mubr.msk.bf16.vlgmr.msra.gmra.mxu0 %vm1182_vm12, %v1230_v34 }
 0x46f   :  { %2223 = vmatpush3.bf16.xpose.msra.mxu0 %v1486_v35  ;;  %2224 = vmatprep.mubr.msk.bf16.mxu0 %vm2356_vm4, %v2355_v38 }
 0x470   :  { %2234 = vmatprep.subr.bf16.mxu0 %v2355_v38 }
 0x472   :  { %2219 = vmatmul.mubr.msk.bf16.vlgmr.msra.gmra.mxu1 %vm977_vm5, %v1429_v17 }
 0x473   :  { %2229 = vmatpush3.bf16.xpose.msra.mxu1 %v1536_v37  ;;  %2230 = vmatprep.mubr.msk.bf16.mxu1 %vm2356_vm4, %v2355_v38 }
 0x474   :  { %2240 = vmatprep.subr.bf16.mxu1 %v2355_v38 }
 0x476   :  { %2225 = vmatmul.mubr.msk.bf16.vlgmr.msra.gmra.mxu0 %vm977_vm5, %v1479_v18 }
 0x477   :  { %2235 = vmatpush3.bf16.xpose.msra.mxu0 %v1586_v40  ;;  %2236 = vmatprep.mubr.msk.bf16.mxu0 %vm2356_vm4, %v2355_v38 }
 0x478   :  { %2246 = vmatprep.subr.bf16.mxu0 %v2355_v38 }
 0x47a   :  { %2231 = vmatmul.mubr.msk.bf16.vlgmr.msra.gmra.mxu1 %vm977_vm5, %v1529_v41 }
 0x47b   :  { %2242 = vmatprep.mubr.msk.bf16.mxu1 %vm2356_vm4, %v2355_v38 }
 0x47e   :  { %2237 = vmatmul.mubr.msk.bf16.vlgmr.msra.gmra.mxu0 %vm977_vm5, %v1579_v42 }
 0x47f   :  { %2248 = vmatprep.mubr.msk.bf16.mxu0 %vm2356_vm4, %v2355_v38 }
 0x4f5   :  { %v1274_v43 = vpop.f32.mrf.mxu1 }
 0x4f6   :  { %1424 = vst.msk [vmem:[#allocation2] sm:$0xff] %vm977_vm5, %v1274_v43 }
 0x4f7   :  { %v2196_v44 = vpop.f32.mrf.mxu1 }
 0x4f9   :  { %v1277_v45 = vpop.f32.mrf.mxu1  ;;  %v1322_v46 = vpop.f32.mrf.mxu0 }
 0x4fa   :  { %1425 = vst.msk [vmem:[#allocation2 + $0x8] sm:$0xff] %vm977_vm5, %v1322_v46 }
 0x4fb   :  { %v2197_v47 = vpop.f32.mrf.mxu1  ;;  %v2202_v49 = vpop.f32.mrf.mxu0 }
 0x4fd   :  { %v1325_v50 = vpop.f32.mrf.mxu0 }
 0x4ff   :  { %v2203_v51 = vpop.f32.mrf.mxu0 }
 0x52a   :  { %v1370_v54 = vpop.f32.mrf.mxu1 }
 0x52b   :  { %1426 = vst.msk [vmem:[#allocation2 + $0x10] sm:$0xff] %vm977_vm5, %v1370_v54 }
 0x52c   :  { %v2208_v56 = vpop.f32.mrf.mxu1 }
 0x52e   :  { %v1373_v57 = vpop.f32.mrf.mxu1  ;;  %v1418_v58 = vpop.f32.mrf.mxu0 }
 0x52f   :  { %1427 = vst.msk [vmem:[#allocation2 + $0x18] sm:$0xff] %vm977_vm5, %v1418_v58 }
 0x530   :  { %v2209_v59 = vpop.f32.mrf.mxu1  ;;  %v2214_v61 = vpop.f32.mrf.mxu0 }
 0x532   :  { %v1421_v63 = vpop.f32.mrf.mxu0  ;;  %v1472_v0 = vpop.f32.mrf.mxu1 }
 0x533   :  { %v1628_v1 = vmul.f32 0.25, %v1472_v0 }
 0x534   :  { %v2215_v3 = vpop.f32.mrf.mxu0  ;;  %v2220_v4 = vpop.f32.mrf.mxu1 }
 0x535   :  { %v1638_v5 = vadd.f32 %v1634_v2, %v1628_v1 }
 0x536   :  { %v1475_v6 = vpop.f32.mrf.mxu1  ;;  %v1522_v8 = vpop.f32.mrf.mxu0 }
 0x537   :  { %v1629_v9 = vmul.f32 0.25, %v1522_v8  ;;  %v1642_v10 = vsel %vm1182_vm12, %v1638_v5, -inf }
 0x538   :  { %v2226_v15 = vpop.f32.mrf.mxu0  ;;  %1643 = vmax.xlane.f32.xlu0 %v1642_v10  ;;  %v2221_v16 = vpop.f32.mrf.mxu1 }
 0x539   :  { %v1639_v19 = vadd.f32 %v1635_v13, %v1629_v9 }
 0x53a   :  { %v1525_v20 = vpop.f32.mrf.mxu0  ;;  %v1572_v21 = vpop.f32.mrf.mxu1 }
 0x53b   :  { %v1630_v22 = vmul.f32 0.25, %v1572_v21  ;;  %v1645_v23 = vsel %vm1182_vm12, %v1639_v19, -inf }
 0x53c   :  { %1646 = vmax.xlane.f32.xlu1 %v1645_v23  ;;  %v2227_v24 = vpop.f32.mrf.mxu0  ;;  %v2232_v25 = vpop.f32.mrf.mxu1 }
 0x53d   :  { %v1640_v26 = vadd.f32 %v1636_v60, %v1630_v22 }
 0x53e   :  { %v1575_v27 = vpop.f32.mrf.mxu1  ;;  %v1622_v28 = vpop.f32.mrf.mxu0 }
 0x53f   :  { %v1631_v29 = vmul.f32 0.25, %v1622_v28  ;;  %v1648_v7 = vsel %vm1182_vm12, %v1640_v26, -inf }
 0x540   :  { %v2238_v12 = vpop.f32.mrf.mxu0  ;;  %1649 = vmax.xlane.f32.xlu0 %v1648_v7  ;;  %v2233_v11 = vpop.f32.mrf.mxu1  ;;  %v2285_v7 = vld [vmem:[%s2762_s7 + $0x8] sm:$0xff]  }
 0x541   :  { %v1641_v17 = vadd.f32 %v1637_v30, %v1631_v29  ;;  %v2286_v30 = vld [vmem:[%s2762_s7] sm:$0xff]  }
 0x542   :  { %v1625_v32 = vpop.f32.mrf.mxu0 }
 0x543   :  { %v1651_v33 = vsel %vm1182_vm12, %v1641_v17, -inf }
 0x544   :  { %v2239_v34 = vpop.f32.mrf.mxu0  ;;  %1652 = vmax.xlane.f32.xlu0 %v1651_v33 }
 0x5c1   :  { %v1644_v14 = vpop.xlane.xlu0 %1643 }
 0x5c2   :  { %v1654_v18 = vsub.f32 %v1638_v5, %v1644_v14 }
 0x5c4   :  { %v1658_v35 = vmul.f32 1.442695, %v1654_v18 }
 0x5c5   :  { %v1647_v36 = vpop.xlane.xlu1 %1646 }
 0x5c6   :  { %2319 = vpow2.f32 %v1658_v35  ;;  %v1655_v37 = vsub.f32 %v1639_v19, %v1647_v36 }
 0x5c8   :  { %v1660_v39 = vmul.f32 1.442695, %v1655_v37 }
 0x5c9   :  { %v1650_v40 = vpop.xlane.xlu0 %1649 }
 0x5ca   :  { %2321 = vpow2.f32 %v1660_v39  ;;  %v1656_v41 = vsub.f32 %v1640_v26, %v1650_v40 }
 0x5cc   :  { %v1662_v31 = vmul.f32 1.442695, %v1656_v41 }
 0x5cd   :  { %v1653_v49 = vpop.xlane.xlu0 %1652 }
 0x5ce   :  { %2323 = vpow2.f32 %v1662_v31  ;;  %v1657_v50 = vsub.f32 %v1641_v17, %v1653_v49  ;;  %v2046_v31 = vld [vmem:[%s2763_s8] ss:$0 sm:$0xff] }
 0x5d0   :  { %v1664_v51 = vmul.f32 1.442695, %v1657_v50 }
 0x5d2   :  { %2325 = vpow2.f32 %v1664_v51 }
 0x5d3   :  { %v2320_v42 = vpop.eup %2319 }
 0x5d4   :  { %v1666_v43 = vsel %vm1182_vm12, %v2320_v42, 0.0 }
 0x5d5   :  { %1667 = vadd.xlane.f32.xlu0 %v1666_v43 }
 0x5d7   :  { %v2322_v44 = vpop.eup %2321 }
 0x5d8   :  { %v1669_v45 = vsel %vm1182_vm12, %v2322_v44, 0.0 }
 0x5d9   :  { %1670 = vadd.xlane.f32.xlu1 %v1669_v45  ;;  %v2335_v45 = vld [vmem:[%s2755_s0 + $0x10] sm:$0xff] }
 0x5db   :  { %v2324_v46 = vpop.eup %2323 }
 0x5dc   :  { %v1672_v47 = vsel %vm1182_vm12, %v2324_v46, 0.0 }
 0x5dd   :  { %1673 = vadd.xlane.f32.xlu0 %v1672_v47 }
 0x5df   :  { %v2326_v54 = vpop.eup %2325 }
 0x5e0   :  { %v1675_v56 = vsel %vm1182_vm12, %v2326_v54, 0.0 }
 0x5ea   :  { %1738 = vrot.lane.b32.xlu1 %v2573_v52, %s2362_s24 }
 0x5ee   :  { %1786 = vrot.lane.b32.xlu1 %v2576_v53, %s2362_s24 }
 0x5f3   :  { %1690 = vrot.lane.b32.xlu0 %v2570_v48, %s2362_s24 }
 0x612   :  { %1676 = vadd.xlane.f32.xlu1 %v1675_v56 }
 0x623   :  { %1834 = vrot.lane.b32.xlu1 %v2579_v55, %s2362_s24 }
 0x65e   :  { %v1668_v57 = vpop.xlane.xlu0 %1667 }
 0x65f   :  { %2327 = vrcp.f32 %v1668_v57 }
 0x662   :  { %v1671_v58 = vpop.xlane.xlu1 %1670 }
 0x663   :  { %2329 = vrcp.f32 %v1671_v58 }
 0x666   :  { %v1739_v59 = vpop.permute.xlu1 %1738  ;;  %v1674_v52 = vpop.xlane.xlu0 %1673 }
 0x667   :  { %v1744_v53 = vsel %vm1236_vm15, %v1739_v59, 0  ;;  %2331 = vrcp.f32 %v1674_v52 }
 0x668   :  { %2247 = vmatpush3.bf16.msra.mxu0 %v1744_v53 }
 0x669   :  { %2258 = vmatprep.subr.bf16.mxu0 %v2355_v38 }
 0x66a   :  { %v1691_v48 = vpop.permute.xlu0 %1690  ;;  %v1787_v63 = vpop.permute.xlu1 %1786 }
 0x66b   :  { %v1696_v61 = vsel %vm1236_vm15, %v1691_v48, 0  ;;  %v1792_v2 = vsel %vm1236_vm15, %v1787_v63, 0 }
 0x66c   :  { %v2328_v62 = vpop.eup %2327  ;;  %2241 = vmatpush3.bf16.msra.mxu1 %v1696_v61 }
 0x66d   :  { %2252 = vmatprep.subr.bf16.mxu1 %v2355_v38  ;;  %v1682_v55 = vmul.f32 %v2328_v62, %v2320_v42 }
 0x66f   :  { %v1686_v0 = vpack.c.bf16 %v1682_v55, %v1682_v55 }
 0x670   :  { %v2330_v1 = vpop.eup %2329 }
 0x671   :  { %2243 = vmatmul.mubr.msk.bf16.vlgmr.msra.gmra.mxu1 %vm1182_vm12, %v1686_v0  ;;  %v1683_v3 = vmul.f32 %v2330_v1, %v2322_v44 }
 0x672   :  { %2253 = vmatpush3.bf16.msra.mxu1 %v1792_v2  ;;  %2254 = vmatprep.mubr.msk.bf16.mxu1 %vm2356_vm4, %v2355_v38 }
 0x673   :  { %v1687_v4 = vpack.c.bf16 %v1683_v3, %v1683_v3  ;;  %2264 = vmatprep.subr.bf16.mxu1 %v2285_v7 }
 0x674   :  { %v2332_v5 = vpop.eup %2331 }
 0x675   :  { %2249 = vmatmul.mubr.msk.bf16.vlgmr.msra.gmra.mxu0 %vm1182_vm12, %v1687_v4  ;;  %v1684_v6 = vmul.f32 %v2332_v5, %v2324_v46 }
 0x676   :  { %2260 = vmatprep.mubr.msk.bf16.mxu0 %vm2356_vm4, %v2355_v38 }
 0x677   :  { %v1688_v8 = vpack.c.bf16 %v1684_v6, %v1684_v6 }
 0x679   :  { %2255 = vmatmul.mubr.msk.bf16.vlgmr.msra.gmra.mxu1 %vm1182_vm12, %v1688_v8 }
 0x67a   :  { %2265 = vmatpush3.bf16.msra.mxu1 %v2285_v7 }
 0x67b   :  { %2266 = vmatprep.subr.bf16.mxu1 %v2286_v30 }
 0x67e   :  { %2267 = vmatpush3.bf16.msra.mxu1 %v2286_v30 }
 0x69b   :  { %v1677_v9 = vpop.xlane.xlu1 %1676 }
 0x69c   :  { %2333 = vrcp.f32 %v1677_v9 }
 0x69f   :  { %v1835_v10 = vpop.permute.xlu1 %1834 }
 0x6a0   :  { %v1840_v13 = vsel %vm1236_vm15, %v1835_v10, 0 }
 0x6a1   :  { %2259 = vmatpush3.bf16.msra.mxu0 %v1840_v13 }
 0x6a9   :  { %v2334_v15 = vpop.eup %2333 }
 0x6aa   :  { %v1685_v16 = vmul.f32 %v2334_v15, %v2326_v54 }
 0x6ac   :  { %v1689_v19 = vpack.c.bf16 %v1685_v16, %v1685_v16 }
 0x6ae   :  { %2261 = vmatmul.mubr.msk.bf16.vlgmr.msra.gmra.mxu0 %vm1182_vm12, %v1689_v19 }
 0x731   :  { %v1732_v20 = vpop.f32.mrf.mxu1 }
 0x732   :  { %1886 = vrot.lane.b32.xlu0 %v1732_v20, %s2363_s25 }
 0x733   :  { %v2244_v21 = vpop.f32.mrf.mxu1 }
 0x735   :  { %v1735_v22 = vpop.f32.mrf.mxu1  ;;  %v1780_v38 = vpop.f32.mrf.mxu0 }
 0x736   :  { %1888 = vrot.lane.b32.xlu1 %v1780_v38, %s2363_s25 }
 0x737   :  { %v2245_v23 = vpop.f32.mrf.mxu1  ;;  %v2250_v60 = vpop.f32.mrf.mxu0 }
 0x739   :  { %v1783_v24 = vpop.f32.mrf.mxu0  ;;  %v1828_v25 = vpop.f32.mrf.mxu1 }
 0x73a   :  { %1890 = vrot.lane.b32.xlu0 %v1828_v25, %s2363_s25 }
 0x73b   :  { %v2251_v26 = vpop.f32.mrf.mxu0  ;;  %v2256_v27 = vpop.f32.mrf.mxu1 }
 0x73d   :  { %v1831_v28 = vpop.f32.mrf.mxu1 }
 0x73f   :  { %v2257_v29 = vpop.f32.mrf.mxu1 }
 0x76e   :  { %v1876_v12 = vpop.f32.mrf.mxu0 }
 0x76f   :  { %1892 = vrot.lane.b32.xlu1 %v1876_v12, %s2363_s25 }
 0x770   :  { %v2262_v11 = vpop.f32.mrf.mxu0 }
 0x772   :  { %v1879_v17 = vpop.f32.mrf.mxu0 }
 0x774   :  { %v2263_v32 = vpop.f32.mrf.mxu0 }
 0x7a4   :  { %v1887_v33 = vpop.permute.xlu0 %1886 }
 0x7a5   :  { %1899 = vst.msk [vmem:[#allocation2] sm:$0xff] %vm1898_vm0, %v1887_v33 }
 0x7a8   :  { %v1889_v34 = vpop.permute.xlu1 %1888 }
 0x7a9   :  { %1900 = vst.msk [vmem:[#allocation2 + $0x8] sm:$0xff] %vm1898_vm0, %v1889_v34 }
 0x7ac   :  { %v1891_v14 = vpop.permute.xlu0 %1890  ;;  %v1903_v18 = vld [vmem:[#allocation2] sm:$0xff] }
 0x7ad   :  { %1901 = vst.msk [vmem:[#allocation2 + $0x10] sm:$0xff] %vm1898_vm0, %v1891_v14 }
 0x7b0   :  { %v1904_v35 = vld [vmem:[#allocation2 + $0x8] sm:$0xff] }
 0x7b1   :  { %v1907_v36 = vpack.c.bf16 %v1904_v35, %v1903_v18 }
 0x7b3   :  { %2268 = vmatprep.mubr.msk.bf16.mxu1 %vm61_vm3, %v1907_v36 }
 0x7b4   :  { %v1905_v39 = vld [vmem:[#allocation2 + $0x10] sm:$0xff] }
 0x7e1   :  { %v1893_v37 = vpop.permute.xlu1 %1892 }
 0x7e2   :  { %1902 = vst.msk [vmem:[#allocation2 + $0x18] sm:$0xff] %vm1898_vm0, %v1893_v37 }
 0x7e9   :  { %v1906_v40 = vld [vmem:[#allocation2 + $0x18] sm:$0xff] }
 0x7ea   :  { %v1908_v41 = vpack.c.bf16 %v1906_v40, %v1905_v39 }
 0x7ec   :  { %2269 = vmatmul.mubr.msk.bf16.vlgmr.msra.gmra.mxu1 %vm61_vm3, %v1908_v41 }
 0x8ac   :  { %v2270_v42 = vpop.f32.mrf.mxu1 }
 0x8ad   :  { %v1981_v43 = vadd.f32 %v2270_v42, %v2046_v31 }
 0x8ae   :  { %v1972_v44 = vpop.f32.mrf.mxu1 }
 0x8af   :  { %v1989_v46 = vadd.f32 %v2335_v45, %v1981_v43  ;;  %v1973_v47 = vadd.f32 %v2046_v31, %v1972_v44 }
 0x8b0   :  { %v2271_v49 = vpop.f32.mrf.mxu1 }
 0x8b1   :  { %1993 = vst.msk [vmem:[%s2765_s10 + $0x10] sm:$0xff] %vm61_vm3, %v1989_v46  ;;  %v1984_v54 = vadd.f32 %v2271_v49, %v2046_v31 }
 0x8b2   :  { %v1975_v56 = vpop.f32.mrf.mxu1 }
 0x8b3   :  { %v1976_v59 = vadd.f32 %v2046_v31, %v1975_v56 }
 0x8b8   :  { %v2336_v50 = vld [vmem:[%s2755_s0] sm:$0xff] }
 0x8b9   :  { %v1987_v51 = vadd.f32 %v2336_v50, %v1973_v47 }
 0x8bb   :  { %1991 = vst.msk [vmem:[%s2765_s10] sm:$0xff] %vm61_vm3, %v1987_v51 }
 0x8c2   :  { %v2337_v57 = vld [vmem:[%s2755_s0 + $0x18] sm:$0xff] }
 0x8c3   :  { %v1990_v58 = vadd.f32 %v2337_v57, %v1984_v54 }
 0x8c5   :  { %1994 = vst.msk [vmem:[%s2765_s10 + $0x18] sm:$0xff] %vm61_vm3, %v1990_v58 }
 0x8cc   :  { %v2338_v52 = vld [vmem:[%s2755_s0 + $0x8] sm:$0xff] }
 0x8cd   :  { %v1988_v53 = vadd.f32 %v2338_v52, %v1976_v59 }
 0x8cf   :  { %1992 = vst.msk [vmem:[%s2765_s10 + $0x8] sm:$0xff] %vm61_vm3, %v1988_v53 }
 0x8d0   :  { %1999 = vsyncpa [#allocation4], 1 }

// kernel: _lambda_.21
= control target key start
LH: loop header
LB: loop body
LE: loop exit
PB: predicated region body
PF: predicated region fallthrough
CT: control target
= control target key end

     0   :  { %s383_s12 = smov 0   ;;  %s419_s0 = inlined_call_operand.vmem [shape: f32[64,16], index: 0, kind: input, shape index: {}]   ;;  %s420_s1 = inlined_call_operand.vmem [shape: f32[64,16], index: 1, kind: input, shape index: {}]   ;;  %s421_s2 = inlined_call_operand.vmem [shape: f32[1,16], index: 2, kind: input, shape index: {}]   ;;  %s422_s3 = inlined_call_operand.vmem [shape: f32[64,16], index: 3, kind: output, shape index: {}]  }
   0x1 LB: > { %s325_s13 = sadd.s32 4294967295, %s361_s12   ;;  %p329_p0 = scmp.ge.s32.totalorder %s361_s12, 1  ;;  %s361_s12 = sphi %s383_s12, %s13_s12  }
   0x2   : > { %p149_p1 = scmp.lt.s32.totalorder %s361_s12, 3 }
   0x4   : > { %p150_p2 = pnand %p329_p0, %p149_p1 }
   0x5   : > { %s330_s14 = sshll.u32 (!%p150_p2), %s325_s13, 2 }
   0x6   : > { %153 = sbr.rel (%p150_p2) target bundleno = 187 (0xbb), region = 32  ;;  %p179_p3 = scmp.lt.s32.totalorder (!%p150_p2), %s330_s14, 7 }
   0xb   : > { %s424_s14 = smov (!%p179_p3, %s330_s14), 7  ;;  %vm212_vm0 = vcmask 130048   ;;  %v336_v33 = vld [vmem:[%s421_s2] ss:$0 sm:$0xff] }
   0xc   : > { %s391_s15 = sshll.u32 %s424_s14, 3 }
   0xd   : > { %s182_s18 = scalar_lea.vmem %s419_s0, %s391_s15  ;;  %s188_s21 = scalar_lea.vmem %s420_s1, %s391_s15 }
   0xe   : > { %v196_v0 = vld [vmem:[%s182_s18] sm:$0xff]  ;;  %v198_v2 = vld [vmem:[%s182_s18 + $0x10] sm:$0xff]  ;;  %v197_v5 = vld [vmem:[%s182_s18 + $0x8] sm:$0xff]  ;;  %s194_s26 = scalar_lea.vmem %s422_s3, %s391_s15 }
   0xf   : > { %v200_v1 = vld [vmem:[%s188_s21] sm:$0xff]  ;;  %v202_v4 = vld [vmem:[%s188_s21 + $0x10] sm:$0xff]  ;;  %v201_v6 = vld [vmem:[%s188_s21 + $0x8] sm:$0xff] }
  0x10   : > { %v204_v3 = vadd.f32 %v200_v1, %v196_v0  ;;  %v206_v7 = vadd.f32 %v202_v4, %v198_v2  ;;  %v205_v8 = vadd.f32 %v201_v6, %v197_v5  ;;  %v199_v9 = vld [vmem:[%s182_s18 + $0x18] sm:$0xff] }
  0x11   : > { %v203_v10 = vld [vmem:[%s188_s21 + $0x18] sm:$0xff] }
  0x12   : > { %v208_v11 = vmul.f32 %v204_v3, %v204_v3  ;;  %v207_v12 = vadd.f32 %v203_v10, %v199_v9  ;;  %v210_v13 = vmul.f32 %v206_v7, %v206_v7  ;;  %v209_v14 = vmul.f32 %v205_v8, %v205_v8 }
  0x14   : > { %v213_v15 = vsel %vm212_vm0, %v208_v11, 0.0  ;;  %v211_v16 = vmul.f32 %v207_v12, %v207_v12  ;;  %v219_v17 = vsel %vm212_vm0, %v210_v13, 0.0  ;;  %v216_v18 = vsel %vm212_vm0, %v209_v14, 0.0 }
  0x15   : > { %214 = vadd.xlane.f32.xlu0 %v213_v15  ;;  %220 = vadd.xlane.f32.xlu1 %v219_v17 }
  0x16   : > { %v222_v19 = vsel %vm212_vm0, %v211_v16, 0.0 }
  0x19   : > { %217 = vadd.xlane.f32.xlu0 %v216_v18  ;;  %223 = vadd.xlane.f32.xlu1 %v222_v19 }
  0x9e   : > { %v215_v20 = vpop.xlane.xlu0 %214  ;;  %v221_v22 = vpop.xlane.xlu1 %220 }
  0x9f   : > { %v226_v21 = vmul.f32 0.0625, %v215_v20  ;;  %v228_v23 = vmul.f32 0.0625, %v221_v22 }
  0xa1   : > { %v230_v24 = vadd.f32 1.1920929e-07, %v226_v21  ;;  %v232_v25 = vadd.f32 1.1920929e-07, %v228_v23 }
  0xa2   : > { %v218_v26 = vpop.xlane.xlu0 %217  ;;  %v224_v28 = vpop.xlane.xlu1 %223 }
  0xa3   : > { %347 = vrsqrt.f32 %v230_v24  ;;  %v227_v27 = vmul.f32 0.0625, %v218_v26  ;;  %v229_v29 = vmul.f32 0.0625, %v224_v28 }
  0xa4   : > { %349 = vrsqrt.f32 %v232_v25 }
  0xa5   : > { %v231_v30 = vadd.f32 1.1920929e-07, %v227_v27  ;;  %v233_v31 = vadd.f32 1.1920929e-07, %v229_v29 }
  0xa7   : > { %351 = vrsqrt.f32 %v231_v30 }
  0xa8   : > { %353 = vrsqrt.f32 %v233_v31 }
  0xb0   : > { %v348_v32 = vpop.eup %347 }
  0xb1   : > { %v350_v34 = vpop.eup %349  ;;  %v238_v35 = vmul.f32 %v348_v32, %v204_v3 }
  0xb2   : > { %v240_v38 = vmul.f32 %v350_v34, %v206_v7 }
  0xb3   : > { %v249_v36 = vmul.f32 %v336_v33, %v238_v35 }
  0xb4   : > { %v352_v37 = vpop.eup %351  ;;  %v251_v43 = vmul.f32 %v336_v33, %v240_v38 }
  0xb5   : > { %v354_v39 = vpop.eup %353  ;;  %253 = vst.msk [vmem:[%s194_s26] sm:$0xff] %vm212_vm0, %v249_v36  ;;  %v239_v40 = vmul.f32 %v352_v37, %v205_v8 }
  0xb6   : > { %v241_v41 = vmul.f32 %v354_v39, %v207_v12  ;;  %255 = vst.msk [vmem:[%s194_s26 + $0x10] sm:$0xff] %vm212_vm0, %v251_v43 }
  0xb7   : > { %v250_v42 = vmul.f32 %v336_v33, %v239_v40 }
  0xb8   : > { %v252_v44 = vmul.f32 %v336_v33, %v241_v41 }
  0xb9   : > { %254 = vst.msk [vmem:[%s194_s26 + $0x8] sm:$0xff] %vm212_vm0, %v250_v42 }
  0xba   : > { %256 = vst.msk [vmem:[%s194_s26 + $0x18] sm:$0xff] %vm212_vm0, %v252_v44 }
  0xbb PF: > { %s13_s12 = sadd.s32 1, %s361_s12  }
  0xbc   : > { %p10_p4 = scmp.ge.s32.totalorder %s13_s12, 4  }
  0xbe   :  { %12 = sbr.rel (!%p10_p4) target bundleno = 1 (0x1), region = 65 }

</bundles_post_ra>
